<compile_context>
chip_gen: v6e
topology: v6e:2x2x1
jax: 0.10.0
libtpu: 0.0.40
codegen_flags: <defaults>
</compile_context>

<pallas_src>
import jax
import jax.numpy as jnp
from jax import lax
from jax.experimental import pallas as pl
from jax.experimental.pallas import tpu as pltpu

LANE = 128
SUBLANE = 8


def _round_up(x, m):
    return (x + m - 1) // m * m


def _pad_cols(a, target):
    if a.shape[-1] == target:
        return a
    pad = [(0, 0)] * (a.ndim - 1) + [(0, target - a.shape[-1])]
    return jnp.pad(a, pad)


# ---------------------------------------------------------------------------
# Kernel body: all LSTM layers + fc head for one batch block
# ---------------------------------------------------------------------------
def _lstm_body(x_ref, wih0_ref, wih_rest_ref, whh_ref, b_ref, fcw_ref, fcb_ref,
               out_ref, gates_scr, seq_scr, *, num_layers, b_blk, hidden,
               gate_w, t_chunk, n_chunks, unroll):
    """
    x_ref      : (T*Bblk, Din)       layer-0 input, time-major within the block
    wih0_ref   : (Din, G)            layer-0 input weights (pre-transposed, padded)
    wih_rest_ref: (L-1, H, G) | None input weights of layers 1..L-1
    whh_ref    : (L, H, G)           recurrent weights
    b_ref      : (L, 1, G)           combined b_ih + b_hh per layer
    fcw_ref    : (H, Op), fcb_ref: (1, Op)
    out_ref    : (Bblk, Op)          fc output (only thing written to HBM)
    gates_scr  : (t_chunk*Bblk, G) f32  chunked, hoisted input-projection gates
    seq_scr    : (T*Bblk, H) | None  inter-layer hidden sequence (VMEM only)
    """
    f32 = jnp.float32
    H = hidden
    rows_c = t_chunk * b_blk

    # Per-lane gate mask (g-gate = lanes [2H, 3H)); built once per kernel body.
    lane = lax.broadcasted_iota(jnp.int32, (b_blk, gate_w), 1)
    g_mask = (lane >= 2 * H) & (lane < 3 * H)

    h_last = None
    for layer in range(num_layers):
        last = layer == num_layers - 1
        store_seq = not last                        # last layer: only h_T is needed
        in_ref = x_ref if layer == 0 else seq_scr   # inter-layer seq stays in VMEM

        def chunk_step(ck, carry, _layer=layer, _in_ref=in_ref, _store=store_seq):
            h, c = carry
            crow = ck * rows_c
            if not isinstance(crow, int):
                crow = pl.multiple_of(crow, rows_c)
            # Hoisted input projection for this time chunk: one MXU matmul covering
            # t_chunk timesteps; only h @ W_hh stays inside the serial loop.
            w_in = wih0_ref[...] if _layer == 0 else wih_rest_ref[_layer - 1]
            x_chunk = _in_ref[pl.ds(crow, rows_c), :]
            gates_scr[...] = (
                jnp.dot(x_chunk, w_in, preferred_element_type=f32) + b_ref[_layer])

            def t_step(tl, carry2):
                h2, c2 = carry2
                base = pl.multiple_of(tl * b_blk, b_blk)
                w_hh = whh_ref[_layer]
                pre = gates_scr[pl.ds(base, b_blk), :] + jnp.dot(
                    h2.astype(w_hh.dtype), w_hh, preferred_element_type=f32)
                # One EUP (tanh) pass over all four gates:
                #   sigmoid(x) = 0.5*(tanh(x/2)+1); g-gate lanes keep plain tanh.
                z = jnp.tanh(jnp.where(g_mask, pre, 0.5 * pre))
                act = jnp.where(g_mask, z, 0.5 * z + 0.5)
                i_g = act[:, 0 * H:1 * H]
                f_g = act[:, 1 * H:2 * H]
                g_g = act[:, 2 * H:3 * H]
                o_g = act[:, 3 * H:4 * H]
                c_n = f_g * c2 + i_g * g_g
                h_n = o_g * jnp.tanh(c_n)
                if _store:
                    row = crow + base
                    if not isinstance(row, int):
                        row = pl.multiple_of(row, b_blk)
                    seq_scr[pl.ds(row, b_blk), :] = h_n.astype(seq_scr.dtype)
                return h_n, c_n

            return lax.fori_loop(0, t_chunk, t_step, (h, c), unroll=unroll)

        h0 = jnp.zeros((b_blk, H), f32)
        c0 = jnp.zeros((b_blk, H), f32)
        if n_chunks == 1:
            h_last, _ = chunk_step(0, (h0, c0))
        else:
            h_last, _ = lax.fori_loop(0, n_chunks, chunk_step, (h0, c0))

    # Dropout(0.5) is identity at inference.  Fused fc epilogue on the final hidden
    # state only; lane-dense (Bblk, Op) output store.
    fcw = fcw_ref[...]
    out_ref[...] = (jnp.dot(h_last.astype(fcw.dtype), fcw,
                            preferred_element_type=f32) + fcb_ref[...])


def _make_kernel(multi_layer, **cfg):
    if multi_layer:
        def kernel(x_ref, wih0, wih_rest, whh, b, fcw, fcb, out, gates, seq):
            _lstm_body(x_ref, wih0, wih_rest, whh, b, fcw, fcb, out, gates, seq,
                       **cfg)
    else:
        def kernel(x_ref, wih0, whh, b, fcw, fcb, out, gates):
            _lstm_body(x_ref, wih0, None, whh, b, fcw, fcb, out, gates, None,
                       **cfg)
    return kernel


# ---------------------------------------------------------------------------
# Wrapper
# ---------------------------------------------------------------------------
def lstm_model_forward(x, params, *, compute_dtype=jnp.bfloat16, time_chunk=None):
    """x: (B, T, input_size) -> (B, output_size).

    compute_dtype controls only the MXU operand dtype (weights / x / inter-layer
    hidden seq); gates, cell state and accumulation stay float32.  bf16 (default)
    hits the native MXU fast path; pass jnp.float32 for PyTorch-matching numerics.
    time_chunk (optional) caps the in-kernel time-chunk length (testing knob).
    """
    B, T, Din = x.shape
    lstm_params = params["lstm"]
    L = len(lstm_params)
    H = lstm_params[0][1].shape[1]                   # w_hh: (4H, H)
    O = params["fc_w"].shape[0]
    f32 = jnp.float32

    G = _round_up(4 * H, LANE)      # total gate width padded (NOT per-gate)
    Op = _round_up(O, LANE)         # lane-dense fc output

    # ---- hardware-aware sizing ----------------------------------------------
    try:
        vmem_cap = int(pltpu.get_tpu_info().vmem_capacity_bytes)
    except Exception:
        vmem_cap = 64 * 1024 * 1024
    vmem_limit = int(vmem_cap * 0.8)        # headroom for compiler scratch / DMAs

    try:
        kind = jax.devices()[0].device_kind.lower()
        big_mxu = not any(t in kind for t in ("v2", "v3", "v4", "v5"))
    except Exception:
        big_mxu = False

    # ---- batch block: >= 2 blocks whenever possible (feeds both v7x TCs);
    #      256-row tiles on 256x256-MXU chips (v6e/v7x) for large batches.
    Bp8 = _round_up(B, SUBLANE)
    cap = 256 if (big_mxu and B >= 256) else 128
    if B >= 16 and Bp8 <= 128:
        B_BLK = _round_up((B + 1) // 2, SUBLANE)
    else:
        B_BLK = min(Bp8, cap)
    NB = -(-B // B_BLK)
    Bp = NB * B_BLK

    # ---- VMEM-bounded time chunking of the hoisted input projection ---------
    gates_budget = max(2 << 20, vmem_limit // 4)
    bytes_per_t = B_BLK * G * 4                      # f32 gate rows per timestep
    max_tc = max(1, gates_budget // bytes_per_t)
    if time_chunk is not None:
        max_tc = max(1, min(max_tc, int(time_chunk)))
    if T <= max_tc:
        T_CHUNK = T
    else:
        T_CHUNK = max(d for d in range(1, max_tc + 1) if T % d == 0)
    N_CHUNKS = T // T_CHUNK

    live_words = B_BLK * (2 * H + G)                 # ~live f32 words per step
    unroll = 8 if live_words <= 4096 else 2
    unroll = max(1, min(unroll, T_CHUNK))

    # ---- one-time parameter prep: transpose, pad the 4H gate axis, stack ----
    wih0, wih_rest, whh_all, b_all = None, [], [], []
    for li, (w_ih, w_hh, b_ih, b_hh) in enumerate(lstm_params):
        w_ih_t = _pad_cols(w_ih.T.astype(f32), G)              # (Din|H, G)
        w_hh_t = _pad_cols(w_hh.T.astype(f32), G)              # (H, G)
        bias = _pad_cols((b_ih + b_hh).astype(f32).reshape(1, -1), G)
        if li == 0:
            wih0 = w_ih_t
        else:
            wih_rest.append(w_ih_t)
        whh_all.append(w_hh_t)
        b_all.append(bias)
    whh_all = jnp.stack(whh_all)                               # (L, H, G)
    b_all = jnp.stack(b_all)                                   # (L, 1, G)
    fc_w = _pad_cols(params["fc_w"].T.astype(f32), Op)         # (H, Op)
    fc_b = _pad_cols(params["fc_b"].astype(f32).reshape(1, -1), Op)

    wih0 = wih0.astype(compute_dtype)
    whh_all = whh_all.astype(compute_dtype)
    fc_w = fc_w.astype(compute_dtype)
    if L > 1:
        wih_rest = jnp.stack(wih_rest).astype(compute_dtype)   # (L-1, H, G)

    # ---- layer-0 input: batch blocks leading, time-major within each block --
    # TODO(synk): express this relayout through the BlockSpec index_map (or a
    # time-chunk grid axis) instead of materializing a re-laid-out copy of x.
    x_t = jnp.transpose(x, (1, 0, 2)).astype(compute_dtype)    # (T, B, Din)
    x_t = jnp.pad(x_t, ((0, 0), (0, Bp - B), (0, 0)))          # (T, Bp, Din)
    x_blk = (x_t.reshape(T, NB, B_BLK, Din)
             .transpose(1, 0, 2, 3)
             .reshape(NB, T * B_BLK, Din))                     # row = t*B_BLK + j

    weight_args = ([wih0] + ([wih_rest] if L > 1 else [])
                   + [whh_all, b_all, fc_w, fc_b])
    scratch = [pltpu.VMEM((T_CHUNK * B_BLK, G), f32)]          # chunked gates
    if L > 1:
        # TODO(synk): spill to HBM with a pipelined time grid if the inter-layer
        # sequence ever exceeds the VMEM budget (extreme T); fine at typical shapes.
        scratch.append(pltpu.VMEM((T * B_BLK, H), compute_dtype))

    kernel = _make_kernel(L > 1, num_layers=L, b_blk=B_BLK, hidden=H, gate_w=G,
                          t_chunk=T_CHUNK, n_chunks=N_CHUNKS, unroll=unroll)

    def _call(single_buffer_weights):
        def wspec(a):
            idx = lambda b, _n=a.ndim: (0,) * _n
            if single_buffer_weights:
                # grid-invariant weights: single-buffer -> halves their VMEM use
                return pl.BlockSpec(a.shape, idx, pipeline_mode=pl.Buffered(1))
            return pl.BlockSpec(a.shape, idx)

        return pl.pallas_call(
            kernel,
            out_shape=jax.ShapeDtypeStruct((Bp, Op), f32),
            grid=(NB,),
            in_specs=[pl.BlockSpec((None, T * B_BLK, Din), lambda b: (b, 0, 0))]
                     + [wspec(a) for a in weight_args],
            out_specs=pl.BlockSpec((B_BLK, Op), lambda b: (b, 0)),
            scratch_shapes=scratch,
            compiler_params=pltpu.CompilerParams(
                dimension_semantics=("parallel",),     # batch blocks -> TensorCores
                vmem_limit_bytes=vmem_limit),
        )(x_blk, *weight_args)

    if hasattr(pl, "Buffered"):
        try:
            out_padded = _call(True)
        except Exception:          # older / stricter pipeline_mode support
            out_padded = _call(False)
    else:
        out_padded = _call(False)

    return out_padded[:B, :O]


# ---------------------------------------------------------------------------
# Deterministic parameter init (shapes match nn.LSTM / nn.Linear)
# ---------------------------------------------------------------------------
def init_params(key, input_size, hidden_size, num_layers, output_size):
    bound = 1.0 / jnp.sqrt(hidden_size)
    params = {"lstm": []}
    for layer in range(num_layers):
        d_in = input_size if layer == 0 else hidden_size
        key, k1, k2, k3, k4 = jax.random.split(key, 5)
        w_ih = jax.random.uniform(k1, (4 * hidden_size, d_in),
                                  minval=-bound, maxval=bound, dtype=jnp.float32)
        w_hh = jax.random.uniform(k2, (4 * hidden_size, hidden_size),
                                  minval=-bound, maxval=bound, dtype=jnp.float32)
        b_ih = jax.random.uniform(k3, (4 * hidden_size,),
                                  minval=-bound, maxval=bound, dtype=jnp.float32)
        b_hh = jax.random.uniform(k4, (4 * hidden_size,),
                                  minval=-bound, maxval=bound, dtype=jnp.float32)
        params["lstm"].append((w_ih, w_hh, b_ih, b_hh))
    key, k5, k6 = jax.random.split(key, 3)
    fb = 1.0 / jnp.sqrt(hidden_size)
    params["fc_w"] = jax.random.uniform(k5, (output_size, hidden_size),
                                        minval=-fb, maxval=fb, dtype=jnp.float32)
    params["fc_b"] = jax.random.uniform(k6, (output_size,),
                                        minval=-fb, maxval=fb, dtype=jnp.float32)
    return params


# Pure-JAX reference (correctness check only)
def reference_forward(x, params):
    B = x.shape[0]
    h_seq = x
    for (w_ih, w_hh, b_ih, b_hh) in params["lstm"]:
        H = w_hh.shape[1]
        h = jnp.zeros((B, H), jnp.float32)
        c = jnp.zeros((B, H), jnp.float32)

        def step(carry, x_t):
            h, c = carry
            g = x_t @ w_ih.T + b_ih + h @ w_hh.T + b_hh
            i = jax.nn.sigmoid(g[:, 0 * H:1 * H])
            f = jax.nn.sigmoid(g[:, 1 * H:2 * H])
            gg = jnp.tanh(g[:, 2 * H:3 * H])
            o = jax.nn.sigmoid(g[:, 3 * H:4 * H])
            c = f * c + i * gg
            h = o * jnp.tanh(c)
            return (h, c), h

        (_, _), hs = lax.scan(step, (h, c), jnp.transpose(h_seq, (1, 0, 2)))
        h_seq = jnp.transpose(hs, (1, 0, 2))
    h_last = h_seq[:, -1, :]
    return h_last @ params["fc_w"].T + params["fc_b"]


if __name__ == "__main__":
    input_size, hidden_size, num_layers, output_size = 8, 32, 2, 4
    seq = 8

    key = jax.random.PRNGKey(0)
    kp, kx1, kx2 = jax.random.split(key, 3)
    params = init_params(kp, input_size, hidden_size, num_layers, output_size)

    # --- small canonical shape (batch=2), f32 MXU operands, tight check ------
    x = jax.random.normal(kx1, (2, seq, input_size), dtype=jnp.float32)
    ref = reference_forward(x, params)
    out = jax.block_until_ready(
        lstm_model_forward(x, params, compute_dtype=jnp.float32))
    assert out.shape == (2, output_size)
    assert jnp.allclose(out, ref, atol=1e-4, rtol=1e-4), \
        float(jnp.max(jnp.abs(out - ref)))

    # --- exercise the time-chunked gate-precompute path -----------------------
    out_ck = jax.block_until_ready(
        lstm_model_forward(x, params, compute_dtype=jnp.float32, time_chunk=2))
    assert jnp.allclose(out_ck, ref, atol=1e-4, rtol=1e-4), \
        float(jnp.max(jnp.abs(out_ck - ref)))

    # --- default bf16 MXU-operand fast path (f32 state/accumulation) ---------
    out_bf = jax.block_until_ready(lstm_model_forward(x, params))
    assert jnp.allclose(out_bf, ref, atol=1e-1, rtol=1e-1), \
        float(jnp.max(jnp.abs(out_bf - ref)))

    # --- multi-block grid (two batch blocks -> both v7x TensorCores) ---------
    xb = jax.random.normal(kx2, (20, seq, input_size), dtype=jnp.float32)
    refb = reference_forward(xb, params)
    outb = jax.block_until_ready(
        lstm_model_forward(xb, params, compute_dtype=jnp.float32))
    assert outb.shape == (20, output_size)
    assert jnp.allclose(outb, refb, atol=1e-4, rtol=1e-4), \
        float(jnp.max(jnp.abs(outb - refb)))

    print("KERNEL_OK")
</pallas_src>

<mosaic_0001>
module attributes {stable_mosaic.version = 11 : i64} {
  func.func @kernel(%arg0: i32, %arg1: memref<1x64x8xf32, #tpu.memory_space<vmem>>, %arg2: memref<8x128xf32, #tpu.memory_space<vmem>>, %arg3: memref<1x32x128xf32, #tpu.memory_space<vmem>>, %arg4: memref<2x32x128xf32, #tpu.memory_space<vmem>>, %arg5: memref<2x1x128xf32, #tpu.memory_space<vmem>>, %arg6: memref<32x128xf32, #tpu.memory_space<vmem>>, %arg7: memref<1x128xf32, #tpu.memory_space<vmem>>, %arg8: memref<8x128xf32, #tpu.memory_space<vmem>>, %arg9: memref<64x128xf32, #tpu.memory_space<vmem>>, %arg10: memref<64x32xf32, #tpu.memory_space<vmem>>) attributes {dimension_semantics = [#tpu.dimension_semantics<parallel>], iteration_bounds = array<i64: 1>, scalar_prefetch = 0 : i64, scratch_operands = 2 : i64, tpu.core_type = #tpu.core_type<tc>, window_params = [{transform_indices = @transform_0, window_bounds = array<i64: 1, 64, 8>}, {pipeline_mode = #tpu.pipeline_mode<synchronous>, transform_indices = @transform_1, window_bounds = array<i64: 8, 128>}, {pipeline_mode = #tpu.pipeline_mode<synchronous>, transform_indices = @transform_2, window_bounds = array<i64: 1, 32, 128>}, {pipeline_mode = #tpu.pipeline_mode<synchronous>, transform_indices = @transform_3, window_bounds = array<i64: 2, 32, 128>}, {pipeline_mode = #tpu.pipeline_mode<synchronous>, transform_indices = @transform_4, window_bounds = array<i64: 2, 1, 128>}, {pipeline_mode = #tpu.pipeline_mode<synchronous>, transform_indices = @transform_5, window_bounds = array<i64: 32, 128>}, {pipeline_mode = #tpu.pipeline_mode<synchronous>, transform_indices = @transform_6, window_bounds = array<i64: 1, 128>}, {transform_indices = @transform_7, window_bounds = array<i64: 8, 128>}]} {
    %0 = tpu.iota {dimensions = array<i32: 1>} : vector<8x128xi32>
    %c64_i32 = arith.constant 64 : i32
    %1 = vector.broadcast %c64_i32 : i32 to vector<8x128xi32>
    %2 = arith.cmpi sge, %0, %1 : vector<8x128xi32>
    %c96_i32 = arith.constant 96 : i32
    %3 = vector.broadcast %c96_i32 : i32 to vector<8x128xi32>
    %4 = arith.cmpi slt, %0, %3 : vector<8x128xi32>
    %5 = arith.andi %2, %4 : vector<8x128xi1>
    %cst = arith.constant 0.000000e+00 : f32
    %6 = vector.broadcast %cst : f32 to vector<8x32xf32>
    %cst_0 = arith.constant 0.000000e+00 : f32
    %7 = vector.broadcast %cst_0 : f32 to vector<8x32xf32>
    %c0 = arith.constant 0 : index
    %c0_1 = arith.constant 0 : index
    %8 = vector.load %arg2[%c0, %c0_1] : memref<8x128xf32, #tpu.memory_space<vmem>>, vector<8x128xf32>
    %c0_2 = arith.constant 0 : index
    %c0_3 = arith.constant 0 : index
    %c0_4 = arith.constant 0 : index
    %9 = vector.load %arg1[%c0_2, %c0_3, %c0_4] : memref<1x64x8xf32, #tpu.memory_space<vmem>>, vector<1x64x8xf32>
    %10 = vector.shape_cast %9 : vector<1x64x8xf32> to vector<64x8xf32>
    %cst_5 = arith.constant dense<0.000000e+00> : vector<64x128xf32>
    %11 = tpu.matmul %10, %8, %cst_5 {dimension_numbers = #tpu.dot_dimension_numbers<[1], [0], [0], [1], [0, 0, 1, 1], [], []>} : vector<64x8xf32>, vector<8x128xf32>, vector<64x128xf32> -> vector<64x128xf32>
    %c0_6 = arith.constant 0 : index
    %c0_7 = arith.constant 0 : index
    %c0_8 = arith.constant 0 : index
    %12 = vector.load %arg5[%c0_6, %c0_7, %c0_8] : memref<2x1x128xf32, #tpu.memory_space<vmem>>, vector<1x1x128xf32>
    %13 = vector.shape_cast %12 : vector<1x1x128xf32> to vector<1x128xf32>
    %14 = vector.broadcast %13 : vector<1x128xf32> to vector<64x128xf32>
    %15 = arith.addf %11, %14 : vector<64x128xf32>
    %c0_9 = arith.constant 0 : index
    %c0_10 = arith.constant 0 : index
    %16 = vector.load %arg9[%c0_9, %c0_10] : memref<64x128xf32, #tpu.memory_space<vmem>>, vector<64x128xf32>
    tpu.vector_store %arg9[%c0_9, %c0_10], %15 {strides = array<i32>} : memref<64x128xf32, #tpu.memory_space<vmem>>, vector<64x128xf32>,
    %c0_i32 = arith.constant 0 : i32
    %c8_i32 = arith.constant 8 : i32
    %17 = arith.muli %c0_i32, %c8_i32 : i32
    %18 = tpu.assume_multiple %17, 8 : i32
    %c0_11 = arith.constant 0 : index
    %c0_12 = arith.constant 0 : index
    %c0_13 = arith.constant 0 : index
    %19 = vector.load %arg4[%c0_11, %c0_12, %c0_13] : memref<2x32x128xf32, #tpu.memory_space<vmem>>, vector<1x32x128xf32>
    %20 = vector.shape_cast %19 : vector<1x32x128xf32> to vector<32x128xf32>
    %21 = arith.index_cast %18 : i32 to index
    %c0_14 = arith.constant 0 : index
    %22 = vector.load %arg9[%21, %c0_14] : memref<64x128xf32, #tpu.memory_space<vmem>>, vector<8x128xf32>
    %cst_15 = arith.constant dense<0.000000e+00> : vector<8x128xf32>
    %23 = tpu.matmul %6, %20, %cst_15 {dimension_numbers = #tpu.dot_dimension_numbers<[1], [0], [0], [1], [0, 0, 1, 1], [], []>} : vector<8x32xf32>, vector<32x128xf32>, vector<8x128xf32> -> vector<8x128xf32>
    %24 = arith.addf %22, %23 : vector<8x128xf32>
    %cst_16 = arith.constant 5.000000e-01 : f32
    %25 = vector.broadcast %cst_16 : f32 to vector<8x128xf32>
    %26 = arith.mulf %25, %24 : vector<8x128xf32>
    %27 = arith.select %5, %24, %26 : vector<8x128xi1>, vector<8x128xf32>
    %28 = math.tanh %27 : vector<8x128xf32>
    %cst_17 = arith.constant 5.000000e-01 : f32
    %29 = vector.broadcast %cst_17 : f32 to vector<8x128xf32>
    %30 = arith.mulf %29, %28 : vector<8x128xf32>
    %cst_18 = arith.constant 5.000000e-01 : f32
    %31 = vector.broadcast %cst_18 : f32 to vector<8x128xf32>
    %32 = arith.addf %30, %31 : vector<8x128xf32>
    %33 = arith.select %5, %28, %32 : vector<8x128xi1>, vector<8x128xf32>
    %34 = vector.extract_strided_slice %33 {offsets = [0, 0], sizes = [8, 32], strides = [1, 1]} : vector<8x128xf32> to vector<8x32xf32>
    %35 = vector.extract_strided_slice %33 {offsets = [0, 32], sizes = [8, 32], strides = [1, 1]} : vector<8x128xf32> to vector<8x32xf32>
    %36 = vector.extract_strided_slice %33 {offsets = [0, 64], sizes = [8, 32], strides = [1, 1]} : vector<8x128xf32> to vector<8x32xf32>
    %37 = vector.extract_strided_slice %33 {offsets = [0, 96], sizes = [8, 32], strides = [1, 1]} : vector<8x128xf32> to vector<8x32xf32>
    %38 = arith.mulf %35, %7 : vector<8x32xf32>
    %39 = arith.mulf %34, %36 : vector<8x32xf32>
    %40 = arith.addf %38, %39 : vector<8x32xf32>
    %41 = math.tanh %40 : vector<8x32xf32>
    %42 = arith.mulf %37, %41 : vector<8x32xf32>
    %c0_i32_19 = arith.constant 0 : i32
    %43 = arith.addi %c0_i32_19, %18 : i32
    %44 = tpu.assume_multiple %43, 8 : i32
    %45 = arith.index_cast %44 : i32 to index
    %c0_20 = arith.constant 0 : index
    %46 = vector.load %arg10[%45, %c0_20] : memref<64x32xf32, #tpu.memory_space<vmem>>, vector<8x32xf32>
    tpu.vector_store %arg10[%45, %c0_20], %42 {strides = array<i32>} : memref<64x32xf32, #tpu.memory_space<vmem>>, vector<8x32xf32>,
    %c1_i32 = arith.constant 1 : i32
    %c8_i32_21 = arith.constant 8 : i32
    %47 = arith.muli %c1_i32, %c8_i32_21 : i32
    %48 = tpu.assume_multiple %47, 8 : i32
    %c0_22 = arith.constant 0 : index
    %c0_23 = arith.constant 0 : index
    %c0_24 = arith.constant 0 : index
    %49 = vector.load %arg4[%c0_22, %c0_23, %c0_24] : memref<2x32x128xf32, #tpu.memory_space<vmem>>, vector<1x32x128xf32>
    %50 = vector.shape_cast %49 : vector<1x32x128xf32> to vector<32x128xf32>
    %51 = arith.index_cast %48 : i32 to index
    %c0_25 = arith.constant 0 : index
    %52 = vector.load %arg9[%51, %c0_25] : memref<64x128xf32, #tpu.memory_space<vmem>>, vector<8x128xf32>
    %cst_26 = arith.constant dense<0.000000e+00> : vector<8x128xf32>
    %53 = tpu.matmul %42, %50, %cst_26 {dimension_numbers = #tpu.dot_dimension_numbers<[1], [0], [0], [1], [0, 0, 1, 1], [], []>} : vector<8x32xf32>, vector<32x128xf32>, vector<8x128xf32> -> vector<8x128xf32>
    %54 = arith.addf %52, %53 : vector<8x128xf32>
    %cst_27 = arith.constant 5.000000e-01 : f32
    %55 = vector.broadcast %cst_27 : f32 to vector<8x128xf32>
    %56 = arith.mulf %55, %54 : vector<8x128xf32>
    %57 = arith.select %5, %54, %56 : vector<8x128xi1>, vector<8x128xf32>
    %58 = math.tanh %57 : vector<8x128xf32>
    %cst_28 = arith.constant 5.000000e-01 : f32
    %59 = vector.broadcast %cst_28 : f32 to vector<8x128xf32>
    %60 = arith.mulf %59, %58 : vector<8x128xf32>
    %cst_29 = arith.constant 5.000000e-01 : f32
    %61 = vector.broadcast %cst_29 : f32 to vector<8x128xf32>
    %62 = arith.addf %60, %61 : vector<8x128xf32>
    %63 = arith.select %5, %58, %62 : vector<8x128xi1>, vector<8x128xf32>
    %64 = vector.extract_strided_slice %63 {offsets = [0, 0], sizes = [8, 32], strides = [1, 1]} : vector<8x128xf32> to vector<8x32xf32>
    %65 = vector.extract_strided_slice %63 {offsets = [0, 32], sizes = [8, 32], strides = [1, 1]} : vector<8x128xf32> to vector<8x32xf32>
    %66 = vector.extract_strided_slice %63 {offsets = [0, 64], sizes = [8, 32], strides = [1, 1]} : vector<8x128xf32> to vector<8x32xf32>
    %67 = vector.extract_strided_slice %63 {offsets = [0, 96], sizes = [8, 32], strides = [1, 1]} : vector<8x128xf32> to vector<8x32xf32>
    %68 = arith.mulf %65, %40 : vector<8x32xf32>
    %69 = arith.mulf %64, %66 : vector<8x32xf32>
    %70 = arith.addf %68, %69 : vector<8x32xf32>
    %71 = math.tanh %70 : vector<8x32xf32>
    %72 = arith.mulf %67, %71 : vector<8x32xf32>
    %c0_i32_30 = arith.constant 0 : i32
    %73 = arith.addi %c0_i32_30, %48 : i32
    %74 = tpu.assume_multiple %73, 8 : i32
    %75 = arith.index_cast %74 : i32 to index
    %c0_31 = arith.constant 0 : index
    %76 = vector.load %arg10[%75, %c0_31] : memref<64x32xf32, #tpu.memory_space<vmem>>, vector<8x32xf32>
    tpu.vector_store %arg10[%75, %c0_31], %72 {strides = array<i32>} : memref<64x32xf32, #tpu.memory_space<vmem>>, vector<8x32xf32>,
    %c2_i32 = arith.constant 2 : i32
    %c8_i32_32 = arith.constant 8 : i32
    %77 = arith.muli %c2_i32, %c8_i32_32 : i32
    %78 = tpu.assume_multiple %77, 8 : i32
    %c0_33 = arith.constant 0 : index
    %c0_34 = arith.constant 0 : index
    %c0_35 = arith.constant 0 : index
    %79 = vector.load %arg4[%c0_33, %c0_34, %c0_35] : memref<2x32x128xf32, #tpu.memory_space<vmem>>, vector<1x32x128xf32>
    %80 = vector.shape_cast %79 : vector<1x32x128xf32> to vector<32x128xf32>
    %81 = arith.index_cast %78 : i32 to index
    %c0_36 = arith.constant 0 : index
    %82 = vector.load %arg9[%81, %c0_36] : memref<64x128xf32, #tpu.memory_space<vmem>>, vector<8x128xf32>
    %cst_37 = arith.constant dense<0.000000e+00> : vector<8x128xf32>
    %83 = tpu.matmul %72, %80, %cst_37 {dimension_numbers = #tpu.dot_dimension_numbers<[1], [0], [0], [1], [0, 0, 1, 1], [], []>} : vector<8x32xf32>, vector<32x128xf32>, vector<8x128xf32> -> vector<8x128xf32>
    %84 = arith.addf %82, %83 : vector<8x128xf32>
    %cst_38 = arith.constant 5.000000e-01 : f32
    %85 = vector.broadcast %cst_38 : f32 to vector<8x128xf32>
    %86 = arith.mulf %85, %84 : vector<8x128xf32>
    %87 = arith.select %5, %84, %86 : vector<8x128xi1>, vector<8x128xf32>
    %88 = math.tanh %87 : vector<8x128xf32>
    %cst_39 = arith.constant 5.000000e-01 : f32
    %89 = vector.broadcast %cst_39 : f32 to vector<8x128xf32>
    %90 = arith.mulf %89, %88 : vector<8x128xf32>
    %cst_40 = arith.constant 5.000000e-01 : f32
    %91 = vector.broadcast %cst_40 : f32 to vector<8x128xf32>
    %92 = arith.addf %90, %91 : vector<8x128xf32>
    %93 = arith.select %5, %88, %92 : vector<8x128xi1>, vector<8x128xf32>
    %94 = vector.extract_strided_slice %93 {offsets = [0, 0], sizes = [8, 32], strides = [1, 1]} : vector<8x128xf32> to vector<8x32xf32>
    %95 = vector.extract_strided_slice %93 {offsets = [0, 32], sizes = [8, 32], strides = [1, 1]} : vector<8x128xf32> to vector<8x32xf32>
    %96 = vector.extract_strided_slice %93 {offsets = [0, 64], sizes = [8, 32], strides = [1, 1]} : vector<8x128xf32> to vector<8x32xf32>
    %97 = vector.extract_strided_slice %93 {offsets = [0, 96], sizes = [8, 32], strides = [1, 1]} : vector<8x128xf32> to vector<8x32xf32>
    %98 = arith.mulf %95, %70 : vector<8x32xf32>
    %99 = arith.mulf %94, %96 : vector<8x32xf32>
    %100 = arith.addf %98, %99 : vector<8x32xf32>
    %101 = math.tanh %100 : vector<8x32xf32>
    %102 = arith.mulf %97, %101 : vector<8x32xf32>
    %c0_i32_41 = arith.constant 0 : i32
    %103 = arith.addi %c0_i32_41, %78 : i32
    %104 = tpu.assume_multiple %103, 8 : i32
    %105 = arith.index_cast %104 : i32 to index
    %c0_42 = arith.constant 0 : index
    %106 = vector.load %arg10[%105, %c0_42] : memref<64x32xf32, #tpu.memory_space<vmem>>, vector<8x32xf32>
    tpu.vector_store %arg10[%105, %c0_42], %102 {strides = array<i32>} : memref<64x32xf32, #tpu.memory_space<vmem>>, vector<8x32xf32>,
    %c3_i32 = arith.constant 3 : i32
    %c8_i32_43 = arith.constant 8 : i32
    %107 = arith.muli %c3_i32, %c8_i32_43 : i32
    %108 = tpu.assume_multiple %107, 8 : i32
    %c0_44 = arith.constant 0 : index
    %c0_45 = arith.constant 0 : index
    %c0_46 = arith.constant 0 : index
    %109 = vector.load %arg4[%c0_44, %c0_45, %c0_46] : memref<2x32x128xf32, #tpu.memory_space<vmem>>, vector<1x32x128xf32>
    %110 = vector.shape_cast %109 : vector<1x32x128xf32> to vector<32x128xf32>
    %111 = arith.index_cast %108 : i32 to index
    %c0_47 = arith.constant 0 : index
    %112 = vector.load %arg9[%111, %c0_47] : memref<64x128xf32, #tpu.memory_space<vmem>>, vector<8x128xf32>
    %cst_48 = arith.constant dense<0.000000e+00> : vector<8x128xf32>
    %113 = tpu.matmul %102, %110, %cst_48 {dimension_numbers = #tpu.dot_dimension_numbers<[1], [0], [0], [1], [0, 0, 1, 1], [], []>} : vector<8x32xf32>, vector<32x128xf32>, vector<8x128xf32> -> vector<8x128xf32>
    %114 = arith.addf %112, %113 : vector<8x128xf32>
    %cst_49 = arith.constant 5.000000e-01 : f32
    %115 = vector.broadcast %cst_49 : f32 to vector<8x128xf32>
    %116 = arith.mulf %115, %114 : vector<8x128xf32>
    %117 = arith.select %5, %114, %116 : vector<8x128xi1>, vector<8x128xf32>
    %118 = math.tanh %117 : vector<8x128xf32>
    %cst_50 = arith.constant 5.000000e-01 : f32
    %119 = vector.broadcast %cst_50 : f32 to vector<8x128xf32>
    %120 = arith.mulf %119, %118 : vector<8x128xf32>
    %cst_51 = arith.constant 5.000000e-01 : f32
    %121 = vector.broadcast %cst_51 : f32 to vector<8x128xf32>
    %122 = arith.addf %120, %121 : vector<8x128xf32>
    %123 = arith.select %5, %118, %122 : vector<8x128xi1>, vector<8x128xf32>
    %124 = vector.extract_strided_slice %123 {offsets = [0, 0], sizes = [8, 32], strides = [1, 1]} : vector<8x128xf32> to vector<8x32xf32>
    %125 = vector.extract_strided_slice %123 {offsets = [0, 32], sizes = [8, 32], strides = [1, 1]} : vector<8x128xf32> to vector<8x32xf32>
    %126 = vector.extract_strided_slice %123 {offsets = [0, 64], sizes = [8, 32], strides = [1, 1]} : vector<8x128xf32> to vector<8x32xf32>
    %127 = vector.extract_strided_slice %123 {offsets = [0, 96], sizes = [8, 32], strides = [1, 1]} : vector<8x128xf32> to vector<8x32xf32>
    %128 = arith.mulf %125, %100 : vector<8x32xf32>
    %129 = arith.mulf %124, %126 : vector<8x32xf32>
    %130 = arith.addf %128, %129 : vector<8x32xf32>
    %131 = math.tanh %130 : vector<8x32xf32>
    %132 = arith.mulf %127, %131 : vector<8x32xf32>
    %c0_i32_52 = arith.constant 0 : i32
    %133 = arith.addi %c0_i32_52, %108 : i32
    %134 = tpu.assume_multiple %133, 8 : i32
    %135 = arith.index_cast %134 : i32 to index
    %c0_53 = arith.constant 0 : index
    %136 = vector.load %arg10[%135, %c0_53] : memref<64x32xf32, #tpu.memory_space<vmem>>, vector<8x32xf32>
    tpu.vector_store %arg10[%135, %c0_53], %132 {strides = array<i32>} : memref<64x32xf32, #tpu.memory_space<vmem>>, vector<8x32xf32>,
    %c4_i32 = arith.constant 4 : i32
    %c8_i32_54 = arith.constant 8 : i32
    %137 = arith.muli %c4_i32, %c8_i32_54 : i32
    %138 = tpu.assume_multiple %137, 8 : i32
    %c0_55 = arith.constant 0 : index
    %c0_56 = arith.constant 0 : index
    %c0_57 = arith.constant 0 : index
    %139 = vector.load %arg4[%c0_55, %c0_56, %c0_57] : memref<2x32x128xf32, #tpu.memory_space<vmem>>, vector<1x32x128xf32>
    %140 = vector.shape_cast %139 : vector<1x32x128xf32> to vector<32x128xf32>
    %141 = arith.index_cast %138 : i32 to index
    %c0_58 = arith.constant 0 : index
    %142 = vector.load %arg9[%141, %c0_58] : memref<64x128xf32, #tpu.memory_space<vmem>>, vector<8x128xf32>
    %cst_59 = arith.constant dense<0.000000e+00> : vector<8x128xf32>
    %143 = tpu.matmul %132, %140, %cst_59 {dimension_numbers = #tpu.dot_dimension_numbers<[1], [0], [0], [1], [0, 0, 1, 1], [], []>} : vector<8x32xf32>, vector<32x128xf32>, vector<8x128xf32> -> vector<8x128xf32>
    %144 = arith.addf %142, %143 : vector<8x128xf32>
    %cst_60 = arith.constant 5.000000e-01 : f32
    %145 = vector.broadcast %cst_60 : f32 to vector<8x128xf32>
    %146 = arith.mulf %145, %144 : vector<8x128xf32>
    %147 = arith.select %5, %144, %146 : vector<8x128xi1>, vector<8x128xf32>
    %148 = math.tanh %147 : vector<8x128xf32>
    %cst_61 = arith.constant 5.000000e-01 : f32
    %149 = vector.broadcast %cst_61 : f32 to vector<8x128xf32>
    %150 = arith.mulf %149, %148 : vector<8x128xf32>
    %cst_62 = arith.constant 5.000000e-01 : f32
    %151 = vector.broadcast %cst_62 : f32 to vector<8x128xf32>
    %152 = arith.addf %150, %151 : vector<8x128xf32>
    %153 = arith.select %5, %148, %152 : vector<8x128xi1>, vector<8x128xf32>
    %154 = vector.extract_strided_slice %153 {offsets = [0, 0], sizes = [8, 32], strides = [1, 1]} : vector<8x128xf32> to vector<8x32xf32>
    %155 = vector.extract_strided_slice %153 {offsets = [0, 32], sizes = [8, 32], strides = [1, 1]} : vector<8x128xf32> to vector<8x32xf32>
    %156 = vector.extract_strided_slice %153 {offsets = [0, 64], sizes = [8, 32], strides = [1, 1]} : vector<8x128xf32> to vector<8x32xf32>
    %157 = vector.extract_strided_slice %153 {offsets = [0, 96], sizes = [8, 32], strides = [1, 1]} : vector<8x128xf32> to vector<8x32xf32>
    %158 = arith.mulf %155, %130 : vector<8x32xf32>
    %159 = arith.mulf %154, %156 : vector<8x32xf32>
    %160 = arith.addf %158, %159 : vector<8x32xf32>
    %161 = math.tanh %160 : vector<8x32xf32>
    %162 = arith.mulf %157, %161 : vector<8x32xf32>
    %c0_i32_63 = arith.constant 0 : i32
    %163 = arith.addi %c0_i32_63, %138 : i32
    %164 = tpu.assume_multiple %163, 8 : i32
    %165 = arith.index_cast %164 : i32 to index
    %c0_64 = arith.constant 0 : index
    %166 = vector.load %arg10[%165, %c0_64] : memref<64x32xf32, #tpu.memory_space<vmem>>, vector<8x32xf32>
    tpu.vector_store %arg10[%165, %c0_64], %162 {strides = array<i32>} : memref<64x32xf32, #tpu.memory_space<vmem>>, vector<8x32xf32>,
    %c5_i32 = arith.constant 5 : i32
    %c8_i32_65 = arith.constant 8 : i32
    %167 = arith.muli %c5_i32, %c8_i32_65 : i32
    %168 = tpu.assume_multiple %167, 8 : i32
    %c0_66 = arith.constant 0 : index
    %c0_67 = arith.constant 0 : index
    %c0_68 = arith.constant 0 : index
    %169 = vector.load %arg4[%c0_66, %c0_67, %c0_68] : memref<2x32x128xf32, #tpu.memory_space<vmem>>, vector<1x32x128xf32>
    %170 = vector.shape_cast %169 : vector<1x32x128xf32> to vector<32x128xf32>
    %171 = arith.index_cast %168 : i32 to index
    %c0_69 = arith.constant 0 : index
    %172 = vector.load %arg9[%171, %c0_69] : memref<64x128xf32, #tpu.memory_space<vmem>>, vector<8x128xf32>
    %cst_70 = arith.constant dense<0.000000e+00> : vector<8x128xf32>
    %173 = tpu.matmul %162, %170, %cst_70 {dimension_numbers = #tpu.dot_dimension_numbers<[1], [0], [0], [1], [0, 0, 1, 1], [], []>} : vector<8x32xf32>, vector<32x128xf32>, vector<8x128xf32> -> vector<8x128xf32>
    %174 = arith.addf %172, %173 : vector<8x128xf32>
    %cst_71 = arith.constant 5.000000e-01 : f32
    %175 = vector.broadcast %cst_71 : f32 to vector<8x128xf32>
    %176 = arith.mulf %175, %174 : vector<8x128xf32>
    %177 = arith.select %5, %174, %176 : vector<8x128xi1>, vector<8x128xf32>
    %178 = math.tanh %177 : vector<8x128xf32>
    %cst_72 = arith.constant 5.000000e-01 : f32
    %179 = vector.broadcast %cst_72 : f32 to vector<8x128xf32>
    %180 = arith.mulf %179, %178 : vector<8x128xf32>
    %cst_73 = arith.constant 5.000000e-01 : f32
    %181 = vector.broadcast %cst_73 : f32 to vector<8x128xf32>
    %182 = arith.addf %180, %181 : vector<8x128xf32>
    %183 = arith.select %5, %178, %182 : vector<8x128xi1>, vector<8x128xf32>
    %184 = vector.extract_strided_slice %183 {offsets = [0, 0], sizes = [8, 32], strides = [1, 1]} : vector<8x128xf32> to vector<8x32xf32>
    %185 = vector.extract_strided_slice %183 {offsets = [0, 32], sizes = [8, 32], strides = [1, 1]} : vector<8x128xf32> to vector<8x32xf32>
    %186 = vector.extract_strided_slice %183 {offsets = [0, 64], sizes = [8, 32], strides = [1, 1]} : vector<8x128xf32> to vector<8x32xf32>
    %187 = vector.extract_strided_slice %183 {offsets = [0, 96], sizes = [8, 32], strides = [1, 1]} : vector<8x128xf32> to vector<8x32xf32>
    %188 = arith.mulf %185, %160 : vector<8x32xf32>
    %189 = arith.mulf %184, %186 : vector<8x32xf32>
    %190 = arith.addf %188, %189 : vector<8x32xf32>
    %191 = math.tanh %190 : vector<8x32xf32>
    %192 = arith.mulf %187, %191 : vector<8x32xf32>
    %c0_i32_74 = arith.constant 0 : i32
    %193 = arith.addi %c0_i32_74, %168 : i32
    %194 = tpu.assume_multiple %193, 8 : i32
    %195 = arith.index_cast %194 : i32 to index
    %c0_75 = arith.constant 0 : index
    %196 = vector.load %arg10[%195, %c0_75] : memref<64x32xf32, #tpu.memory_space<vmem>>, vector<8x32xf32>
    tpu.vector_store %arg10[%195, %c0_75], %192 {strides = array<i32>} : memref<64x32xf32, #tpu.memory_space<vmem>>, vector<8x32xf32>,
    %c6_i32 = arith.constant 6 : i32
    %c8_i32_76 = arith.constant 8 : i32
    %197 = arith.muli %c6_i32, %c8_i32_76 : i32
    %198 = tpu.assume_multiple %197, 8 : i32
    %c0_77 = arith.constant 0 : index
    %c0_78 = arith.constant 0 : index
    %c0_79 = arith.constant 0 : index
    %199 = vector.load %arg4[%c0_77, %c0_78, %c0_79] : memref<2x32x128xf32, #tpu.memory_space<vmem>>, vector<1x32x128xf32>
    %200 = vector.shape_cast %199 : vector<1x32x128xf32> to vector<32x128xf32>
    %201 = arith.index_cast %198 : i32 to index
    %c0_80 = arith.constant 0 : index
    %202 = vector.load %arg9[%201, %c0_80] : memref<64x128xf32, #tpu.memory_space<vmem>>, vector<8x128xf32>
    %cst_81 = arith.constant dense<0.000000e+00> : vector<8x128xf32>
    %203 = tpu.matmul %192, %200, %cst_81 {dimension_numbers = #tpu.dot_dimension_numbers<[1], [0], [0], [1], [0, 0, 1, 1], [], []>} : vector<8x32xf32>, vector<32x128xf32>, vector<8x128xf32> -> vector<8x128xf32>
    %204 = arith.addf %202, %203 : vector<8x128xf32>
    %cst_82 = arith.constant 5.000000e-01 : f32
    %205 = vector.broadcast %cst_82 : f32 to vector<8x128xf32>
    %206 = arith.mulf %205, %204 : vector<8x128xf32>
    %207 = arith.select %5, %204, %206 : vector<8x128xi1>, vector<8x128xf32>
    %208 = math.tanh %207 : vector<8x128xf32>
    %cst_83 = arith.constant 5.000000e-01 : f32
    %209 = vector.broadcast %cst_83 : f32 to vector<8x128xf32>
    %210 = arith.mulf %209, %208 : vector<8x128xf32>
    %cst_84 = arith.constant 5.000000e-01 : f32
    %211 = vector.broadcast %cst_84 : f32 to vector<8x128xf32>
    %212 = arith.addf %210, %211 : vector<8x128xf32>
    %213 = arith.select %5, %208, %212 : vector<8x128xi1>, vector<8x128xf32>
    %214 = vector.extract_strided_slice %213 {offsets = [0, 0], sizes = [8, 32], strides = [1, 1]} : vector<8x128xf32> to vector<8x32xf32>
    %215 = vector.extract_strided_slice %213 {offsets = [0, 32], sizes = [8, 32], strides = [1, 1]} : vector<8x128xf32> to vector<8x32xf32>
    %216 = vector.extract_strided_slice %213 {offsets = [0, 64], sizes = [8, 32], strides = [1, 1]} : vector<8x128xf32> to vector<8x32xf32>
    %217 = vector.extract_strided_slice %213 {offsets = [0, 96], sizes = [8, 32], strides = [1, 1]} : vector<8x128xf32> to vector<8x32xf32>
    %218 = arith.mulf %215, %190 : vector<8x32xf32>
    %219 = arith.mulf %214, %216 : vector<8x32xf32>
    %220 = arith.addf %218, %219 : vector<8x32xf32>
    %221 = math.tanh %220 : vector<8x32xf32>
    %222 = arith.mulf %217, %221 : vector<8x32xf32>
    %c0_i32_85 = arith.constant 0 : i32
    %223 = arith.addi %c0_i32_85, %198 : i32
    %224 = tpu.assume_multiple %223, 8 : i32
    %225 = arith.index_cast %224 : i32 to index
    %c0_86 = arith.constant 0 : index
    %226 = vector.load %arg10[%225, %c0_86] : memref<64x32xf32, #tpu.memory_space<vmem>>, vector<8x32xf32>
    tpu.vector_store %arg10[%225, %c0_86], %222 {strides = array<i32>} : memref<64x32xf32, #tpu.memory_space<vmem>>, vector<8x32xf32>,
    %c7_i32 = arith.constant 7 : i32
    %c8_i32_87 = arith.constant 8 : i32
    %227 = arith.muli %c7_i32, %c8_i32_87 : i32
    %228 = tpu.assume_multiple %227, 8 : i32
    %c0_88 = arith.constant 0 : index
    %c0_89 = arith.constant 0 : index
    %c0_90 = arith.constant 0 : index
    %229 = vector.load %arg4[%c0_88, %c0_89, %c0_90] : memref<2x32x128xf32, #tpu.memory_space<vmem>>, vector<1x32x128xf32>
    %230 = vector.shape_cast %229 : vector<1x32x128xf32> to vector<32x128xf32>
    %231 = arith.index_cast %228 : i32 to index
    %c0_91 = arith.constant 0 : index
    %232 = vector.load %arg9[%231, %c0_91] : memref<64x128xf32, #tpu.memory_space<vmem>>, vector<8x128xf32>
    %cst_92 = arith.constant dense<0.000000e+00> : vector<8x128xf32>
    %233 = tpu.matmul %222, %230, %cst_92 {dimension_numbers = #tpu.dot_dimension_numbers<[1], [0], [0], [1], [0, 0, 1, 1], [], []>} : vector<8x32xf32>, vector<32x128xf32>, vector<8x128xf32> -> vector<8x128xf32>
    %234 = arith.addf %232, %233 : vector<8x128xf32>
    %cst_93 = arith.constant 5.000000e-01 : f32
    %235 = vector.broadcast %cst_93 : f32 to vector<8x128xf32>
    %236 = arith.mulf %235, %234 : vector<8x128xf32>
    %237 = arith.select %5, %234, %236 : vector<8x128xi1>, vector<8x128xf32>
    %238 = math.tanh %237 : vector<8x128xf32>
    %cst_94 = arith.constant 5.000000e-01 : f32
    %239 = vector.broadcast %cst_94 : f32 to vector<8x128xf32>
    %240 = arith.mulf %239, %238 : vector<8x128xf32>
    %cst_95 = arith.constant 5.000000e-01 : f32
    %241 = vector.broadcast %cst_95 : f32 to vector<8x128xf32>
    %242 = arith.addf %240, %241 : vector<8x128xf32>
    %243 = arith.select %5, %238, %242 : vector<8x128xi1>, vector<8x128xf32>
    %244 = vector.extract_strided_slice %243 {offsets = [0, 0], sizes = [8, 32], strides = [1, 1]} : vector<8x128xf32> to vector<8x32xf32>
    %245 = vector.extract_strided_slice %243 {offsets = [0, 32], sizes = [8, 32], strides = [1, 1]} : vector<8x128xf32> to vector<8x32xf32>
    %246 = vector.extract_strided_slice %243 {offsets = [0, 64], sizes = [8, 32], strides = [1, 1]} : vector<8x128xf32> to vector<8x32xf32>
    %247 = vector.extract_strided_slice %243 {offsets = [0, 96], sizes = [8, 32], strides = [1, 1]} : vector<8x128xf32> to vector<8x32xf32>
    %248 = arith.mulf %245, %220 : vector<8x32xf32>
    %249 = arith.mulf %244, %246 : vector<8x32xf32>
    %250 = arith.addf %248, %249 : vector<8x32xf32>
    %251 = math.tanh %250 : vector<8x32xf32>
    %252 = arith.mulf %247, %251 : vector<8x32xf32>
    %c0_i32_96 = arith.constant 0 : i32
    %253 = arith.addi %c0_i32_96, %228 : i32
    %254 = tpu.assume_multiple %253, 8 : i32
    %255 = arith.index_cast %254 : i32 to index
    %c0_97 = arith.constant 0 : index
    %256 = vector.load %arg10[%255, %c0_97] : memref<64x32xf32, #tpu.memory_space<vmem>>, vector<8x32xf32>
    tpu.vector_store %arg10[%255, %c0_97], %252 {strides = array<i32>} : memref<64x32xf32, #tpu.memory_space<vmem>>, vector<8x32xf32>,
    %c8_i32_98 = arith.constant 8 : i32
    %cst_99 = arith.constant 0.000000e+00 : f32
    %257 = vector.broadcast %cst_99 : f32 to vector<8x32xf32>
    %cst_100 = arith.constant 0.000000e+00 : f32
    %258 = vector.broadcast %cst_100 : f32 to vector<8x32xf32>
    %c0_101 = arith.constant 0 : index
    %c0_102 = arith.constant 0 : index
    %c0_103 = arith.constant 0 : index
    %259 = vector.load %arg3[%c0_101, %c0_102, %c0_103] : memref<1x32x128xf32, #tpu.memory_space<vmem>>, vector<1x32x128xf32>
    %260 = vector.shape_cast %259 : vector<1x32x128xf32> to vector<32x128xf32>
    %c0_104 = arith.constant 0 : index
    %c0_105 = arith.constant 0 : index
    %261 = vector.load %arg10[%c0_104, %c0_105] : memref<64x32xf32, #tpu.memory_space<vmem>>, vector<64x32xf32>
    %cst_106 = arith.constant dense<0.000000e+00> : vector<64x128xf32>
    %262 = tpu.matmul %261, %260, %cst_106 {dimension_numbers = #tpu.dot_dimension_numbers<[1], [0], [0], [1], [0, 0, 1, 1], [], []>} : vector<64x32xf32>, vector<32x128xf32>, vector<64x128xf32> -> vector<64x128xf32>
    %c1 = arith.constant 1 : index
    %c0_107 = arith.constant 0 : index
    %c0_108 = arith.constant 0 : index
    %263 = vector.load %arg5[%c1, %c0_107, %c0_108] : memref<2x1x128xf32, #tpu.memory_space<vmem>>, vector<1x1x128xf32>
    %264 = vector.shape_cast %263 : vector<1x1x128xf32> to vector<1x128xf32>
    %265 = vector.broadcast %264 : vector<1x128xf32> to vector<64x128xf32>
    %266 = arith.addf %262, %265 : vector<64x128xf32>
    %c0_109 = arith.constant 0 : index
    %c0_110 = arith.constant 0 : index
    %267 = vector.load %arg9[%c0_109, %c0_110] : memref<64x128xf32, #tpu.memory_space<vmem>>, vector<64x128xf32>
    tpu.vector_store %arg9[%c0_109, %c0_110], %266 {strides = array<i32>} : memref<64x128xf32, #tpu.memory_space<vmem>>, vector<64x128xf32>,
    %c0_i32_111 = arith.constant 0 : i32
    %c8_i32_112 = arith.constant 8 : i32
    %268 = arith.muli %c0_i32_111, %c8_i32_112 : i32
    %269 = tpu.assume_multiple %268, 8 : i32
    %c1_113 = arith.constant 1 : index
    %c0_114 = arith.constant 0 : index
    %c0_115 = arith.constant 0 : index
    %270 = vector.load %arg4[%c1_113, %c0_114, %c0_115] : memref<2x32x128xf32, #tpu.memory_space<vmem>>, vector<1x32x128xf32>
    %271 = vector.shape_cast %270 : vector<1x32x128xf32> to vector<32x128xf32>
    %272 = arith.index_cast %269 : i32 to index
    %c0_116 = arith.constant 0 : index
    %273 = vector.load %arg9[%272, %c0_116] : memref<64x128xf32, #tpu.memory_space<vmem>>, vector<8x128xf32>
    %cst_117 = arith.constant dense<0.000000e+00> : vector<8x128xf32>
    %274 = tpu.matmul %257, %271, %cst_117 {dimension_numbers = #tpu.dot_dimension_numbers<[1], [0], [0], [1], [0, 0, 1, 1], [], []>} : vector<8x32xf32>, vector<32x128xf32>, vector<8x128xf32> -> vector<8x128xf32>
    %275 = arith.addf %273, %274 : vector<8x128xf32>
    %cst_118 = arith.constant 5.000000e-01 : f32
    %276 = vector.broadcast %cst_118 : f32 to vector<8x128xf32>
    %277 = arith.mulf %276, %275 : vector<8x128xf32>
    %278 = arith.select %5, %275, %277 : vector<8x128xi1>, vector<8x128xf32>
    %279 = math.tanh %278 : vector<8x128xf32>
    %cst_119 = arith.constant 5.000000e-01 : f32
    %280 = vector.broadcast %cst_119 : f32 to vector<8x128xf32>
    %281 = arith.mulf %280, %279 : vector<8x128xf32>
    %cst_120 = arith.constant 5.000000e-01 : f32
    %282 = vector.broadcast %cst_120 : f32 to vector<8x128xf32>
    %283 = arith.addf %281, %282 : vector<8x128xf32>
    %284 = arith.select %5, %279, %283 : vector<8x128xi1>, vector<8x128xf32>
    %285 = vector.extract_strided_slice %284 {offsets = [0, 0], sizes = [8, 32], strides = [1, 1]} : vector<8x128xf32> to vector<8x32xf32>
    %286 = vector.extract_strided_slice %284 {offsets = [0, 32], sizes = [8, 32], strides = [1, 1]} : vector<8x128xf32> to vector<8x32xf32>
    %287 = vector.extract_strided_slice %284 {offsets = [0, 64], sizes = [8, 32], strides = [1, 1]} : vector<8x128xf32> to vector<8x32xf32>
    %288 = vector.extract_strided_slice %284 {offsets = [0, 96], sizes = [8, 32], strides = [1, 1]} : vector<8x128xf32> to vector<8x32xf32>
    %289 = arith.mulf %286, %258 : vector<8x32xf32>
    %290 = arith.mulf %285, %287 : vector<8x32xf32>
    %291 = arith.addf %289, %290 : vector<8x32xf32>
    %292 = math.tanh %291 : vector<8x32xf32>
    %293 = arith.mulf %288, %292 : vector<8x32xf32>
    %c1_i32_121 = arith.constant 1 : i32
    %c8_i32_122 = arith.constant 8 : i32
    %294 = arith.muli %c1_i32_121, %c8_i32_122 : i32
    %295 = tpu.assume_multiple %294, 8 : i32
    %c1_123 = arith.constant 1 : index
    %c0_124 = arith.constant 0 : index
    %c0_125 = arith.constant 0 : index
    %296 = vector.load %arg4[%c1_123, %c0_124, %c0_125] : memref<2x32x128xf32, #tpu.memory_space<vmem>>, vector<1x32x128xf32>
    %297 = vector.shape_cast %296 : vector<1x32x128xf32> to vector<32x128xf32>
    %298 = arith.index_cast %295 : i32 to index
    %c0_126 = arith.constant 0 : index
    %299 = vector.load %arg9[%298, %c0_126] : memref<64x128xf32, #tpu.memory_space<vmem>>, vector<8x128xf32>
    %cst_127 = arith.constant dense<0.000000e+00> : vector<8x128xf32>
    %300 = tpu.matmul %293, %297, %cst_127 {dimension_numbers = #tpu.dot_dimension_numbers<[1], [0], [0], [1], [0, 0, 1, 1], [], []>} : vector<8x32xf32>, vector<32x128xf32>, vector<8x128xf32> -> vector<8x128xf32>
    %301 = arith.addf %299, %300 : vector<8x128xf32>
    %cst_128 = arith.constant 5.000000e-01 : f32
    %302 = vector.broadcast %cst_128 : f32 to vector<8x128xf32>
    %303 = arith.mulf %302, %301 : vector<8x128xf32>
    %304 = arith.select %5, %301, %303 : vector<8x128xi1>, vector<8x128xf32>
    %305 = math.tanh %304 : vector<8x128xf32>
    %cst_129 = arith.constant 5.000000e-01 : f32
    %306 = vector.broadcast %cst_129 : f32 to vector<8x128xf32>
    %307 = arith.mulf %306, %305 : vector<8x128xf32>
    %cst_130 = arith.constant 5.000000e-01 : f32
    %308 = vector.broadcast %cst_130 : f32 to vector<8x128xf32>
    %309 = arith.addf %307, %308 : vector<8x128xf32>
    %310 = arith.select %5, %305, %309 : vector<8x128xi1>, vector<8x128xf32>
    %311 = vector.extract_strided_slice %310 {offsets = [0, 0], sizes = [8, 32], strides = [1, 1]} : vector<8x128xf32> to vector<8x32xf32>
    %312 = vector.extract_strided_slice %310 {offsets = [0, 32], sizes = [8, 32], strides = [1, 1]} : vector<8x128xf32> to vector<8x32xf32>
    %313 = vector.extract_strided_slice %310 {offsets = [0, 64], sizes = [8, 32], strides = [1, 1]} : vector<8x128xf32> to vector<8x32xf32>
    %314 = vector.extract_strided_slice %310 {offsets = [0, 96], sizes = [8, 32], strides = [1, 1]} : vector<8x128xf32> to vector<8x32xf32>
    %315 = arith.mulf %312, %291 : vector<8x32xf32>
    %316 = arith.mulf %311, %313 : vector<8x32xf32>
    %317 = arith.addf %315, %316 : vector<8x32xf32>
    %318 = math.tanh %317 : vector<8x32xf32>
    %319 = arith.mulf %314, %318 : vector<8x32xf32>
    %c2_i32_131 = arith.constant 2 : i32
    %c8_i32_132 = arith.constant 8 : i32
    %320 = arith.muli %c2_i32_131, %c8_i32_132 : i32
    %321 = tpu.assume_multiple %320, 8 : i32
    %c1_133 = arith.constant 1 : index
    %c0_134 = arith.constant 0 : index
    %c0_135 = arith.constant 0 : index
    %322 = vector.load %arg4[%c1_133, %c0_134, %c0_135] : memref<2x32x128xf32, #tpu.memory_space<vmem>>, vector<1x32x128xf32>
    %323 = vector.shape_cast %322 : vector<1x32x128xf32> to vector<32x128xf32>
    %324 = arith.index_cast %321 : i32 to index
    %c0_136 = arith.constant 0 : index
    %325 = vector.load %arg9[%324, %c0_136] : memref<64x128xf32, #tpu.memory_space<vmem>>, vector<8x128xf32>
    %cst_137 = arith.constant dense<0.000000e+00> : vector<8x128xf32>
    %326 = tpu.matmul %319, %323, %cst_137 {dimension_numbers = #tpu.dot_dimension_numbers<[1], [0], [0], [1], [0, 0, 1, 1], [], []>} : vector<8x32xf32>, vector<32x128xf32>, vector<8x128xf32> -> vector<8x128xf32>
    %327 = arith.addf %325, %326 : vector<8x128xf32>
    %cst_138 = arith.constant 5.000000e-01 : f32
    %328 = vector.broadcast %cst_138 : f32 to vector<8x128xf32>
    %329 = arith.mulf %328, %327 : vector<8x128xf32>
    %330 = arith.select %5, %327, %329 : vector<8x128xi1>, vector<8x128xf32>
    %331 = math.tanh %330 : vector<8x128xf32>
    %cst_139 = arith.constant 5.000000e-01 : f32
    %332 = vector.broadcast %cst_139 : f32 to vector<8x128xf32>
    %333 = arith.mulf %332, %331 : vector<8x128xf32>
    %cst_140 = arith.constant 5.000000e-01 : f32
    %334 = vector.broadcast %cst_140 : f32 to vector<8x128xf32>
    %335 = arith.addf %333, %334 : vector<8x128xf32>
    %336 = arith.select %5, %331, %335 : vector<8x128xi1>, vector<8x128xf32>
    %337 = vector.extract_strided_slice %336 {offsets = [0, 0], sizes = [8, 32], strides = [1, 1]} : vector<8x128xf32> to vector<8x32xf32>
    %338 = vector.extract_strided_slice %336 {offsets = [0, 32], sizes = [8, 32], strides = [1, 1]} : vector<8x128xf32> to vector<8x32xf32>
    %339 = vector.extract_strided_slice %336 {offsets = [0, 64], sizes = [8, 32], strides = [1, 1]} : vector<8x128xf32> to vector<8x32xf32>
    %340 = vector.extract_strided_slice %336 {offsets = [0, 96], sizes = [8, 32], strides = [1, 1]} : vector<8x128xf32> to vector<8x32xf32>
    %341 = arith.mulf %338, %317 : vector<8x32xf32>
    %342 = arith.mulf %337, %339 : vector<8x32xf32>
    %343 = arith.addf %341, %342 : vector<8x32xf32>
    %344 = math.tanh %343 : vector<8x32xf32>
    %345 = arith.mulf %340, %344 : vector<8x32xf32>
    %c3_i32_141 = arith.constant 3 : i32
    %c8_i32_142 = arith.constant 8 : i32
    %346 = arith.muli %c3_i32_141, %c8_i32_142 : i32
    %347 = tpu.assume_multiple %346, 8 : i32
    %c1_143 = arith.constant 1 : index
    %c0_144 = arith.constant 0 : index
    %c0_145 = arith.constant 0 : index
    %348 = vector.load %arg4[%c1_143, %c0_144, %c0_145] : memref<2x32x128xf32, #tpu.memory_space<vmem>>, vector<1x32x128xf32>
    %349 = vector.shape_cast %348 : vector<1x32x128xf32> to vector<32x128xf32>
    %350 = arith.index_cast %347 : i32 to index
    %c0_146 = arith.constant 0 : index
    %351 = vector.load %arg9[%350, %c0_146] : memref<64x128xf32, #tpu.memory_space<vmem>>, vector<8x128xf32>
    %cst_147 = arith.constant dense<0.000000e+00> : vector<8x128xf32>
    %352 = tpu.matmul %345, %349, %cst_147 {dimension_numbers = #tpu.dot_dimension_numbers<[1], [0], [0], [1], [0, 0, 1, 1], [], []>} : vector<8x32xf32>, vector<32x128xf32>, vector<8x128xf32> -> vector<8x128xf32>
    %353 = arith.addf %351, %352 : vector<8x128xf32>
    %cst_148 = arith.constant 5.000000e-01 : f32
    %354 = vector.broadcast %cst_148 : f32 to vector<8x128xf32>
    %355 = arith.mulf %354, %353 : vector<8x128xf32>
    %356 = arith.select %5, %353, %355 : vector<8x128xi1>, vector<8x128xf32>
    %357 = math.tanh %356 : vector<8x128xf32>
    %cst_149 = arith.constant 5.000000e-01 : f32
    %358 = vector.broadcast %cst_149 : f32 to vector<8x128xf32>
    %359 = arith.mulf %358, %357 : vector<8x128xf32>
    %cst_150 = arith.constant 5.000000e-01 : f32
    %360 = vector.broadcast %cst_150 : f32 to vector<8x128xf32>
    %361 = arith.addf %359, %360 : vector<8x128xf32>
    %362 = arith.select %5, %357, %361 : vector<8x128xi1>, vector<8x128xf32>
    %363 = vector.extract_strided_slice %362 {offsets = [0, 0], sizes = [8, 32], strides = [1, 1]} : vector<8x128xf32> to vector<8x32xf32>
    %364 = vector.extract_strided_slice %362 {offsets = [0, 32], sizes = [8, 32], strides = [1, 1]} : vector<8x128xf32> to vector<8x32xf32>
    %365 = vector.extract_strided_slice %362 {offsets = [0, 64], sizes = [8, 32], strides = [1, 1]} : vector<8x128xf32> to vector<8x32xf32>
    %366 = vector.extract_strided_slice %362 {offsets = [0, 96], sizes = [8, 32], strides = [1, 1]} : vector<8x128xf32> to vector<8x32xf32>
    %367 = arith.mulf %364, %343 : vector<8x32xf32>
    %368 = arith.mulf %363, %365 : vector<8x32xf32>
    %369 = arith.addf %367, %368 : vector<8x32xf32>
    %370 = math.tanh %369 : vector<8x32xf32>
    %371 = arith.mulf %366, %370 : vector<8x32xf32>
    %c4_i32_151 = arith.constant 4 : i32
    %c8_i32_152 = arith.constant 8 : i32
    %372 = arith.muli %c4_i32_151, %c8_i32_152 : i32
    %373 = tpu.assume_multiple %372, 8 : i32
    %c1_153 = arith.constant 1 : index
    %c0_154 = arith.constant 0 : index
    %c0_155 = arith.constant 0 : index
    %374 = vector.load %arg4[%c1_153, %c0_154, %c0_155] : memref<2x32x128xf32, #tpu.memory_space<vmem>>, vector<1x32x128xf32>
    %375 = vector.shape_cast %374 : vector<1x32x128xf32> to vector<32x128xf32>
    %376 = arith.index_cast %373 : i32 to index
    %c0_156 = arith.constant 0 : index
    %377 = vector.load %arg9[%376, %c0_156] : memref<64x128xf32, #tpu.memory_space<vmem>>, vector<8x128xf32>
    %cst_157 = arith.constant dense<0.000000e+00> : vector<8x128xf32>
    %378 = tpu.matmul %371, %375, %cst_157 {dimension_numbers = #tpu.dot_dimension_numbers<[1], [0], [0], [1], [0, 0, 1, 1], [], []>} : vector<8x32xf32>, vector<32x128xf32>, vector<8x128xf32> -> vector<8x128xf32>
    %379 = arith.addf %377, %378 : vector<8x128xf32>
    %cst_158 = arith.constant 5.000000e-01 : f32
    %380 = vector.broadcast %cst_158 : f32 to vector<8x128xf32>
    %381 = arith.mulf %380, %379 : vector<8x128xf32>
    %382 = arith.select %5, %379, %381 : vector<8x128xi1>, vector<8x128xf32>
    %383 = math.tanh %382 : vector<8x128xf32>
    %cst_159 = arith.constant 5.000000e-01 : f32
    %384 = vector.broadcast %cst_159 : f32 to vector<8x128xf32>
    %385 = arith.mulf %384, %383 : vector<8x128xf32>
    %cst_160 = arith.constant 5.000000e-01 : f32
    %386 = vector.broadcast %cst_160 : f32 to vector<8x128xf32>
    %387 = arith.addf %385, %386 : vector<8x128xf32>
    %388 = arith.select %5, %383, %387 : vector<8x128xi1>, vector<8x128xf32>
    %389 = vector.extract_strided_slice %388 {offsets = [0, 0], sizes = [8, 32], strides = [1, 1]} : vector<8x128xf32> to vector<8x32xf32>
    %390 = vector.extract_strided_slice %388 {offsets = [0, 32], sizes = [8, 32], strides = [1, 1]} : vector<8x128xf32> to vector<8x32xf32>
    %391 = vector.extract_strided_slice %388 {offsets = [0, 64], sizes = [8, 32], strides = [1, 1]} : vector<8x128xf32> to vector<8x32xf32>
    %392 = vector.extract_strided_slice %388 {offsets = [0, 96], sizes = [8, 32], strides = [1, 1]} : vector<8x128xf32> to vector<8x32xf32>
    %393 = arith.mulf %390, %369 : vector<8x32xf32>
    %394 = arith.mulf %389, %391 : vector<8x32xf32>
    %395 = arith.addf %393, %394 : vector<8x32xf32>
    %396 = math.tanh %395 : vector<8x32xf32>
    %397 = arith.mulf %392, %396 : vector<8x32xf32>
    %c5_i32_161 = arith.constant 5 : i32
    %c8_i32_162 = arith.constant 8 : i32
    %398 = arith.muli %c5_i32_161, %c8_i32_162 : i32
    %399 = tpu.assume_multiple %398, 8 : i32
    %c1_163 = arith.constant 1 : index
    %c0_164 = arith.constant 0 : index
    %c0_165 = arith.constant 0 : index
    %400 = vector.load %arg4[%c1_163, %c0_164, %c0_165] : memref<2x32x128xf32, #tpu.memory_space<vmem>>, vector<1x32x128xf32>
    %401 = vector.shape_cast %400 : vector<1x32x128xf32> to vector<32x128xf32>
    %402 = arith.index_cast %399 : i32 to index
    %c0_166 = arith.constant 0 : index
    %403 = vector.load %arg9[%402, %c0_166] : memref<64x128xf32, #tpu.memory_space<vmem>>, vector<8x128xf32>
    %cst_167 = arith.constant dense<0.000000e+00> : vector<8x128xf32>
    %404 = tpu.matmul %397, %401, %cst_167 {dimension_numbers = #tpu.dot_dimension_numbers<[1], [0], [0], [1], [0, 0, 1, 1], [], []>} : vector<8x32xf32>, vector<32x128xf32>, vector<8x128xf32> -> vector<8x128xf32>
    %405 = arith.addf %403, %404 : vector<8x128xf32>
    %cst_168 = arith.constant 5.000000e-01 : f32
    %406 = vector.broadcast %cst_168 : f32 to vector<8x128xf32>
    %407 = arith.mulf %406, %405 : vector<8x128xf32>
    %408 = arith.select %5, %405, %407 : vector<8x128xi1>, vector<8x128xf32>
    %409 = math.tanh %408 : vector<8x128xf32>
    %cst_169 = arith.constant 5.000000e-01 : f32
    %410 = vector.broadcast %cst_169 : f32 to vector<8x128xf32>
    %411 = arith.mulf %410, %409 : vector<8x128xf32>
    %cst_170 = arith.constant 5.000000e-01 : f32
    %412 = vector.broadcast %cst_170 : f32 to vector<8x128xf32>
    %413 = arith.addf %411, %412 : vector<8x128xf32>
    %414 = arith.select %5, %409, %413 : vector<8x128xi1>, vector<8x128xf32>
    %415 = vector.extract_strided_slice %414 {offsets = [0, 0], sizes = [8, 32], strides = [1, 1]} : vector<8x128xf32> to vector<8x32xf32>
    %416 = vector.extract_strided_slice %414 {offsets = [0, 32], sizes = [8, 32], strides = [1, 1]} : vector<8x128xf32> to vector<8x32xf32>
    %417 = vector.extract_strided_slice %414 {offsets = [0, 64], sizes = [8, 32], strides = [1, 1]} : vector<8x128xf32> to vector<8x32xf32>
    %418 = vector.extract_strided_slice %414 {offsets = [0, 96], sizes = [8, 32], strides = [1, 1]} : vector<8x128xf32> to vector<8x32xf32>
    %419 = arith.mulf %416, %395 : vector<8x32xf32>
    %420 = arith.mulf %415, %417 : vector<8x32xf32>
    %421 = arith.addf %419, %420 : vector<8x32xf32>
    %422 = math.tanh %421 : vector<8x32xf32>
    %423 = arith.mulf %418, %422 : vector<8x32xf32>
    %c6_i32_171 = arith.constant 6 : i32
    %c8_i32_172 = arith.constant 8 : i32
    %424 = arith.muli %c6_i32_171, %c8_i32_172 : i32
    %425 = tpu.assume_multiple %424, 8 : i32
    %c1_173 = arith.constant 1 : index
    %c0_174 = arith.constant 0 : index
    %c0_175 = arith.constant 0 : index
    %426 = vector.load %arg4[%c1_173, %c0_174, %c0_175] : memref<2x32x128xf32, #tpu.memory_space<vmem>>, vector<1x32x128xf32>
    %427 = vector.shape_cast %426 : vector<1x32x128xf32> to vector<32x128xf32>
    %428 = arith.index_cast %425 : i32 to index
    %c0_176 = arith.constant 0 : index
    %429 = vector.load %arg9[%428, %c0_176] : memref<64x128xf32, #tpu.memory_space<vmem>>, vector<8x128xf32>
    %cst_177 = arith.constant dense<0.000000e+00> : vector<8x128xf32>
    %430 = tpu.matmul %423, %427, %cst_177 {dimension_numbers = #tpu.dot_dimension_numbers<[1], [0], [0], [1], [0, 0, 1, 1], [], []>} : vector<8x32xf32>, vector<32x128xf32>, vector<8x128xf32> -> vector<8x128xf32>
    %431 = arith.addf %429, %430 : vector<8x128xf32>
    %cst_178 = arith.constant 5.000000e-01 : f32
    %432 = vector.broadcast %cst_178 : f32 to vector<8x128xf32>
    %433 = arith.mulf %432, %431 : vector<8x128xf32>
    %434 = arith.select %5, %431, %433 : vector<8x128xi1>, vector<8x128xf32>
    %435 = math.tanh %434 : vector<8x128xf32>
    %cst_179 = arith.constant 5.000000e-01 : f32
    %436 = vector.broadcast %cst_179 : f32 to vector<8x128xf32>
    %437 = arith.mulf %436, %435 : vector<8x128xf32>
    %cst_180 = arith.constant 5.000000e-01 : f32
    %438 = vector.broadcast %cst_180 : f32 to vector<8x128xf32>
    %439 = arith.addf %437, %438 : vector<8x128xf32>
    %440 = arith.select %5, %435, %439 : vector<8x128xi1>, vector<8x128xf32>
    %441 = vector.extract_strided_slice %440 {offsets = [0, 0], sizes = [8, 32], strides = [1, 1]} : vector<8x128xf32> to vector<8x32xf32>
    %442 = vector.extract_strided_slice %440 {offsets = [0, 32], sizes = [8, 32], strides = [1, 1]} : vector<8x128xf32> to vector<8x32xf32>
    %443 = vector.extract_strided_slice %440 {offsets = [0, 64], sizes = [8, 32], strides = [1, 1]} : vector<8x128xf32> to vector<8x32xf32>
    %444 = vector.extract_strided_slice %440 {offsets = [0, 96], sizes = [8, 32], strides = [1, 1]} : vector<8x128xf32> to vector<8x32xf32>
    %445 = arith.mulf %442, %421 : vector<8x32xf32>
    %446 = arith.mulf %441, %443 : vector<8x32xf32>
    %447 = arith.addf %445, %446 : vector<8x32xf32>
    %448 = math.tanh %447 : vector<8x32xf32>
    %449 = arith.mulf %444, %448 : vector<8x32xf32>
    %c7_i32_181 = arith.constant 7 : i32
    %c8_i32_182 = arith.constant 8 : i32
    %450 = arith.muli %c7_i32_181, %c8_i32_182 : i32
    %451 = tpu.assume_multiple %450, 8 : i32
    %c1_183 = arith.constant 1 : index
    %c0_184 = arith.constant 0 : index
    %c0_185 = arith.constant 0 : index
    %452 = vector.load %arg4[%c1_183, %c0_184, %c0_185] : memref<2x32x128xf32, #tpu.memory_space<vmem>>, vector<1x32x128xf32>
    %453 = vector.shape_cast %452 : vector<1x32x128xf32> to vector<32x128xf32>
    %454 = arith.index_cast %451 : i32 to index
    %c0_186 = arith.constant 0 : index
    %455 = vector.load %arg9[%454, %c0_186] : memref<64x128xf32, #tpu.memory_space<vmem>>, vector<8x128xf32>
    %cst_187 = arith.constant dense<0.000000e+00> : vector<8x128xf32>
    %456 = tpu.matmul %449, %453, %cst_187 {dimension_numbers = #tpu.dot_dimension_numbers<[1], [0], [0], [1], [0, 0, 1, 1], [], []>} : vector<8x32xf32>, vector<32x128xf32>, vector<8x128xf32> -> vector<8x128xf32>
    %457 = arith.addf %455, %456 : vector<8x128xf32>
    %cst_188 = arith.constant 5.000000e-01 : f32
    %458 = vector.broadcast %cst_188 : f32 to vector<8x128xf32>
    %459 = arith.mulf %458, %457 : vector<8x128xf32>
    %460 = arith.select %5, %457, %459 : vector<8x128xi1>, vector<8x128xf32>
    %461 = math.tanh %460 : vector<8x128xf32>
    %cst_189 = arith.constant 5.000000e-01 : f32
    %462 = vector.broadcast %cst_189 : f32 to vector<8x128xf32>
    %463 = arith.mulf %462, %461 : vector<8x128xf32>
    %cst_190 = arith.constant 5.000000e-01 : f32
    %464 = vector.broadcast %cst_190 : f32 to vector<8x128xf32>
    %465 = arith.addf %463, %464 : vector<8x128xf32>
    %466 = arith.select %5, %461, %465 : vector<8x128xi1>, vector<8x128xf32>
    %467 = vector.extract_strided_slice %466 {offsets = [0, 0], sizes = [8, 32], strides = [1, 1]} : vector<8x128xf32> to vector<8x32xf32>
    %468 = vector.extract_strided_slice %466 {offsets = [0, 32], sizes = [8, 32], strides = [1, 1]} : vector<8x128xf32> to vector<8x32xf32>
    %469 = vector.extract_strided_slice %466 {offsets = [0, 64], sizes = [8, 32], strides = [1, 1]} : vector<8x128xf32> to vector<8x32xf32>
    %470 = vector.extract_strided_slice %466 {offsets = [0, 96], sizes = [8, 32], strides = [1, 1]} : vector<8x128xf32> to vector<8x32xf32>
    %471 = arith.mulf %468, %447 : vector<8x32xf32>
    %472 = arith.mulf %467, %469 : vector<8x32xf32>
    %473 = arith.addf %471, %472 : vector<8x32xf32>
    %474 = math.tanh %473 : vector<8x32xf32>
    %475 = arith.mulf %470, %474 : vector<8x32xf32>
    %c8_i32_191 = arith.constant 8 : i32
    %c0_192 = arith.constant 0 : index
    %c0_193 = arith.constant 0 : index
    %476 = vector.load %arg6[%c0_192, %c0_193] : memref<32x128xf32, #tpu.memory_space<vmem>>, vector<32x128xf32>
    %cst_194 = arith.constant dense<0.000000e+00> : vector<8x128xf32>
    %477 = tpu.matmul %475, %476, %cst_194 {dimension_numbers = #tpu.dot_dimension_numbers<[1], [0], [0], [1], [0, 0, 1, 1], [], []>} : vector<8x32xf32>, vector<32x128xf32>, vector<8x128xf32> -> vector<8x128xf32>
    %c0_195 = arith.constant 0 : index
    %c0_196 = arith.constant 0 : index
    %478 = vector.load %arg7[%c0_195, %c0_196] : memref<1x128xf32, #tpu.memory_space<vmem>>, vector<1x128xf32>
    %479 = vector.broadcast %478 : vector<1x128xf32> to vector<8x128xf32>
    %480 = arith.addf %477, %479 : vector<8x128xf32>
    %c0_197 = arith.constant 0 : index
    %c0_198 = arith.constant 0 : index
    %481 = vector.load %arg8[%c0_197, %c0_198] : memref<8x128xf32, #tpu.memory_space<vmem>>, vector<8x128xf32>
    tpu.vector_store %arg8[%c0_197, %c0_198], %480 {strides = array<i32>} : memref<8x128xf32, #tpu.memory_space<vmem>>, vector<8x128xf32>,
    return
  }
  func.func @transform_0(%arg0: i32) -> (i32, i32, i32) {
    %c0_i32 = arith.constant 0 : i32
    %c0_i32_0 = arith.constant 0 : i32
    %c0_i32_1 = arith.constant 0 : i32
    return %arg0, %c0_i32, %c0_i32_0 : i32, i32, i32
  }
  func.func @transform_1(%arg0: i32) -> (i32, i32) {
    %c0_i32 = arith.constant 0 : i32
    %c0_i32_0 = arith.constant 0 : i32
    %c0_i32_1 = arith.constant 0 : i32
    return %c0_i32, %c0_i32_0 : i32, i32
  }
  func.func @transform_2(%arg0: i32) -> (i32, i32, i32) {
    %c0_i32 = arith.constant 0 : i32
    %c0_i32_0 = arith.constant 0 : i32
    %c0_i32_1 = arith.constant 0 : i32
    %c0_i32_2 = arith.constant 0 : i32
    return %c0_i32, %c0_i32_0, %c0_i32_1 : i32, i32, i32
  }
  func.func @transform_3(%arg0: i32) -> (i32, i32, i32) {
    %c0_i32 = arith.constant 0 : i32
    %c0_i32_0 = arith.constant 0 : i32
    %c0_i32_1 = arith.constant 0 : i32
    %c0_i32_2 = arith.constant 0 : i32
    return %c0_i32, %c0_i32_0, %c0_i32_1 : i32, i32, i32
  }
  func.func @transform_4(%arg0: i32) -> (i32, i32, i32) {
    %c0_i32 = arith.constant 0 : i32
    %c0_i32_0 = arith.constant 0 : i32
    %c0_i32_1 = arith.constant 0 : i32
    %c0_i32_2 = arith.constant 0 : i32
    return %c0_i32, %c0_i32_0, %c0_i32_1 : i32, i32, i32
  }
  func.func @transform_5(%arg0: i32) -> (i32, i32) {
    %c0_i32 = arith.constant 0 : i32
    %c0_i32_0 = arith.constant 0 : i32
    %c0_i32_1 = arith.constant 0 : i32
    return %c0_i32, %c0_i32_0 : i32, i32
  }
  func.func @transform_6(%arg0: i32) -> (i32, i32) {
    %c0_i32 = arith.constant 0 : i32
    %c0_i32_0 = arith.constant 0 : i32
    %c0_i32_1 = arith.constant 0 : i32
    return %c0_i32, %c0_i32_0 : i32, i32
  }
  func.func @transform_7(%arg0: i32) -> (i32, i32) {
    %c0_i32 = arith.constant 0 : i32
    %c0_i32_0 = arith.constant 0 : i32
    return %arg0, %c0_i32 : i32, i32
  }
}

module attributes {stable_mosaic.version = 11 : i64} {
  func.func @kernel(%arg0: i32, %arg1: memref<1x64x8xf32, #tpu.memory_space<vmem>>, %arg2: memref<8x128xf32, #tpu.memory_space<vmem>>, %arg3: memref<1x32x128xf32, #tpu.memory_space<vmem>>, %arg4: memref<2x32x128xf32, #tpu.memory_space<vmem>>, %arg5: memref<2x1x128xf32, #tpu.memory_space<vmem>>, %arg6: memref<32x128xf32, #tpu.memory_space<vmem>>, %arg7: memref<1x128xf32, #tpu.memory_space<vmem>>, %arg8: memref<8x128xf32, #tpu.memory_space<vmem>>, %arg9: memref<64x128xf32, #tpu.memory_space<vmem>>, %arg10: memref<64x32xf32, #tpu.memory_space<vmem>>) attributes {dimension_semantics = [#tpu.dimension_semantics<parallel>], iteration_bounds = array<i64: 1>, scalar_prefetch = 0 : i64, scratch_operands = 2 : i64, tpu.core_type = #tpu.core_type<tc>, window_params = [{transform_indices = @transform_0, window_bounds = array<i64: 1, 64, 8>}, {pipeline_mode = #tpu.pipeline_mode<synchronous>, transform_indices = @transform_1, window_bounds = array<i64: 8, 128>}, {pipeline_mode = #tpu.pipeline_mode<synchronous>, transform_indices = @transform_2, window_bounds = array<i64: 1, 32, 128>}, {pipeline_mode = #tpu.pipeline_mode<synchronous>, transform_indices = @transform_3, window_bounds = array<i64: 2, 32, 128>}, {pipeline_mode = #tpu.pipeline_mode<synchronous>, transform_indices = @transform_4, window_bounds = array<i64: 2, 1, 128>}, {pipeline_mode = #tpu.pipeline_mode<synchronous>, transform_indices = @transform_5, window_bounds = array<i64: 32, 128>}, {pipeline_mode = #tpu.pipeline_mode<synchronous>, transform_indices = @transform_6, window_bounds = array<i64: 1, 128>}, {transform_indices = @transform_7, window_bounds = array<i64: 8, 128>}]} {
    %0 = tpu.iota {dimensions = array<i32: 1>} : vector<8x128xi32>
    %c64_i32 = arith.constant 64 : i32
    %1 = vector.broadcast %c64_i32 : i32 to vector<8x128xi32>
    %2 = arith.cmpi sge, %0, %1 : vector<8x128xi32>
    %c96_i32 = arith.constant 96 : i32
    %3 = vector.broadcast %c96_i32 : i32 to vector<8x128xi32>
    %4 = arith.cmpi slt, %0, %3 : vector<8x128xi32>
    %5 = arith.andi %2, %4 : vector<8x128xi1>
    %cst = arith.constant 0.000000e+00 : f32
    %6 = vector.broadcast %cst : f32 to vector<8x32xf32>
    %cst_0 = arith.constant 0.000000e+00 : f32
    %7 = vector.broadcast %cst_0 : f32 to vector<8x32xf32>
    %c0 = arith.constant 0 : index
    %c0_1 = arith.constant 0 : index
    %8 = vector.load %arg2[%c0, %c0_1] : memref<8x128xf32, #tpu.memory_space<vmem>>, vector<8x128xf32>
    %c0_2 = arith.constant 0 : index
    %c0_3 = arith.constant 0 : index
    %c0_4 = arith.constant 0 : index
    %9 = vector.load %arg1[%c0_2, %c0_3, %c0_4] : memref<1x64x8xf32, #tpu.memory_space<vmem>>, vector<1x64x8xf32>
    %10 = vector.shape_cast %9 : vector<1x64x8xf32> to vector<64x8xf32>
    %cst_5 = arith.constant dense<0.000000e+00> : vector<64x128xf32>
    %11 = tpu.matmul %10, %8, %cst_5 {dimension_numbers = #tpu.dot_dimension_numbers<[1], [0], [0], [1], [0, 0, 1, 1], [], []>} : vector<64x8xf32>, vector<8x128xf32>, vector<64x128xf32> -> vector<64x128xf32>
    %c0_6 = arith.constant 0 : index
    %c0_7 = arith.constant 0 : index
    %c0_8 = arith.constant 0 : index
    %12 = vector.load %arg5[%c0_6, %c0_7, %c0_8] : memref<2x1x128xf32, #tpu.memory_space<vmem>>, vector<1x1x128xf32>
    %13 = vector.shape_cast %12 : vector<1x1x128xf32> to vector<1x128xf32>
    %14 = vector.broadcast %13 : vector<1x128xf32> to vector<64x128xf32>
    %15 = arith.addf %11, %14 : vector<64x128xf32>
    %c0_9 = arith.constant 0 : index
    %c0_10 = arith.constant 0 : index
    %16 = vector.load %arg9[%c0_9, %c0_10] : memref<64x128xf32, #tpu.memory_space<vmem>>, vector<64x128xf32>
    tpu.vector_store %arg9[%c0_9, %c0_10], %15 {strides = array<i32>} : memref<64x128xf32, #tpu.memory_space<vmem>>, vector<64x128xf32>,
    %c0_i32 = arith.constant 0 : i32
    %c8_i32 = arith.constant 8 : i32
    %17 = arith.muli %c0_i32, %c8_i32 : i32
    %18 = tpu.assume_multiple %17, 8 : i32
    %c0_11 = arith.constant 0 : index
    %c0_12 = arith.constant 0 : index
    %c0_13 = arith.constant 0 : index
    %19 = vector.load %arg4[%c0_11, %c0_12, %c0_13] : memref<2x32x128xf32, #tpu.memory_space<vmem>>, vector<1x32x128xf32>
    %20 = vector.shape_cast %19 : vector<1x32x128xf32> to vector<32x128xf32>
    %21 = arith.index_cast %18 : i32 to index
    %c0_14 = arith.constant 0 : index
    %22 = vector.load %arg9[%21, %c0_14] : memref<64x128xf32, #tpu.memory_space<vmem>>, vector<8x128xf32>
    %cst_15 = arith.constant dense<0.000000e+00> : vector<8x128xf32>
    %23 = tpu.matmul %6, %20, %cst_15 {dimension_numbers = #tpu.dot_dimension_numbers<[1], [0], [0], [1], [0, 0, 1, 1], [], []>} : vector<8x32xf32>, vector<32x128xf32>, vector<8x128xf32> -> vector<8x128xf32>
    %24 = arith.addf %22, %23 : vector<8x128xf32>
    %cst_16 = arith.constant 5.000000e-01 : f32
    %25 = vector.broadcast %cst_16 : f32 to vector<8x128xf32>
    %26 = arith.mulf %25, %24 : vector<8x128xf32>
    %27 = arith.select %5, %24, %26 : vector<8x128xi1>, vector<8x128xf32>
    %28 = math.tanh %27 : vector<8x128xf32>
    %cst_17 = arith.constant 5.000000e-01 : f32
    %29 = vector.broadcast %cst_17 : f32 to vector<8x128xf32>
    %30 = arith.mulf %29, %28 : vector<8x128xf32>
    %cst_18 = arith.constant 5.000000e-01 : f32
    %31 = vector.broadcast %cst_18 : f32 to vector<8x128xf32>
    %32 = arith.addf %30, %31 : vector<8x128xf32>
    %33 = arith.select %5, %28, %32 : vector<8x128xi1>, vector<8x128xf32>
    %34 = vector.extract_strided_slice %33 {offsets = [0, 0], sizes = [8, 32], strides = [1, 1]} : vector<8x128xf32> to vector<8x32xf32>
    %35 = vector.extract_strided_slice %33 {offsets = [0, 32], sizes = [8, 32], strides = [1, 1]} : vector<8x128xf32> to vector<8x32xf32>
    %36 = vector.extract_strided_slice %33 {offsets = [0, 64], sizes = [8, 32], strides = [1, 1]} : vector<8x128xf32> to vector<8x32xf32>
    %37 = vector.extract_strided_slice %33 {offsets = [0, 96], sizes = [8, 32], strides = [1, 1]} : vector<8x128xf32> to vector<8x32xf32>
    %38 = arith.mulf %35, %7 : vector<8x32xf32>
    %39 = arith.mulf %34, %36 : vector<8x32xf32>
    %40 = arith.addf %38, %39 : vector<8x32xf32>
    %41 = math.tanh %40 : vector<8x32xf32>
    %42 = arith.mulf %37, %41 : vector<8x32xf32>
    %c0_i32_19 = arith.constant 0 : i32
    %43 = arith.addi %c0_i32_19, %18 : i32
    %44 = tpu.assume_multiple %43, 8 : i32
    %45 = arith.index_cast %44 : i32 to index
    %c0_20 = arith.constant 0 : index
    %46 = vector.load %arg10[%45, %c0_20] : memref<64x32xf32, #tpu.memory_space<vmem>>, vector<8x32xf32>
    tpu.vector_store %arg10[%45, %c0_20], %42 {strides = array<i32>} : memref<64x32xf32, #tpu.memory_space<vmem>>, vector<8x32xf32>,
    %c1_i32 = arith.constant 1 : i32
    %c8_i32_21 = arith.constant 8 : i32
    %47 = arith.muli %c1_i32, %c8_i32_21 : i32
    %48 = tpu.assume_multiple %47, 8 : i32
    %c0_22 = arith.constant 0 : index
    %c0_23 = arith.constant 0 : index
    %c0_24 = arith.constant 0 : index
    %49 = vector.load %arg4[%c0_22, %c0_23, %c0_24] : memref<2x32x128xf32, #tpu.memory_space<vmem>>, vector<1x32x128xf32>
    %50 = vector.shape_cast %49 : vector<1x32x128xf32> to vector<32x128xf32>
    %51 = arith.index_cast %48 : i32 to index
    %c0_25 = arith.constant 0 : index
    %52 = vector.load %arg9[%51, %c0_25] : memref<64x128xf32, #tpu.memory_space<vmem>>, vector<8x128xf32>
    %cst_26 = arith.constant dense<0.000000e+00> : vector<8x128xf32>
    %53 = tpu.matmul %42, %50, %cst_26 {dimension_numbers = #tpu.dot_dimension_numbers<[1], [0], [0], [1], [0, 0, 1, 1], [], []>} : vector<8x32xf32>, vector<32x128xf32>, vector<8x128xf32> -> vector<8x128xf32>
    %54 = arith.addf %52, %53 : vector<8x128xf32>
    %cst_27 = arith.constant 5.000000e-01 : f32
    %55 = vector.broadcast %cst_27 : f32 to vector<8x128xf32>
    %56 = arith.mulf %55, %54 : vector<8x128xf32>
    %57 = arith.select %5, %54, %56 : vector<8x128xi1>, vector<8x128xf32>
    %58 = math.tanh %57 : vector<8x128xf32>
    %cst_28 = arith.constant 5.000000e-01 : f32
    %59 = vector.broadcast %cst_28 : f32 to vector<8x128xf32>
    %60 = arith.mulf %59, %58 : vector<8x128xf32>
    %cst_29 = arith.constant 5.000000e-01 : f32
    %61 = vector.broadcast %cst_29 : f32 to vector<8x128xf32>
    %62 = arith.addf %60, %61 : vector<8x128xf32>
    %63 = arith.select %5, %58, %62 : vector<8x128xi1>, vector<8x128xf32>
    %64 = vector.extract_strided_slice %63 {offsets = [0, 0], sizes = [8, 32], strides = [1, 1]} : vector<8x128xf32> to vector<8x32xf32>
    %65 = vector.extract_strided_slice %63 {offsets = [0, 32], sizes = [8, 32], strides = [1, 1]} : vector<8x128xf32> to vector<8x32xf32>
    %66 = vector.extract_strided_slice %63 {offsets = [0, 64], sizes = [8, 32], strides = [1, 1]} : vector<8x128xf32> to vector<8x32xf32>
    %67 = vector.extract_strided_slice %63 {offsets = [0, 96], sizes = [8, 32], strides = [1, 1]} : vector<8x128xf32> to vector<8x32xf32>
    %68 = arith.mulf %65, %40 : vector<8x32xf32>
    %69 = arith.mulf %64, %66 : vector<8x32xf32>
    %70 = arith.addf %68, %69 : vector<8x32xf32>
    %71 = math.tanh %70 : vector<8x32xf32>
    %72 = arith.mulf %67, %71 : vector<8x32xf32>
    %c0_i32_30 = arith.constant 0 : i32
    %73 = arith.addi %c0_i32_30, %48 : i32
    %74 = tpu.assume_multiple %73, 8 : i32
    %75 = arith.index_cast %74 : i32 to index
    %c0_31 = arith.constant 0 : index
    %76 = vector.load %arg10[%75, %c0_31] : memref<64x32xf32, #tpu.memory_space<vmem>>, vector<8x32xf32>
    tpu.vector_store %arg10[%75, %c0_31], %72 {strides = array<i32>} : memref<64x32xf32, #tpu.memory_space<vmem>>, vector<8x32xf32>,
    %c2_i32 = arith.constant 2 : i32
    %c8_i32_32 = arith.constant 8 : i32
    %77 = arith.muli %c2_i32, %c8_i32_32 : i32
    %78 = tpu.assume_multiple %77, 8 : i32
    %c0_33 = arith.constant 0 : index
    %c0_34 = arith.constant 0 : index
    %c0_35 = arith.constant 0 : index
    %79 = vector.load %arg4[%c0_33, %c0_34, %c0_35] : memref<2x32x128xf32, #tpu.memory_space<vmem>>, vector<1x32x128xf32>
    %80 = vector.shape_cast %79 : vector<1x32x128xf32> to vector<32x128xf32>
    %81 = arith.index_cast %78 : i32 to index
    %c0_36 = arith.constant 0 : index
    %82 = vector.load %arg9[%81, %c0_36] : memref<64x128xf32, #tpu.memory_space<vmem>>, vector<8x128xf32>
    %cst_37 = arith.constant dense<0.000000e+00> : vector<8x128xf32>
    %83 = tpu.matmul %72, %80, %cst_37 {dimension_numbers = #tpu.dot_dimension_numbers<[1], [0], [0], [1], [0, 0, 1, 1], [], []>} : vector<8x32xf32>, vector<32x128xf32>, vector<8x128xf32> -> vector<8x128xf32>
    %84 = arith.addf %82, %83 : vector<8x128xf32>
    %cst_38 = arith.constant 5.000000e-01 : f32
    %85 = vector.broadcast %cst_38 : f32 to vector<8x128xf32>
    %86 = arith.mulf %85, %84 : vector<8x128xf32>
    %87 = arith.select %5, %84, %86 : vector<8x128xi1>, vector<8x128xf32>
    %88 = math.tanh %87 : vector<8x128xf32>
    %cst_39 = arith.constant 5.000000e-01 : f32
    %89 = vector.broadcast %cst_39 : f32 to vector<8x128xf32>
    %90 = arith.mulf %89, %88 : vector<8x128xf32>
    %cst_40 = arith.constant 5.000000e-01 : f32
    %91 = vector.broadcast %cst_40 : f32 to vector<8x128xf32>
    %92 = arith.addf %90, %91 : vector<8x128xf32>
    %93 = arith.select %5, %88, %92 : vector<8x128xi1>, vector<8x128xf32>
    %94 = vector.extract_strided_slice %93 {offsets = [0, 0], sizes = [8, 32], strides = [1, 1]} : vector<8x128xf32> to vector<8x32xf32>
    %95 = vector.extract_strided_slice %93 {offsets = [0, 32], sizes = [8, 32], strides = [1, 1]} : vector<8x128xf32> to vector<8x32xf32>
    %96 = vector.extract_strided_slice %93 {offsets = [0, 64], sizes = [8, 32], strides = [1, 1]} : vector<8x128xf32> to vector<8x32xf32>
    %97 = vector.extract_strided_slice %93 {offsets = [0, 96], sizes = [8, 32], strides = [1, 1]} : vector<8x128xf32> to vector<8x32xf32>
    %98 = arith.mulf %95, %70 : vector<8x32xf32>
    %99 = arith.mulf %94, %96 : vector<8x32xf32>
    %100 = arith.addf %98, %99 : vector<8x32xf32>
    %101 = math.tanh %100 : vector<8x32xf32>
    %102 = arith.mulf %97, %101 : vector<8x32xf32>
    %c0_i32_41 = arith.constant 0 : i32
    %103 = arith.addi %c0_i32_41, %78 : i32
    %104 = tpu.assume_multiple %103, 8 : i32
    %105 = arith.index_cast %104 : i32 to index
    %c0_42 = arith.constant 0 : index
    %106 = vector.load %arg10[%105, %c0_42] : memref<64x32xf32, #tpu.memory_space<vmem>>, vector<8x32xf32>
    tpu.vector_store %arg10[%105, %c0_42], %102 {strides = array<i32>} : memref<64x32xf32, #tpu.memory_space<vmem>>, vector<8x32xf32>,
    %c3_i32 = arith.constant 3 : i32
    %c8_i32_43 = arith.constant 8 : i32
    %107 = arith.muli %c3_i32, %c8_i32_43 : i32
    %108 = tpu.assume_multiple %107, 8 : i32
    %c0_44 = arith.constant 0 : index
    %c0_45 = arith.constant 0 : index
    %c0_46 = arith.constant 0 : index
    %109 = vector.load %arg4[%c0_44, %c0_45, %c0_46] : memref<2x32x128xf32, #tpu.memory_space<vmem>>, vector<1x32x128xf32>
    %110 = vector.shape_cast %109 : vector<1x32x128xf32> to vector<32x128xf32>
    %111 = arith.index_cast %108 : i32 to index
    %c0_47 = arith.constant 0 : index
    %112 = vector.load %arg9[%111, %c0_47] : memref<64x128xf32, #tpu.memory_space<vmem>>, vector<8x128xf32>
    %cst_48 = arith.constant dense<0.000000e+00> : vector<8x128xf32>
    %113 = tpu.matmul %102, %110, %cst_48 {dimension_numbers = #tpu.dot_dimension_numbers<[1], [0], [0], [1], [0, 0, 1, 1], [], []>} : vector<8x32xf32>, vector<32x128xf32>, vector<8x128xf32> -> vector<8x128xf32>
    %114 = arith.addf %112, %113 : vector<8x128xf32>
    %cst_49 = arith.constant 5.000000e-01 : f32
    %115 = vector.broadcast %cst_49 : f32 to vector<8x128xf32>
    %116 = arith.mulf %115, %114 : vector<8x128xf32>
    %117 = arith.select %5, %114, %116 : vector<8x128xi1>, vector<8x128xf32>
    %118 = math.tanh %117 : vector<8x128xf32>
    %cst_50 = arith.constant 5.000000e-01 : f32
    %119 = vector.broadcast %cst_50 : f32 to vector<8x128xf32>
    %120 = arith.mulf %119, %118 : vector<8x128xf32>
    %cst_51 = arith.constant 5.000000e-01 : f32
    %121 = vector.broadcast %cst_51 : f32 to vector<8x128xf32>
    %122 = arith.addf %120, %121 : vector<8x128xf32>
    %123 = arith.select %5, %118, %122 : vector<8x128xi1>, vector<8x128xf32>
    %124 = vector.extract_strided_slice %123 {offsets = [0, 0], sizes = [8, 32], strides = [1, 1]} : vector<8x128xf32> to vector<8x32xf32>
    %125 = vector.extract_strided_slice %123 {offsets = [0, 32], sizes = [8, 32], strides = [1, 1]} : vector<8x128xf32> to vector<8x32xf32>
    %126 = vector.extract_strided_slice %123 {offsets = [0, 64], sizes = [8, 32], strides = [1, 1]} : vector<8x128xf32> to vector<8x32xf32>
    %127 = vector.extract_strided_slice %123 {offsets = [0, 96], sizes = [8, 32], strides = [1, 1]} : vector<8x128xf32> to vector<8x32xf32>
    %128 = arith.mulf %125, %100 : vector<8x32xf32>
    %129 = arith.mulf %124, %126 : vector<8x32xf32>
    %130 = arith.addf %128, %129 : vector<8x32xf32>
    %131 = math.tanh %130 : vector<8x32xf32>
    %132 = arith.mulf %127, %131 : vector<8x32xf32>
    %c0_i32_52 = arith.constant 0 : i32
    %133 = arith.addi %c0_i32_52, %108 : i32
    %134 = tpu.assume_multiple %133, 8 : i32
    %135 = arith.index_cast %134 : i32 to index
    %c0_53 = arith.constant 0 : index
    %136 = vector.load %arg10[%135, %c0_53] : memref<64x32xf32, #tpu.memory_space<vmem>>, vector<8x32xf32>
    tpu.vector_store %arg10[%135, %c0_53], %132 {strides = array<i32>} : memref<64x32xf32, #tpu.memory_space<vmem>>, vector<8x32xf32>,
    %c4_i32 = arith.constant 4 : i32
    %c8_i32_54 = arith.constant 8 : i32
    %137 = arith.muli %c4_i32, %c8_i32_54 : i32
    %138 = tpu.assume_multiple %137, 8 : i32
    %c0_55 = arith.constant 0 : index
    %c0_56 = arith.constant 0 : index
    %c0_57 = arith.constant 0 : index
    %139 = vector.load %arg4[%c0_55, %c0_56, %c0_57] : memref<2x32x128xf32, #tpu.memory_space<vmem>>, vector<1x32x128xf32>
    %140 = vector.shape_cast %139 : vector<1x32x128xf32> to vector<32x128xf32>
    %141 = arith.index_cast %138 : i32 to index
    %c0_58 = arith.constant 0 : index
    %142 = vector.load %arg9[%141, %c0_58] : memref<64x128xf32, #tpu.memory_space<vmem>>, vector<8x128xf32>
    %cst_59 = arith.constant dense<0.000000e+00> : vector<8x128xf32>
    %143 = tpu.matmul %132, %140, %cst_59 {dimension_numbers = #tpu.dot_dimension_numbers<[1], [0], [0], [1], [0, 0, 1, 1], [], []>} : vector<8x32xf32>, vector<32x128xf32>, vector<8x128xf32> -> vector<8x128xf32>
    %144 = arith.addf %142, %143 : vector<8x128xf32>
    %cst_60 = arith.constant 5.000000e-01 : f32
    %145 = vector.broadcast %cst_60 : f32 to vector<8x128xf32>
    %146 = arith.mulf %145, %144 : vector<8x128xf32>
    %147 = arith.select %5, %144, %146 : vector<8x128xi1>, vector<8x128xf32>
    %148 = math.tanh %147 : vector<8x128xf32>
    %cst_61 = arith.constant 5.000000e-01 : f32
    %149 = vector.broadcast %cst_61 : f32 to vector<8x128xf32>
    %150 = arith.mulf %149, %148 : vector<8x128xf32>
    %cst_62 = arith.constant 5.000000e-01 : f32
    %151 = vector.broadcast %cst_62 : f32 to vector<8x128xf32>
    %152 = arith.addf %150, %151 : vector<8x128xf32>
    %153 = arith.select %5, %148, %152 : vector<8x128xi1>, vector<8x128xf32>
    %154 = vector.extract_strided_slice %153 {offsets = [0, 0], sizes = [8, 32], strides = [1, 1]} : vector<8x128xf32> to vector<8x32xf32>
    %155 = vector.extract_strided_slice %153 {offsets = [0, 32], sizes = [8, 32], strides = [1, 1]} : vector<8x128xf32> to vector<8x32xf32>
    %156 = vector.extract_strided_slice %153 {offsets = [0, 64], sizes = [8, 32], strides = [1, 1]} : vector<8x128xf32> to vector<8x32xf32>
    %157 = vector.extract_strided_slice %153 {offsets = [0, 96], sizes = [8, 32], strides = [1, 1]} : vector<8x128xf32> to vector<8x32xf32>
    %158 = arith.mulf %155, %130 : vector<8x32xf32>
    %159 = arith.mulf %154, %156 : vector<8x32xf32>
    %160 = arith.addf %158, %159 : vector<8x32xf32>
    %161 = math.tanh %160 : vector<8x32xf32>
    %162 = arith.mulf %157, %161 : vector<8x32xf32>
    %c0_i32_63 = arith.constant 0 : i32
    %163 = arith.addi %c0_i32_63, %138 : i32
    %164 = tpu.assume_multiple %163, 8 : i32
    %165 = arith.index_cast %164 : i32 to index
    %c0_64 = arith.constant 0 : index
    %166 = vector.load %arg10[%165, %c0_64] : memref<64x32xf32, #tpu.memory_space<vmem>>, vector<8x32xf32>
    tpu.vector_store %arg10[%165, %c0_64], %162 {strides = array<i32>} : memref<64x32xf32, #tpu.memory_space<vmem>>, vector<8x32xf32>,
    %c5_i32 = arith.constant 5 : i32
    %c8_i32_65 = arith.constant 8 : i32
    %167 = arith.muli %c5_i32, %c8_i32_65 : i32
    %168 = tpu.assume_multiple %167, 8 : i32
    %c0_66 = arith.constant 0 : index
    %c0_67 = arith.constant 0 : index
    %c0_68 = arith.constant 0 : index
    %169 = vector.load %arg4[%c0_66, %c0_67, %c0_68] : memref<2x32x128xf32, #tpu.memory_space<vmem>>, vector<1x32x128xf32>
    %170 = vector.shape_cast %169 : vector<1x32x128xf32> to vector<32x128xf32>
    %171 = arith.index_cast %168 : i32 to index
    %c0_69 = arith.constant 0 : index
    %172 = vector.load %arg9[%171, %c0_69] : memref<64x128xf32, #tpu.memory_space<vmem>>, vector<8x128xf32>
    %cst_70 = arith.constant dense<0.000000e+00> : vector<8x128xf32>
    %173 = tpu.matmul %162, %170, %cst_70 {dimension_numbers = #tpu.dot_dimension_numbers<[1], [0], [0], [1], [0, 0, 1, 1], [], []>} : vector<8x32xf32>, vector<32x128xf32>, vector<8x128xf32> -> vector<8x128xf32>
    %174 = arith.addf %172, %173 : vector<8x128xf32>
    %cst_71 = arith.constant 5.000000e-01 : f32
    %175 = vector.broadcast %cst_71 : f32 to vector<8x128xf32>
    %176 = arith.mulf %175, %174 : vector<8x128xf32>
    %177 = arith.select %5, %174, %176 : vector<8x128xi1>, vector<8x128xf32>
    %178 = math.tanh %177 : vector<8x128xf32>
    %cst_72 = arith.constant 5.000000e-01 : f32
    %179 = vector.broadcast %cst_72 : f32 to vector<8x128xf32>
    %180 = arith.mulf %179, %178 : vector<8x128xf32>
    %cst_73 = arith.constant 5.000000e-01 : f32
    %181 = vector.broadcast %cst_73 : f32 to vector<8x128xf32>
    %182 = arith.addf %180, %181 : vector<8x128xf32>
    %183 = arith.select %5, %178, %182 : vector<8x128xi1>, vector<8x128xf32>
    %184 = vector.extract_strided_slice %183 {offsets = [0, 0], sizes = [8, 32], strides = [1, 1]} : vector<8x128xf32> to vector<8x32xf32>
    %185 = vector.extract_strided_slice %183 {offsets = [0, 32], sizes = [8, 32], strides = [1, 1]} : vector<8x128xf32> to vector<8x32xf32>
    %186 = vector.extract_strided_slice %183 {offsets = [0, 64], sizes = [8, 32], strides = [1, 1]} : vector<8x128xf32> to vector<8x32xf32>
    %187 = vector.extract_strided_slice %183 {offsets = [0, 96], sizes = [8, 32], strides = [1, 1]} : vector<8x128xf32> to vector<8x32xf32>
    %188 = arith.mulf %185, %160 : vector<8x32xf32>
    %189 = arith.mulf %184, %186 : vector<8x32xf32>
    %190 = arith.addf %188, %189 : vector<8x32xf32>
    %191 = math.tanh %190 : vector<8x32xf32>
    %192 = arith.mulf %187, %191 : vector<8x32xf32>
    %c0_i32_74 = arith.constant 0 : i32
    %193 = arith.addi %c0_i32_74, %168 : i32
    %194 = tpu.assume_multiple %193, 8 : i32
    %195 = arith.index_cast %194 : i32 to index
    %c0_75 = arith.constant 0 : index
    %196 = vector.load %arg10[%195, %c0_75] : memref<64x32xf32, #tpu.memory_space<vmem>>, vector<8x32xf32>
    tpu.vector_store %arg10[%195, %c0_75], %192 {strides = array<i32>} : memref<64x32xf32, #tpu.memory_space<vmem>>, vector<8x32xf32>,
    %c6_i32 = arith.constant 6 : i32
    %c8_i32_76 = arith.constant 8 : i32
    %197 = arith.muli %c6_i32, %c8_i32_76 : i32
    %198 = tpu.assume_multiple %197, 8 : i32
    %c0_77 = arith.constant 0 : index
    %c0_78 = arith.constant 0 : index
    %c0_79 = arith.constant 0 : index
    %199 = vector.load %arg4[%c0_77, %c0_78, %c0_79] : memref<2x32x128xf32, #tpu.memory_space<vmem>>, vector<1x32x128xf32>
    %200 = vector.shape_cast %199 : vector<1x32x128xf32> to vector<32x128xf32>
    %201 = arith.index_cast %198 : i32 to index
    %c0_80 = arith.constant 0 : index
    %202 = vector.load %arg9[%201, %c0_80] : memref<64x128xf32, #tpu.memory_space<vmem>>, vector<8x128xf32>
    %cst_81 = arith.constant dense<0.000000e+00> : vector<8x128xf32>
    %203 = tpu.matmul %192, %200, %cst_81 {dimension_numbers = #tpu.dot_dimension_numbers<[1], [0], [0], [1], [0, 0, 1, 1], [], []>} : vector<8x32xf32>, vector<32x128xf32>, vector<8x128xf32> -> vector<8x128xf32>
    %204 = arith.addf %202, %203 : vector<8x128xf32>
    %cst_82 = arith.constant 5.000000e-01 : f32
    %205 = vector.broadcast %cst_82 : f32 to vector<8x128xf32>
    %206 = arith.mulf %205, %204 : vector<8x128xf32>
    %207 = arith.select %5, %204, %206 : vector<8x128xi1>, vector<8x128xf32>
    %208 = math.tanh %207 : vector<8x128xf32>
    %cst_83 = arith.constant 5.000000e-01 : f32
    %209 = vector.broadcast %cst_83 : f32 to vector<8x128xf32>
    %210 = arith.mulf %209, %208 : vector<8x128xf32>
    %cst_84 = arith.constant 5.000000e-01 : f32
    %211 = vector.broadcast %cst_84 : f32 to vector<8x128xf32>
    %212 = arith.addf %210, %211 : vector<8x128xf32>
    %213 = arith.select %5, %208, %212 : vector<8x128xi1>, vector<8x128xf32>
    %214 = vector.extract_strided_slice %213 {offsets = [0, 0], sizes = [8, 32], strides = [1, 1]} : vector<8x128xf32> to vector<8x32xf32>
    %215 = vector.extract_strided_slice %213 {offsets = [0, 32], sizes = [8, 32], strides = [1, 1]} : vector<8x128xf32> to vector<8x32xf32>
    %216 = vector.extract_strided_slice %213 {offsets = [0, 64], sizes = [8, 32], strides = [1, 1]} : vector<8x128xf32> to vector<8x32xf32>
    %217 = vector.extract_strided_slice %213 {offsets = [0, 96], sizes = [8, 32], strides = [1, 1]} : vector<8x128xf32> to vector<8x32xf32>
    %218 = arith.mulf %215, %190 : vector<8x32xf32>
    %219 = arith.mulf %214, %216 : vector<8x32xf32>
    %220 = arith.addf %218, %219 : vector<8x32xf32>
    %221 = math.tanh %220 : vector<8x32xf32>
    %222 = arith.mulf %217, %221 : vector<8x32xf32>
    %c0_i32_85 = arith.constant 0 : i32
    %223 = arith.addi %c0_i32_85, %198 : i32
    %224 = tpu.assume_multiple %223, 8 : i32
    %225 = arith.index_cast %224 : i32 to index
    %c0_86 = arith.constant 0 : index
    %226 = vector.load %arg10[%225, %c0_86] : memref<64x32xf32, #tpu.memory_space<vmem>>, vector<8x32xf32>
    tpu.vector_store %arg10[%225, %c0_86], %222 {strides = array<i32>} : memref<64x32xf32, #tpu.memory_space<vmem>>, vector<8x32xf32>,
    %c7_i32 = arith.constant 7 : i32
    %c8_i32_87 = arith.constant 8 : i32
    %227 = arith.muli %c7_i32, %c8_i32_87 : i32
    %228 = tpu.assume_multiple %227, 8 : i32
    %c0_88 = arith.constant 0 : index
    %c0_89 = arith.constant 0 : index
    %c0_90 = arith.constant 0 : index
    %229 = vector.load %arg4[%c0_88, %c0_89, %c0_90] : memref<2x32x128xf32, #tpu.memory_space<vmem>>, vector<1x32x128xf32>
    %230 = vector.shape_cast %229 : vector<1x32x128xf32> to vector<32x128xf32>
    %231 = arith.index_cast %228 : i32 to index
    %c0_91 = arith.constant 0 : index
    %232 = vector.load %arg9[%231, %c0_91] : memref<64x128xf32, #tpu.memory_space<vmem>>, vector<8x128xf32>
    %cst_92 = arith.constant dense<0.000000e+00> : vector<8x128xf32>
    %233 = tpu.matmul %222, %230, %cst_92 {dimension_numbers = #tpu.dot_dimension_numbers<[1], [0], [0], [1], [0, 0, 1, 1], [], []>} : vector<8x32xf32>, vector<32x128xf32>, vector<8x128xf32> -> vector<8x128xf32>
    %234 = arith.addf %232, %233 : vector<8x128xf32>
    %cst_93 = arith.constant 5.000000e-01 : f32
    %235 = vector.broadcast %cst_93 : f32 to vector<8x128xf32>
    %236 = arith.mulf %235, %234 : vector<8x128xf32>
    %237 = arith.select %5, %234, %236 : vector<8x128xi1>, vector<8x128xf32>
    %238 = math.tanh %237 : vector<8x128xf32>
    %cst_94 = arith.constant 5.000000e-01 : f32
    %239 = vector.broadcast %cst_94 : f32 to vector<8x128xf32>
    %240 = arith.mulf %239, %238 : vector<8x128xf32>
    %cst_95 = arith.constant 5.000000e-01 : f32
    %241 = vector.broadcast %cst_95 : f32 to vector<8x128xf32>
    %242 = arith.addf %240, %241 : vector<8x128xf32>
    %243 = arith.select %5, %238, %242 : vector<8x128xi1>, vector<8x128xf32>
    %244 = vector.extract_strided_slice %243 {offsets = [0, 0], sizes = [8, 32], strides = [1, 1]} : vector<8x128xf32> to vector<8x32xf32>
    %245 = vector.extract_strided_slice %243 {offsets = [0, 32], sizes = [8, 32], strides = [1, 1]} : vector<8x128xf32> to vector<8x32xf32>
    %246 = vector.extract_strided_slice %243 {offsets = [0, 64], sizes = [8, 32], strides = [1, 1]} : vector<8x128xf32> to vector<8x32xf32>
    %247 = vector.extract_strided_slice %243 {offsets = [0, 96], sizes = [8, 32], strides = [1, 1]} : vector<8x128xf32> to vector<8x32xf32>
    %248 = arith.mulf %245, %220 : vector<8x32xf32>
    %249 = arith.mulf %244, %246 : vector<8x32xf32>
    %250 = arith.addf %248, %249 : vector<8x32xf32>
    %251 = math.tanh %250 : vector<8x32xf32>
    %252 = arith.mulf %247, %251 : vector<8x32xf32>
    %c0_i32_96 = arith.constant 0 : i32
    %253 = arith.addi %c0_i32_96, %228 : i32
    %254 = tpu.assume_multiple %253, 8 : i32
    %255 = arith.index_cast %254 : i32 to index
    %c0_97 = arith.constant 0 : index
    %256 = vector.load %arg10[%255, %c0_97] : memref<64x32xf32, #tpu.memory_space<vmem>>, vector<8x32xf32>
    tpu.vector_store %arg10[%255, %c0_97], %252 {strides = array<i32>} : memref<64x32xf32, #tpu.memory_space<vmem>>, vector<8x32xf32>,
    %c8_i32_98 = arith.constant 8 : i32
    %cst_99 = arith.constant 0.000000e+00 : f32
    %257 = vector.broadcast %cst_99 : f32 to vector<8x32xf32>
    %cst_100 = arith.constant 0.000000e+00 : f32
    %258 = vector.broadcast %cst_100 : f32 to vector<8x32xf32>
    %c0_101 = arith.constant 0 : index
    %c0_102 = arith.constant 0 : index
    %c0_103 = arith.constant 0 : index
    %259 = vector.load %arg3[%c0_101, %c0_102, %c0_103] : memref<1x32x128xf32, #tpu.memory_space<vmem>>, vector<1x32x128xf32>
    %260 = vector.shape_cast %259 : vector<1x32x128xf32> to vector<32x128xf32>
    %c0_104 = arith.constant 0 : index
    %c0_105 = arith.constant 0 : index
    %261 = vector.load %arg10[%c0_104, %c0_105] : memref<64x32xf32, #tpu.memory_space<vmem>>, vector<64x32xf32>
    %cst_106 = arith.constant dense<0.000000e+00> : vector<64x128xf32>
    %262 = tpu.matmul %261, %260, %cst_106 {dimension_numbers = #tpu.dot_dimension_numbers<[1], [0], [0], [1], [0, 0, 1, 1], [], []>} : vector<64x32xf32>, vector<32x128xf32>, vector<64x128xf32> -> vector<64x128xf32>
    %c1 = arith.constant 1 : index
    %c0_107 = arith.constant 0 : index
    %c0_108 = arith.constant 0 : index
    %263 = vector.load %arg5[%c1, %c0_107, %c0_108] : memref<2x1x128xf32, #tpu.memory_space<vmem>>, vector<1x1x128xf32>
    %264 = vector.shape_cast %263 : vector<1x1x128xf32> to vector<1x128xf32>
    %265 = vector.broadcast %264 : vector<1x128xf32> to vector<64x128xf32>
    %266 = arith.addf %262, %265 : vector<64x128xf32>
    %c0_109 = arith.constant 0 : index
    %c0_110 = arith.constant 0 : index
    %267 = vector.load %arg9[%c0_109, %c0_110] : memref<64x128xf32, #tpu.memory_space<vmem>>, vector<64x128xf32>
    tpu.vector_store %arg9[%c0_109, %c0_110], %266 {strides = array<i32>} : memref<64x128xf32, #tpu.memory_space<vmem>>, vector<64x128xf32>,
    %c0_i32_111 = arith.constant 0 : i32
    %c8_i32_112 = arith.constant 8 : i32
    %268 = arith.muli %c0_i32_111, %c8_i32_112 : i32
    %269 = tpu.assume_multiple %268, 8 : i32
    %c1_113 = arith.constant 1 : index
    %c0_114 = arith.constant 0 : index
    %c0_115 = arith.constant 0 : index
    %270 = vector.load %arg4[%c1_113, %c0_114, %c0_115] : memref<2x32x128xf32, #tpu.memory_space<vmem>>, vector<1x32x128xf32>
    %271 = vector.shape_cast %270 : vector<1x32x128xf32> to vector<32x128xf32>
    %272 = arith.index_cast %269 : i32 to index
    %c0_116 = arith.constant 0 : index
    %273 = vector.load %arg9[%272, %c0_116] : memref<64x128xf32, #tpu.memory_space<vmem>>, vector<8x128xf32>
    %cst_117 = arith.constant dense<0.000000e+00> : vector<8x128xf32>
    %274 = tpu.matmul %257, %271, %cst_117 {dimension_numbers = #tpu.dot_dimension_numbers<[1], [0], [0], [1], [0, 0, 1, 1], [], []>} : vector<8x32xf32>, vector<32x128xf32>, vector<8x128xf32> -> vector<8x128xf32>
    %275 = arith.addf %273, %274 : vector<8x128xf32>
    %cst_118 = arith.constant 5.000000e-01 : f32
    %276 = vector.broadcast %cst_118 : f32 to vector<8x128xf32>
    %277 = arith.mulf %276, %275 : vector<8x128xf32>
    %278 = arith.select %5, %275, %277 : vector<8x128xi1>, vector<8x128xf32>
    %279 = math.tanh %278 : vector<8x128xf32>
    %cst_119 = arith.constant 5.000000e-01 : f32
    %280 = vector.broadcast %cst_119 : f32 to vector<8x128xf32>
    %281 = arith.mulf %280, %279 : vector<8x128xf32>
    %cst_120 = arith.constant 5.000000e-01 : f32
    %282 = vector.broadcast %cst_120 : f32 to vector<8x128xf32>
    %283 = arith.addf %281, %282 : vector<8x128xf32>
    %284 = arith.select %5, %279, %283 : vector<8x128xi1>, vector<8x128xf32>
    %285 = vector.extract_strided_slice %284 {offsets = [0, 0], sizes = [8, 32], strides = [1, 1]} : vector<8x128xf32> to vector<8x32xf32>
    %286 = vector.extract_strided_slice %284 {offsets = [0, 32], sizes = [8, 32], strides = [1, 1]} : vector<8x128xf32> to vector<8x32xf32>
    %287 = vector.extract_strided_slice %284 {offsets = [0, 64], sizes = [8, 32], strides = [1, 1]} : vector<8x128xf32> to vector<8x32xf32>
    %288 = vector.extract_strided_slice %284 {offsets = [0, 96], sizes = [8, 32], strides = [1, 1]} : vector<8x128xf32> to vector<8x32xf32>
    %289 = arith.mulf %286, %258 : vector<8x32xf32>
    %290 = arith.mulf %285, %287 : vector<8x32xf32>
    %291 = arith.addf %289, %290 : vector<8x32xf32>
    %292 = math.tanh %291 : vector<8x32xf32>
    %293 = arith.mulf %288, %292 : vector<8x32xf32>
    %c1_i32_121 = arith.constant 1 : i32
    %c8_i32_122 = arith.constant 8 : i32
    %294 = arith.muli %c1_i32_121, %c8_i32_122 : i32
    %295 = tpu.assume_multiple %294, 8 : i32
    %c1_123 = arith.constant 1 : index
    %c0_124 = arith.constant 0 : index
    %c0_125 = arith.constant 0 : index
    %296 = vector.load %arg4[%c1_123, %c0_124, %c0_125] : memref<2x32x128xf32, #tpu.memory_space<vmem>>, vector<1x32x128xf32>
    %297 = vector.shape_cast %296 : vector<1x32x128xf32> to vector<32x128xf32>
    %298 = arith.index_cast %295 : i32 to index
    %c0_126 = arith.constant 0 : index
    %299 = vector.load %arg9[%298, %c0_126] : memref<64x128xf32, #tpu.memory_space<vmem>>, vector<8x128xf32>
    %cst_127 = arith.constant dense<0.000000e+00> : vector<8x128xf32>
    %300 = tpu.matmul %293, %297, %cst_127 {dimension_numbers = #tpu.dot_dimension_numbers<[1], [0], [0], [1], [0, 0, 1, 1], [], []>} : vector<8x32xf32>, vector<32x128xf32>, vector<8x128xf32> -> vector<8x128xf32>
    %301 = arith.addf %299, %300 : vector<8x128xf32>
    %cst_128 = arith.constant 5.000000e-01 : f32
    %302 = vector.broadcast %cst_128 : f32 to vector<8x128xf32>
    %303 = arith.mulf %302, %301 : vector<8x128xf32>
    %304 = arith.select %5, %301, %303 : vector<8x128xi1>, vector<8x128xf32>
    %305 = math.tanh %304 : vector<8x128xf32>
    %cst_129 = arith.constant 5.000000e-01 : f32
    %306 = vector.broadcast %cst_129 : f32 to vector<8x128xf32>
    %307 = arith.mulf %306, %305 : vector<8x128xf32>
    %cst_130 = arith.constant 5.000000e-01 : f32
    %308 = vector.broadcast %cst_130 : f32 to vector<8x128xf32>
    %309 = arith.addf %307, %308 : vector<8x128xf32>
    %310 = arith.select %5, %305, %309 : vector<8x128xi1>, vector<8x128xf32>
    %311 = vector.extract_strided_slice %310 {offsets = [0, 0], sizes = [8, 32], strides = [1, 1]} : vector<8x128xf32> to vector<8x32xf32>
    %312 = vector.extract_strided_slice %310 {offsets = [0, 32], sizes = [8, 32], strides = [1, 1]} : vector<8x128xf32> to vector<8x32xf32>
    %313 = vector.extract_strided_slice %310 {offsets = [0, 64], sizes = [8, 32], strides = [1, 1]} : vector<8x128xf32> to vector<8x32xf32>
    %314 = vector.extract_strided_slice %310 {offsets = [0, 96], sizes = [8, 32], strides = [1, 1]} : vector<8x128xf32> to vector<8x32xf32>
    %315 = arith.mulf %312, %291 : vector<8x32xf32>
    %316 = arith.mulf %311, %313 : vector<8x32xf32>
    %317 = arith.addf %315, %316 : vector<8x32xf32>
    %318 = math.tanh %317 : vector<8x32xf32>
    %319 = arith.mulf %314, %318 : vector<8x32xf32>
    %c2_i32_131 = arith.constant 2 : i32
    %c8_i32_132 = arith.constant 8 : i32
    %320 = arith.muli %c2_i32_131, %c8_i32_132 : i32
    %321 = tpu.assume_multiple %320, 8 : i32
    %c1_133 = arith.constant 1 : index
    %c0_134 = arith.constant 0 : index
    %c0_135 = arith.constant 0 : index
    %322 = vector.load %arg4[%c1_133, %c0_134, %c0_135] : memref<2x32x128xf32, #tpu.memory_space<vmem>>, vector<1x32x128xf32>
    %323 = vector.shape_cast %322 : vector<1x32x128xf32> to vector<32x128xf32>
    %324 = arith.index_cast %321 : i32 to index
    %c0_136 = arith.constant 0 : index
    %325 = vector.load %arg9[%324, %c0_136] : memref<64x128xf32, #tpu.memory_space<vmem>>, vector<8x128xf32>
    %cst_137 = arith.constant dense<0.000000e+00> : vector<8x128xf32>
    %326 = tpu.matmul %319, %323, %cst_137 {dimension_numbers = #tpu.dot_dimension_numbers<[1], [0], [0], [1], [0, 0, 1, 1], [], []>} : vector<8x32xf32>, vector<32x128xf32>, vector<8x128xf32> -> vector<8x128xf32>
    %327 = arith.addf %325, %326 : vector<8x128xf32>
    %cst_138 = arith.constant 5.000000e-01 : f32
    %328 = vector.broadcast %cst_138 : f32 to vector<8x128xf32>
    %329 = arith.mulf %328, %327 : vector<8x128xf32>
    %330 = arith.select %5, %327, %329 : vector<8x128xi1>, vector<8x128xf32>
    %331 = math.tanh %330 : vector<8x128xf32>
    %cst_139 = arith.constant 5.000000e-01 : f32
    %332 = vector.broadcast %cst_139 : f32 to vector<8x128xf32>
    %333 = arith.mulf %332, %331 : vector<8x128xf32>
    %cst_140 = arith.constant 5.000000e-01 : f32
    %334 = vector.broadcast %cst_140 : f32 to vector<8x128xf32>
    %335 = arith.addf %333, %334 : vector<8x128xf32>
    %336 = arith.select %5, %331, %335 : vector<8x128xi1>, vector<8x128xf32>
    %337 = vector.extract_strided_slice %336 {offsets = [0, 0], sizes = [8, 32], strides = [1, 1]} : vector<8x128xf32> to vector<8x32xf32>
    %338 = vector.extract_strided_slice %336 {offsets = [0, 32], sizes = [8, 32], strides = [1, 1]} : vector<8x128xf32> to vector<8x32xf32>
    %339 = vector.extract_strided_slice %336 {offsets = [0, 64], sizes = [8, 32], strides = [1, 1]} : vector<8x128xf32> to vector<8x32xf32>
    %340 = vector.extract_strided_slice %336 {offsets = [0, 96], sizes = [8, 32], strides = [1, 1]} : vector<8x128xf32> to vector<8x32xf32>
    %341 = arith.mulf %338, %317 : vector<8x32xf32>
    %342 = arith.mulf %337, %339 : vector<8x32xf32>
    %343 = arith.addf %341, %342 : vector<8x32xf32>
    %344 = math.tanh %343 : vector<8x32xf32>
    %345 = arith.mulf %340, %344 : vector<8x32xf32>
    %c3_i32_141 = arith.constant 3 : i32
    %c8_i32_142 = arith.constant 8 : i32
    %346 = arith.muli %c3_i32_141, %c8_i32_142 : i32
    %347 = tpu.assume_multiple %346, 8 : i32
    %c1_143 = arith.constant 1 : index
    %c0_144 = arith.constant 0 : index
    %c0_145 = arith.constant 0 : index
    %348 = vector.load %arg4[%c1_143, %c0_144, %c0_145] : memref<2x32x128xf32, #tpu.memory_space<vmem>>, vector<1x32x128xf32>
    %349 = vector.shape_cast %348 : vector<1x32x128xf32> to vector<32x128xf32>
    %350 = arith.index_cast %347 : i32 to index
    %c0_146 = arith.constant 0 : index
    %351 = vector.load %arg9[%350, %c0_146] : memref<64x128xf32, #tpu.memory_space<vmem>>, vector<8x128xf32>
    %cst_147 = arith.constant dense<0.000000e+00> : vector<8x128xf32>
    %352 = tpu.matmul %345, %349, %cst_147 {dimension_numbers = #tpu.dot_dimension_numbers<[1], [0], [0], [1], [0, 0, 1, 1], [], []>} : vector<8x32xf32>, vector<32x128xf32>, vector<8x128xf32> -> vector<8x128xf32>
    %353 = arith.addf %351, %352 : vector<8x128xf32>
    %cst_148 = arith.constant 5.000000e-01 : f32
    %354 = vector.broadcast %cst_148 : f32 to vector<8x128xf32>
    %355 = arith.mulf %354, %353 : vector<8x128xf32>
    %356 = arith.select %5, %353, %355 : vector<8x128xi1>, vector<8x128xf32>
    %357 = math.tanh %356 : vector<8x128xf32>
    %cst_149 = arith.constant 5.000000e-01 : f32
    %358 = vector.broadcast %cst_149 : f32 to vector<8x128xf32>
    %359 = arith.mulf %358, %357 : vector<8x128xf32>
    %cst_150 = arith.constant 5.000000e-01 : f32
    %360 = vector.broadcast %cst_150 : f32 to vector<8x128xf32>
    %361 = arith.addf %359, %360 : vector<8x128xf32>
    %362 = arith.select %5, %357, %361 : vector<8x128xi1>, vector<8x128xf32>
    %363 = vector.extract_strided_slice %362 {offsets = [0, 0], sizes = [8, 32], strides = [1, 1]} : vector<8x128xf32> to vector<8x32xf32>
    %364 = vector.extract_strided_slice %362 {offsets = [0, 32], sizes = [8, 32], strides = [1, 1]} : vector<8x128xf32> to vector<8x32xf32>
    %365 = vector.extract_strided_slice %362 {offsets = [0, 64], sizes = [8, 32], strides = [1, 1]} : vector<8x128xf32> to vector<8x32xf32>
    %366 = vector.extract_strided_slice %362 {offsets = [0, 96], sizes = [8, 32], strides = [1, 1]} : vector<8x128xf32> to vector<8x32xf32>
    %367 = arith.mulf %364, %343 : vector<8x32xf32>
    %368 = arith.mulf %363, %365 : vector<8x32xf32>
    %369 = arith.addf %367, %368 : vector<8x32xf32>
    %370 = math.tanh %369 : vector<8x32xf32>
    %371 = arith.mulf %366, %370 : vector<8x32xf32>
    %c4_i32_151 = arith.constant 4 : i32
    %c8_i32_152 = arith.constant 8 : i32
    %372 = arith.muli %c4_i32_151, %c8_i32_152 : i32
    %373 = tpu.assume_multiple %372, 8 : i32
    %c1_153 = arith.constant 1 : index
    %c0_154 = arith.constant 0 : index
    %c0_155 = arith.constant 0 : index
    %374 = vector.load %arg4[%c1_153, %c0_154, %c0_155] : memref<2x32x128xf32, #tpu.memory_space<vmem>>, vector<1x32x128xf32>
    %375 = vector.shape_cast %374 : vector<1x32x128xf32> to vector<32x128xf32>
    %376 = arith.index_cast %373 : i32 to index
    %c0_156 = arith.constant 0 : index
    %377 = vector.load %arg9[%376, %c0_156] : memref<64x128xf32, #tpu.memory_space<vmem>>, vector<8x128xf32>
    %cst_157 = arith.constant dense<0.000000e+00> : vector<8x128xf32>
    %378 = tpu.matmul %371, %375, %cst_157 {dimension_numbers = #tpu.dot_dimension_numbers<[1], [0], [0], [1], [0, 0, 1, 1], [], []>} : vector<8x32xf32>, vector<32x128xf32>, vector<8x128xf32> -> vector<8x128xf32>
    %379 = arith.addf %377, %378 : vector<8x128xf32>
    %cst_158 = arith.constant 5.000000e-01 : f32
    %380 = vector.broadcast %cst_158 : f32 to vector<8x128xf32>
    %381 = arith.mulf %380, %379 : vector<8x128xf32>
    %382 = arith.select %5, %379, %381 : vector<8x128xi1>, vector<8x128xf32>
    %383 = math.tanh %382 : vector<8x128xf32>
    %cst_159 = arith.constant 5.000000e-01 : f32
    %384 = vector.broadcast %cst_159 : f32 to vector<8x128xf32>
    %385 = arith.mulf %384, %383 : vector<8x128xf32>
    %cst_160 = arith.constant 5.000000e-01 : f32
    %386 = vector.broadcast %cst_160 : f32 to vector<8x128xf32>
    %387 = arith.addf %385, %386 : vector<8x128xf32>
    %388 = arith.select %5, %383, %387 : vector<8x128xi1>, vector<8x128xf32>
    %389 = vector.extract_strided_slice %388 {offsets = [0, 0], sizes = [8, 32], strides = [1, 1]} : vector<8x128xf32> to vector<8x32xf32>
    %390 = vector.extract_strided_slice %388 {offsets = [0, 32], sizes = [8, 32], strides = [1, 1]} : vector<8x128xf32> to vector<8x32xf32>
    %391 = vector.extract_strided_slice %388 {offsets = [0, 64], sizes = [8, 32], strides = [1, 1]} : vector<8x128xf32> to vector<8x32xf32>
    %392 = vector.extract_strided_slice %388 {offsets = [0, 96], sizes = [8, 32], strides = [1, 1]} : vector<8x128xf32> to vector<8x32xf32>
    %393 = arith.mulf %390, %369 : vector<8x32xf32>
    %394 = arith.mulf %389, %391 : vector<8x32xf32>
    %395 = arith.addf %393, %394 : vector<8x32xf32>
    %396 = math.tanh %395 : vector<8x32xf32>
    %397 = arith.mulf %392, %396 : vector<8x32xf32>
    %c5_i32_161 = arith.constant 5 : i32
    %c8_i32_162 = arith.constant 8 : i32
    %398 = arith.muli %c5_i32_161, %c8_i32_162 : i32
    %399 = tpu.assume_multiple %398, 8 : i32
    %c1_163 = arith.constant 1 : index
    %c0_164 = arith.constant 0 : index
    %c0_165 = arith.constant 0 : index
    %400 = vector.load %arg4[%c1_163, %c0_164, %c0_165] : memref<2x32x128xf32, #tpu.memory_space<vmem>>, vector<1x32x128xf32>
    %401 = vector.shape_cast %400 : vector<1x32x128xf32> to vector<32x128xf32>
    %402 = arith.index_cast %399 : i32 to index
    %c0_166 = arith.constant 0 : index
    %403 = vector.load %arg9[%402, %c0_166] : memref<64x128xf32, #tpu.memory_space<vmem>>, vector<8x128xf32>
    %cst_167 = arith.constant dense<0.000000e+00> : vector<8x128xf32>
    %404 = tpu.matmul %397, %401, %cst_167 {dimension_numbers = #tpu.dot_dimension_numbers<[1], [0], [0], [1], [0, 0, 1, 1], [], []>} : vector<8x32xf32>, vector<32x128xf32>, vector<8x128xf32> -> vector<8x128xf32>
    %405 = arith.addf %403, %404 : vector<8x128xf32>
    %cst_168 = arith.constant 5.000000e-01 : f32
    %406 = vector.broadcast %cst_168 : f32 to vector<8x128xf32>
    %407 = arith.mulf %406, %405 : vector<8x128xf32>
    %408 = arith.select %5, %405, %407 : vector<8x128xi1>, vector<8x128xf32>
    %409 = math.tanh %408 : vector<8x128xf32>
    %cst_169 = arith.constant 5.000000e-01 : f32
    %410 = vector.broadcast %cst_169 : f32 to vector<8x128xf32>
    %411 = arith.mulf %410, %409 : vector<8x128xf32>
    %cst_170 = arith.constant 5.000000e-01 : f32
    %412 = vector.broadcast %cst_170 : f32 to vector<8x128xf32>
    %413 = arith.addf %411, %412 : vector<8x128xf32>
    %414 = arith.select %5, %409, %413 : vector<8x128xi1>, vector<8x128xf32>
    %415 = vector.extract_strided_slice %414 {offsets = [0, 0], sizes = [8, 32], strides = [1, 1]} : vector<8x128xf32> to vector<8x32xf32>
    %416 = vector.extract_strided_slice %414 {offsets = [0, 32], sizes = [8, 32], strides = [1, 1]} : vector<8x128xf32> to vector<8x32xf32>
    %417 = vector.extract_strided_slice %414 {offsets = [0, 64], sizes = [8, 32], strides = [1, 1]} : vector<8x128xf32> to vector<8x32xf32>
    %418 = vector.extract_strided_slice %414 {offsets = [0, 96], sizes = [8, 32], strides = [1, 1]} : vector<8x128xf32> to vector<8x32xf32>
    %419 = arith.mulf %416, %395 : vector<8x32xf32>
    %420 = arith.mulf %415, %417 : vector<8x32xf32>
    %421 = arith.addf %419, %420 : vector<8x32xf32>
    %422 = math.tanh %421 : vector<8x32xf32>
    %423 = arith.mulf %418, %422 : vector<8x32xf32>
    %c6_i32_171 = arith.constant 6 : i32
    %c8_i32_172 = arith.constant 8 : i32
    %424 = arith.muli %c6_i32_171, %c8_i32_172 : i32
    %425 = tpu.assume_multiple %424, 8 : i32
    %c1_173 = arith.constant 1 : index
    %c0_174 = arith.constant 0 : index
    %c0_175 = arith.constant 0 : index
    %426 = vector.load %arg4[%c1_173, %c0_174, %c0_175] : memref<2x32x128xf32, #tpu.memory_space<vmem>>, vector<1x32x128xf32>
    %427 = vector.shape_cast %426 : vector<1x32x128xf32> to vector<32x128xf32>
    %428 = arith.index_cast %425 : i32 to index
    %c0_176 = arith.constant 0 : index
    %429 = vector.load %arg9[%428, %c0_176] : memref<64x128xf32, #tpu.memory_space<vmem>>, vector<8x128xf32>
    %cst_177 = arith.constant dense<0.000000e+00> : vector<8x128xf32>
    %430 = tpu.matmul %423, %427, %cst_177 {dimension_numbers = #tpu.dot_dimension_numbers<[1], [0], [0], [1], [0, 0, 1, 1], [], []>} : vector<8x32xf32>, vector<32x128xf32>, vector<8x128xf32> -> vector<8x128xf32>
    %431 = arith.addf %429, %430 : vector<8x128xf32>
    %cst_178 = arith.constant 5.000000e-01 : f32
    %432 = vector.broadcast %cst_178 : f32 to vector<8x128xf32>
    %433 = arith.mulf %432, %431 : vector<8x128xf32>
    %434 = arith.select %5, %431, %433 : vector<8x128xi1>, vector<8x128xf32>
    %435 = math.tanh %434 : vector<8x128xf32>
    %cst_179 = arith.constant 5.000000e-01 : f32
    %436 = vector.broadcast %cst_179 : f32 to vector<8x128xf32>
    %437 = arith.mulf %436, %435 : vector<8x128xf32>
    %cst_180 = arith.constant 5.000000e-01 : f32
    %438 = vector.broadcast %cst_180 : f32 to vector<8x128xf32>
    %439 = arith.addf %437, %438 : vector<8x128xf32>
    %440 = arith.select %5, %435, %439 : vector<8x128xi1>, vector<8x128xf32>
    %441 = vector.extract_strided_slice %440 {offsets = [0, 0], sizes = [8, 32], strides = [1, 1]} : vector<8x128xf32> to vector<8x32xf32>
    %442 = vector.extract_strided_slice %440 {offsets = [0, 32], sizes = [8, 32], strides = [1, 1]} : vector<8x128xf32> to vector<8x32xf32>
    %443 = vector.extract_strided_slice %440 {offsets = [0, 64], sizes = [8, 32], strides = [1, 1]} : vector<8x128xf32> to vector<8x32xf32>
    %444 = vector.extract_strided_slice %440 {offsets = [0, 96], sizes = [8, 32], strides = [1, 1]} : vector<8x128xf32> to vector<8x32xf32>
    %445 = arith.mulf %442, %421 : vector<8x32xf32>
    %446 = arith.mulf %441, %443 : vector<8x32xf32>
    %447 = arith.addf %445, %446 : vector<8x32xf32>
    %448 = math.tanh %447 : vector<8x32xf32>
    %449 = arith.mulf %444, %448 : vector<8x32xf32>
    %c7_i32_181 = arith.constant 7 : i32
    %c8_i32_182 = arith.constant 8 : i32
    %450 = arith.muli %c7_i32_181, %c8_i32_182 : i32
    %451 = tpu.assume_multiple %450, 8 : i32
    %c1_183 = arith.constant 1 : index
    %c0_184 = arith.constant 0 : index
    %c0_185 = arith.constant 0 : index
    %452 = vector.load %arg4[%c1_183, %c0_184, %c0_185] : memref<2x32x128xf32, #tpu.memory_space<vmem>>, vector<1x32x128xf32>
    %453 = vector.shape_cast %452 : vector<1x32x128xf32> to vector<32x128xf32>
    %454 = arith.index_cast %451 : i32 to index
    %c0_186 = arith.constant 0 : index
    %455 = vector.load %arg9[%454, %c0_186] : memref<64x128xf32, #tpu.memory_space<vmem>>, vector<8x128xf32>
    %cst_187 = arith.constant dense<0.000000e+00> : vector<8x128xf32>
    %456 = tpu.matmul %449, %453, %cst_187 {dimension_numbers = #tpu.dot_dimension_numbers<[1], [0], [0], [1], [0, 0, 1, 1], [], []>} : vector<8x32xf32>, vector<32x128xf32>, vector<8x128xf32> -> vector<8x128xf32>
    %457 = arith.addf %455, %456 : vector<8x128xf32>
    %cst_188 = arith.constant 5.000000e-01 : f32
    %458 = vector.broadcast %cst_188 : f32 to vector<8x128xf32>
    %459 = arith.mulf %458, %457 : vector<8x128xf32>
    %460 = arith.select %5, %457, %459 : vector<8x128xi1>, vector<8x128xf32>
    %461 = math.tanh %460 : vector<8x128xf32>
    %cst_189 = arith.constant 5.000000e-01 : f32
    %462 = vector.broadcast %cst_189 : f32 to vector<8x128xf32>
    %463 = arith.mulf %462, %461 : vector<8x128xf32>
    %cst_190 = arith.constant 5.000000e-01 : f32
    %464 = vector.broadcast %cst_190 : f32 to vector<8x128xf32>
    %465 = arith.addf %463, %464 : vector<8x128xf32>
    %466 = arith.select %5, %461, %465 : vector<8x128xi1>, vector<8x128xf32>
    %467 = vector.extract_strided_slice %466 {offsets = [0, 0], sizes = [8, 32], strides = [1, 1]} : vector<8x128xf32> to vector<8x32xf32>
    %468 = vector.extract_strided_slice %466 {offsets = [0, 32], sizes = [8, 32], strides = [1, 1]} : vector<8x128xf32> to vector<8x32xf32>
    %469 = vector.extract_strided_slice %466 {offsets = [0, 64], sizes = [8, 32], strides = [1, 1]} : vector<8x128xf32> to vector<8x32xf32>
    %470 = vector.extract_strided_slice %466 {offsets = [0, 96], sizes = [8, 32], strides = [1, 1]} : vector<8x128xf32> to vector<8x32xf32>
    %471 = arith.mulf %468, %447 : vector<8x32xf32>
    %472 = arith.mulf %467, %469 : vector<8x32xf32>
    %473 = arith.addf %471, %472 : vector<8x32xf32>
    %474 = math.tanh %473 : vector<8x32xf32>
    %475 = arith.mulf %470, %474 : vector<8x32xf32>
    %c8_i32_191 = arith.constant 8 : i32
    %c0_192 = arith.constant 0 : index
    %c0_193 = arith.constant 0 : index
    %476 = vector.load %arg6[%c0_192, %c0_193] : memref<32x128xf32, #tpu.memory_space<vmem>>, vector<32x128xf32>
    %cst_194 = arith.constant dense<0.000000e+00> : vector<8x128xf32>
    %477 = tpu.matmul %475, %476, %cst_194 {dimension_numbers = #tpu.dot_dimension_numbers<[1], [0], [0], [1], [0, 0, 1, 1], [], []>} : vector<8x32xf32>, vector<32x128xf32>, vector<8x128xf32> -> vector<8x128xf32>
    %c0_195 = arith.constant 0 : index
    %c0_196 = arith.constant 0 : index
    %478 = vector.load %arg7[%c0_195, %c0_196] : memref<1x128xf32, #tpu.memory_space<vmem>>, vector<1x128xf32>
    %479 = vector.broadcast %478 : vector<1x128xf32> to vector<8x128xf32>
    %480 = arith.addf %477, %479 : vector<8x128xf32>
    %c0_197 = arith.constant 0 : index
    %c0_198 = arith.constant 0 : index
    %481 = vector.load %arg8[%c0_197, %c0_198] : memref<8x128xf32, #tpu.memory_space<vmem>>, vector<8x128xf32>
    tpu.vector_store %arg8[%c0_197, %c0_198], %480 {strides = array<i32>} : memref<8x128xf32, #tpu.memory_space<vmem>>, vector<8x128xf32>,
    return
  }
  func.func @transform_0(%arg0: i32) -> (i32, i32, i32) {
    %c0_i32 = arith.constant 0 : i32
    %c0_i32_0 = arith.constant 0 : i32
    %c0_i32_1 = arith.constant 0 : i32
    return %arg0, %c0_i32, %c0_i32_0 : i32, i32, i32
  }
  func.func @transform_1(%arg0: i32) -> (i32, i32) {
    %c0_i32 = arith.constant 0 : i32
    %c0_i32_0 = arith.constant 0 : i32
    %c0_i32_1 = arith.constant 0 : i32
    return %c0_i32, %c0_i32_0 : i32, i32
  }
  func.func @transform_2(%arg0: i32) -> (i32, i32, i32) {
    %c0_i32 = arith.constant 0 : i32
    %c0_i32_0 = arith.constant 0 : i32
    %c0_i32_1 = arith.constant 0 : i32
    %c0_i32_2 = arith.constant 0 : i32
    return %c0_i32, %c0_i32_0, %c0_i32_1 : i32, i32, i32
  }
  func.func @transform_3(%arg0: i32) -> (i32, i32, i32) {
    %c0_i32 = arith.constant 0 : i32
    %c0_i32_0 = arith.constant 0 : i32
    %c0_i32_1 = arith.constant 0 : i32
    %c0_i32_2 = arith.constant 0 : i32
    return %c0_i32, %c0_i32_0, %c0_i32_1 : i32, i32, i32
  }
  func.func @transform_4(%arg0: i32) -> (i32, i32, i32) {
    %c0_i32 = arith.constant 0 : i32
    %c0_i32_0 = arith.constant 0 : i32
    %c0_i32_1 = arith.constant 0 : i32
    %c0_i32_2 = arith.constant 0 : i32
    return %c0_i32, %c0_i32_0, %c0_i32_1 : i32, i32, i32
  }
  func.func @transform_5(%arg0: i32) -> (i32, i32) {
    %c0_i32 = arith.constant 0 : i32
    %c0_i32_0 = arith.constant 0 : i32
    %c0_i32_1 = arith.constant 0 : i32
    return %c0_i32, %c0_i32_0 : i32, i32
  }
  func.func @transform_6(%arg0: i32) -> (i32, i32) {
    %c0_i32 = arith.constant 0 : i32
    %c0_i32_0 = arith.constant 0 : i32
    %c0_i32_1 = arith.constant 0 : i32
    return %c0_i32, %c0_i32_0 : i32, i32
  }
  func.func @transform_7(%arg0: i32) -> (i32, i32) {
    %c0_i32 = arith.constant 0 : i32
    %c0_i32_0 = arith.constant 0 : i32
    return %arg0, %c0_i32 : i32, i32
  }
}

</mosaic_0001>

<bundles_post_ra>
// kernel: tpu_custom_call.1
= control target key start
LH: loop header
LB: loop body
LE: loop exit
PB: predicated region body
PF: predicated region fallthrough
CT: control target
= control target key end

     0   :  { %12 = vsyncpa [#allocation5], 0  ;;  %s3164_s0 = inlined_call_operand.vmem [shape: f32[1,64,8], index: 0, kind: input, shape index: {}]   ;;  %s3165_s1 = inlined_call_operand.vmem [shape: f32[8,128], index: 1, kind: input, shape index: {}]   ;;  %s3166_s2 = inlined_call_operand.hbm [shape: f32[1,32,128], index: 2, kind: input, shape index: {}]   ;;  %s3167_s3 = inlined_call_operand.vmem [shape: f32[2,32,128], index: 3, kind: input, shape index: {}]   ;;  %s3168_s4 = inlined_call_operand.vmem [shape: f32[2,1,128], index: 4, kind: input, shape index: {}]   ;;  %s3169_s5 = inlined_call_operand.hbm [shape: f32[32,128], index: 5, kind: input, shape index: {}]   ;;  %s3170_s6 = inlined_call_operand.vmem [shape: f32[1,128], index: 6, kind: input, shape index: {}]   ;;  %s3171_s7 = inlined_call_operand.hbm [shape: f32[8,128], index: 7, kind: output, shape index: {}]  }
   0x1   :  { %13 = vsyncpa [#allocation8], 0 }
   0x2   :  { %14 = vsyncpa [#allocation6], 0  ;;  %s2643_s24 = smov [#allocation4]  }
   0x3   :  { %s24_s25 = sshll.u32 %s2643_s24, 4  ;;  %s25_s25 = int_to_ptr.vmem [resolvable:$true] %s24_s25 }
   0x4   :  { %s2585_s26 = scalar_lea.vmem %s25_s25, 512  ;;  %p2590_p1 = scmp.lt.s32.totalorder %s25_s25, %s25_s25 }
   0x5   :  { %p2586_p0 = scmp.ne.s32.totalorder %s25_s25, %s2585_s26  ;;  %p2591_p2 = scmp.lt.s32.totalorder %s2585_s26, %s2585_s26 }
   0x7   :  { %p2592_p3 = por %p2591_p2, %p2590_p1 }
   0x9   :  { %p2593_p4 = pnand %p2592_p3, %p2586_p0 }
   0xb   :  { %2596 = shalt.err (!%p2593_p4)
}
   0xc   :  { %s2644_s27 = smov 128   ;;  %s2645_s28 = smov 8  }
   0xd   :  { %30 = dma.hbm_to_vmem [thread:$0]  %s3166_s2, 512, %s25_s25, [#allocation5], %s2644_s27, %s2644_s27, %s2645_s28  }
   0xe   :  { %s2646_s8 = smov [#allocation7]  }
   0xf   :  { %s40_s9 = sshll.u32 %s2646_s8, 4  ;;  %s41_s9 = int_to_ptr.vmem [resolvable:$true] %s40_s9 }
  0x10   :  { %s2605_s10 = scalar_lea.vmem %s41_s9, 512  ;;  %p2610_p6 = scmp.lt.s32.totalorder %s41_s9, %s41_s9 }
  0x11   :  { %p2606_p5 = scmp.ne.s32.totalorder %s41_s9, %s2605_s10  ;;  %p2611_p7 = scmp.lt.s32.totalorder %s2605_s10, %s2605_s10 }
  0x13   :  { %p2612_p8 = por %p2611_p7, %p2610_p6 }
  0x15   :  { %p2613_p9 = pnand %p2612_p8, %p2606_p5 }
  0x17   :  { %2616 = shalt.err (!%p2613_p9)
}
  0x18   :  { %46 = dma.hbm_to_vmem [thread:$0]  %s3169_s5, 512, %s41_s9, [#allocation8], %s2644_s27, %s2644_s27, %s2645_s28  }
  0x19   :  { %2637 = dma.done.wait [#allocation5], 512  }
  0x1a   :  { %2638 = vsyncadd [#allocation5], 4294966784 }
  0x1b   :  { %2639 = dma.done.wait [#allocation8], 512  }
  0x1c   :  { %2640 = vsyncadd [#allocation8], 4294966784  ;;  %v2647_v0 = vmov 0.0   ;;  %vm2648_vm0 = vmmov 0   ;;  %vm76_vm1 = vcmask 64512   ;;  %v60_v1 = vld [vmem:[%s3165_s1] sm:$0xff]  ;;  %v55_v8 = vlaneseq }
  0x1d   :  { %2297 = vmatprep.subr.mxu1 %v2647_v0  ;;  %2305 = vmatprep.mubr.msk.f32.mxu1 %vm2648_vm0, %v2647_v0  ;;  %v2707_v2 = vld [vmem:[%s3167_s3 + $0x18] sm:$0xff]  ;;  %v61_v3 = vld [vmem:[%s3164_s0] sm:$0xff]  ;;  %v62_v4 = vld [vmem:[%s3164_s0 + $0x8] sm:$0xff]  ;;  %s2649_s26 = smov 64   ;;  %s2650_s27 = smov 32   ;;  %vm219_vm5 = vcmask 261120  }
  0x1e   :  { %2283 = vmatprep.subr.mxu0 %v60_v1  ;;  %2298 = vmatpush3.msra.mxu1 %v2707_v2  ;;  %v2719_v5 = vld [vmem:[%s3167_s3 + $0x10] sm:$0xff]  ;;  %v2727_v6 = vld [vmem:[%s3167_s3 + $0x8] sm:$0xff]  ;;  %v2735_v7 = vld [vmem:[%s3167_s3] sm:$0xff]  ;;  %v56_v11 = vand.u32 127, %v55_v8  ;;  %s2651_s23 = smov [#allocation9]  }
  0x1f   :  { %2284 = vmatpush3.msra.mxu0 %v60_v1  ;;  %2285 = vmatprep.mubr.msk.f32.mxu0 %vm76_vm1, %v61_v3  ;;  %v2763_v10 = vld [vmem:[%s3168_s4] ss:$0 sm:$0xff]  ;;  %v63_v48 = vld [vmem:[%s3164_s0 + $0x10] sm:$0xff]  ;;  %v64_v49 = vld [vmem:[%s3164_s0 + $0x18] sm:$0xff]  ;;  %s2128_s24 = sshll.u32 %s2651_s23, 4  ;;  %s2129_s24 = int_to_ptr.vmem [resolvable:$true] %s2128_s24 }
  0x20   :  { %2299 = vmatprep.subr.mxu1 %v2647_v0  ;;  %2286 = vmatmul.mubr.msk.f32.vlgmr.msra.gmra.mxu0 %vm76_vm1, %v62_v4  ;;  %vm57_vm2 = vcmp.ge.s32.totalorder %v56_v11, 64  ;;  %vm58_vm3 = vcmp.lt.s32.totalorder %v56_v11, 96  ;;  %v65_v50 = vld [vmem:[%s3164_s0 + $0x20] sm:$0xff]  ;;  %v66_v51 = vld [vmem:[%s3164_s0 + $0x28] sm:$0xff]  ;;  %v67_v52 = vld [vmem:[%s3164_s0 + $0x30] sm:$0xff]  ;;  %s2617_s25 = scalar_lea.vmem %s2129_s24, 128  ;;  %p2622_p11 = scmp.lt.s32.totalorder %s2129_s24, %s2129_s24 }
  0x21   :  { %2300 = vmatpush3.msra.mxu1 %v2719_v5  ;;  %2319 = vmatprep.subr.mxu0 %v2647_v0  ;;  %vm2766_vm4 = vmand %vm57_vm2, %vm58_vm3  ;;  %v68_v53 = vld [vmem:[%s3164_s0 + $0x38] sm:$0xff]  ;;  %v2035_v16 = vld [vmem:[#allocation7] sm:$0xff]  ;;  %p2618_p10 = scmp.ne.s32.totalorder %s2129_s24, %s2617_s25  ;;  %p2623_p12 = scmp.lt.s32.totalorder %s2617_s25, %s2617_s25 }
  0x22   :  { %2301 = vmatprep.subr.mxu1 %v2647_v0  ;;  %2320 = vmatpush3.msra.mxu0 %v2707_v2 }
  0x23   :  { %2302 = vmatpush3.msra.mxu1 %v2727_v6  ;;  %2321 = vmatprep.subr.mxu0 %v2647_v0  ;;  %p2624_p13 = por %p2623_p12, %p2622_p11 }
  0x24   :  { %2303 = vmatprep.subr.mxu1 %v2647_v0  ;;  %2322 = vmatpush3.msra.mxu0 %v2719_v5 }
  0x25   :  { %2304 = vmatpush3.msra.mxu1 %v2735_v7  ;;  %2323 = vmatprep.subr.mxu0 %v2647_v0  ;;  %p2625_p0 = pnand %p2624_p13, %p2618_p10 }
  0x26   :  { %2306 = vmatmul.mubr.f32.vlgmr.msra.gmra.mxu1 %v2647_v0  ;;  %2308 = vmatprep.subr.mxu1 %v2647_v0 }
  0x27   :  { %2309 = vmatpush3.msra.mxu1 %v2707_v2  ;;  %2316 = vmatprep.mubr.msk.f32.mxu1 %vm2648_vm0, %v2647_v0 }
  0x28   :  { %2310 = vmatprep.subr.mxu1 %v2647_v0  ;;  %2324 = vmatpush3.msra.mxu0 %v2727_v6 }
  0x29   :  { %2311 = vmatpush3.msra.mxu1 %v2719_v5  ;;  %2325 = vmatprep.subr.mxu0 %v2647_v0 }
  0x2a   :  { %2312 = vmatprep.subr.mxu1 %v2647_v0  ;;  %2326 = vmatpush3.msra.mxu0 %v2735_v7 }
  0x2b   :  { %2313 = vmatpush3.msra.mxu1 %v2727_v6  ;;  %2341 = vmatprep.subr.mxu0 %v2647_v0 }
  0x2c   :  { %2314 = vmatprep.subr.mxu1 %v2647_v0  ;;  %2288 = vmatprep.mubr.msk.f32.mxu0 %vm76_vm1, %v63_v48 }
  0x2d   :  { %2315 = vmatpush3.msra.mxu1 %v2735_v7  ;;  %2289 = vmatmul.mubr.msk.f32.gmra.mxu0 %vm76_vm1, %v64_v49 }
  0x2e   :  { %2330 = vmatprep.subr.mxu1 %v2647_v0  ;;  %2291 = vmatprep.mubr.msk.f32.mxu0 %vm76_vm1, %v65_v50 }
  0x31   :  { %2292 = vmatmul.mubr.msk.f32.gmra.mxu0 %vm76_vm1, %v66_v51 }
  0x32   :  { %2294 = vmatprep.mubr.msk.f32.mxu0 %vm76_vm1, %v67_v52 }
  0x35   :  { %2295 = vmatmul.mubr.msk.f32.gmra.mxu0 %vm76_vm1, %v68_v53 }
  0x36   :  { %2327 = vmatprep.mubr.msk.f32.mxu0 %vm2648_vm0, %v2647_v0 }
  0xe0   :  { %v2287_v9 = vpop.f32.mrf.mxu0 }
  0xe1   :  { %v173_v33 = vadd.f32 %v2287_v9, %v2763_v10 }
  0xe2   :  { %v167_v12 = vpop.f32.mrf.mxu0 }
  0xe3   :  { %v168_v13 = vadd.f32 %v2763_v10, %v167_v12 }
  0xe6   :  { %v289_v14 = vpop.f32.mrf.mxu1 }
  0xe7   :  { %v293_v15 = vadd.f32 %v289_v14, %v168_v13 }
  0xe8   :  { %v2307_v17 = vpop.f32.mrf.mxu1 }
  0xe9   :  { %v294_v18 = vmul.f32 0.5, %v293_v15 }
  0xeb   :  { %v295_v19 = vsel %vm2766_vm4, %v293_v15, %v294_v18 }
  0xec   :  { %2513 = vtanh.f32 %v295_v19 }
  0xed   :  { %v2290_v58 = vpop.f32.mrf.mxu0 }
  0xef   :  { %v177_v59 = vpop.f32.mrf.mxu0 }
  0xf0   :  { %v178_v1 = vadd.f32 %v2763_v10, %v177_v59 }
  0xf1   :  { %v2837_v60 = vpop.f32.mrf.mxu0 }
  0xf3   :  { %v2839_v61 = vpop.f32.mrf.mxu0 }
  0xf5   :  { %v2841_v62 = vpop.f32.mrf.mxu0 }
  0xf7   :  { %v2843_v63 = vpop.f32.mrf.mxu0 }
  0xf9   :  { %v2514_v20 = vpop.eup %2513 }
  0xfa   :  { %v297_v21 = vmul.f32 0.5, %v2514_v20 }
  0xfc   :  { %v298_v22 = vadd.f32 0.5, %v297_v21 }
  0xfe   :  { %v299_v23 = vsel %vm2766_vm4, %v2514_v20, %v298_v22 }
  0xff   :  { %302 = vrot.lane.b32.xlu0 %v299_v23, %s2649_s26  ;;  %v300_v26 = vmul.f32 0.0, %v299_v23 }
 0x171   :  { %v303_v24 = vpop.permute.xlu0 %302 }
 0x172   :  { %v305_v25 = vmul.f32 %v303_v24, %v299_v23 }
 0x174   :  { %307 = vrot.lane.b32.xlu0 %v305_v25, %s2650_s27 }
 0x1e6   :  { %v308_v27 = vpop.permute.xlu0 %307 }
 0x1e7   :  { %v310_v28 = vadd.f32 %v308_v27, %v300_v26  ;;  %v183_v26 = vadd.f32 %v2290_v58, %v2763_v10 }
 0x1e9   :  { %2515 = vtanh.f32 %v310_v28 }
 0x1f6   :  { %v2516_v29 = vpop.eup %2515 }
 0x1f7   :  { %313 = vrot.lane.b32.xlu1 %v2516_v29, %s2649_s26 }
 0x269   :  { %v314_v30 = vpop.permute.xlu1 %313 }
 0x26a   :  { %v316_v31 = vmul.f32 %v314_v30, %v299_v23 }
 0x26c   :  { %318 = vrot.lane.b32.xlu1 %v316_v31, %s2650_s27 }
 0x2de   :  { %v319_v32 = vpop.permute.xlu1 %318 }
 0x2df   :  { %321 = vst.msk [vmem:[#allocation3] sm:$0xff] %vm219_vm5, %v319_v32  ;;  %2317 = vmatmul.mubr.msk.f32.vlgmr.msra.gmra.mxu1 %vm219_vm5, %v319_v32 }
 0x2e0   :  { %2331 = vmatpush3.msra.mxu1 %v2707_v2  ;;  %2338 = vmatprep.mubr.msk.f32.mxu1 %vm2648_vm0, %v2647_v0 }
 0x2e1   :  { %2332 = vmatprep.subr.mxu1 %v2647_v0 }
 0x2e2   :  { %2333 = vmatpush3.msra.mxu1 %v2719_v5 }
 0x2e3   :  { %2334 = vmatprep.subr.mxu1 %v2647_v0 }
 0x2e4   :  { %2335 = vmatpush3.msra.mxu1 %v2727_v6 }
 0x2e5   :  { %2336 = vmatprep.subr.mxu1 %v2647_v0 }
 0x2e6   :  { %2337 = vmatpush3.msra.mxu1 %v2735_v7 }
 0x2e7   :  { %2352 = vmatprep.subr.mxu1 %v2647_v0 }
 0x39f   :  { %v396_v34 = vpop.f32.mrf.mxu1 }
 0x3a0   :  { %v400_v35 = vadd.f32 %v396_v34, %v173_v33 }
 0x3a1   :  { %v2318_v36 = vpop.f32.mrf.mxu1 }
 0x3a2   :  { %v401_v37 = vmul.f32 0.5, %v400_v35 }
 0x3a4   :  { %v402_v38 = vsel %vm2766_vm4, %v400_v35, %v401_v37 }
 0x3a5   :  { %2517 = vtanh.f32 %v402_v38 }
 0x3b2   :  { %v2518_v39 = vpop.eup %2517 }
 0x3b3   :  { %v404_v40 = vmul.f32 0.5, %v2518_v39 }
 0x3b5   :  { %v405_v41 = vadd.f32 0.5, %v404_v40 }
 0x3b7   :  { %v406_v42 = vsel %vm2766_vm4, %v2518_v39, %v405_v41 }
 0x3b8   :  { %409 = vrot.lane.b32.xlu0 %v406_v42, %s2649_s26  ;;  %v407_v45 = vmul.f32 %v406_v42, %v310_v28 }
 0x42a   :  { %v410_v43 = vpop.permute.xlu0 %409 }
 0x42b   :  { %v412_v44 = vmul.f32 %v410_v43, %v406_v42 }
 0x42d   :  { %414 = vrot.lane.b32.xlu1 %v412_v44, %s2650_s27 }
 0x49f   :  { %v415_v46 = vpop.permute.xlu1 %414 }
 0x4a0   :  { %v417_v47 = vadd.f32 %v415_v46, %v407_v45  ;;  %v188_v45 = vadd.f32 %v2763_v10, %v2839_v61 }
 0x4a2   :  { %2519 = vtanh.f32 %v417_v47 }
 0x4af   :  { %v2520_v54 = vpop.eup %2519 }
 0x4b0   :  { %420 = vrot.lane.b32.xlu0 %v2520_v54, %s2649_s26 }
 0x522   :  { %v421_v55 = vpop.permute.xlu0 %420 }
 0x523   :  { %v423_v56 = vmul.f32 %v421_v55, %v406_v42 }
 0x525   :  { %425 = vrot.lane.b32.xlu1 %v423_v56, %s2650_s27 }
 0x597   :  { %v426_v57 = vpop.permute.xlu1 %425 }
 0x598   :  { %429 = vst.msk [vmem:[#allocation3 + $0x8] sm:$0xff] %vm219_vm5, %v426_v57  ;;  %2328 = vmatmul.mubr.msk.f32.vlgmr.msra.gmra.mxu0 %vm219_vm5, %v426_v57 }
 0x599   :  { %2342 = vmatpush3.msra.mxu0 %v2707_v2  ;;  %2349 = vmatprep.mubr.msk.f32.mxu0 %vm2648_vm0, %v2647_v0 }
 0x59a   :  { %2343 = vmatprep.subr.mxu0 %v2647_v0 }
 0x59b   :  { %2344 = vmatpush3.msra.mxu0 %v2719_v5 }
 0x59c   :  { %2345 = vmatprep.subr.mxu0 %v2647_v0 }
 0x59d   :  { %2346 = vmatpush3.msra.mxu0 %v2727_v6 }
 0x59e   :  { %2347 = vmatprep.subr.mxu0 %v2647_v0 }
 0x59f   :  { %2348 = vmatpush3.msra.mxu0 %v2735_v7 }
 0x5a0   :  { %2363 = vmatprep.subr.mxu0 %v2647_v0 }
 0x658   :  { %v504_v3 = vpop.f32.mrf.mxu0 }
 0x659   :  { %v508_v4 = vadd.f32 %v504_v3, %v178_v1 }
 0x65a   :  { %v2329_v8 = vpop.f32.mrf.mxu0 }
 0x65b   :  { %v509_v9 = vmul.f32 0.5, %v508_v4 }
 0x65d   :  { %v510_v11 = vsel %vm2766_vm4, %v508_v4, %v509_v9 }
 0x65e   :  { %2521 = vtanh.f32 %v510_v11 }
 0x66b   :  { %v2522_v12 = vpop.eup %2521 }
 0x66c   :  { %v512_v13 = vmul.f32 0.5, %v2522_v12 }
 0x66e   :  { %v513_v14 = vadd.f32 0.5, %v512_v13 }
 0x670   :  { %v514_v15 = vsel %vm2766_vm4, %v2522_v12, %v513_v14 }
 0x671   :  { %517 = vrot.lane.b32.xlu0 %v514_v15, %s2649_s26  ;;  %v515_v19 = vmul.f32 %v514_v15, %v417_v47 }
 0x6e3   :  { %v518_v17 = vpop.permute.xlu0 %517 }
 0x6e4   :  { %v520_v18 = vmul.f32 %v518_v17, %v514_v15 }
 0x6e6   :  { %522 = vrot.lane.b32.xlu1 %v520_v18, %s2650_s27 }
 0x758   :  { %v523_v20 = vpop.permute.xlu1 %522 }
 0x759   :  { %v525_v21 = vadd.f32 %v523_v20, %v515_v19  ;;  %v1081_v20 = vld [vmem:[#allocation4 + $0x18] sm:$0xff] }
 0x75b   :  { %2523 = vtanh.f32 %v525_v21 }
 0x768   :  { %v2524_v22 = vpop.eup %2523 }
 0x769   :  { %528 = vrot.lane.b32.xlu0 %v2524_v22, %s2649_s26 }
 0x7db   :  { %v529_v23 = vpop.permute.xlu0 %528 }
 0x7dc   :  { %v531_v24 = vmul.f32 %v529_v23, %v514_v15 }
 0x7de   :  { %533 = vrot.lane.b32.xlu1 %v531_v24, %s2650_s27 }
 0x850   :  { %v534_v25 = vpop.permute.xlu1 %533 }
 0x851   :  { %537 = vst.msk [vmem:[#allocation3 + $0x10] sm:$0xff] %vm219_vm5, %v534_v25  ;;  %2339 = vmatmul.mubr.msk.f32.vlgmr.msra.gmra.mxu1 %vm219_vm5, %v534_v25  ;;  %v1080_v25 = vld [vmem:[#allocation4 + $0x10] sm:$0xff] }
 0x852   :  { %2353 = vmatpush3.msra.mxu1 %v2707_v2  ;;  %2360 = vmatprep.mubr.msk.f32.mxu1 %vm2648_vm0, %v2647_v0 }
 0x853   :  { %2354 = vmatprep.subr.mxu1 %v2647_v0 }
 0x854   :  { %2355 = vmatpush3.msra.mxu1 %v2719_v5 }
 0x855   :  { %2356 = vmatprep.subr.mxu1 %v2647_v0 }
 0x856   :  { %2357 = vmatpush3.msra.mxu1 %v2727_v6 }
 0x857   :  { %2358 = vmatprep.subr.mxu1 %v2647_v0 }
 0x858   :  { %2359 = vmatpush3.msra.mxu1 %v2735_v7 }
 0x859   :  { %2374 = vmatprep.subr.mxu1 %v2647_v0 }
 0x911   :  { %v612_v27 = vpop.f32.mrf.mxu1 }
 0x912   :  { %v616_v28 = vadd.f32 %v612_v27, %v183_v26  ;;  %v1082_v26 = vld [vmem:[#allocation3] sm:$0xff]  ;;  %v1079_v27 = vld [vmem:[#allocation4 + $0x8] sm:$0xff] }
 0x913   :  { %v2340_v29 = vpop.f32.mrf.mxu1 }
 0x914   :  { %v617_v30 = vmul.f32 0.5, %v616_v28  ;;  %v1083_v29 = vld [vmem:[#allocation3 + $0x8] sm:$0xff] }
 0x916   :  { %v618_v31 = vsel %vm2766_vm4, %v616_v28, %v617_v30  ;;  %v1078_v28 = vld [vmem:[#allocation4] sm:$0xff]  ;;  %v1084_v30 = vld [vmem:[#allocation3 + $0x10] sm:$0xff] }
 0x917   :  { %2525 = vtanh.f32 %v618_v31 }
 0x924   :  { %v2526_v32 = vpop.eup %2525 }
 0x925   :  { %v620_v33 = vmul.f32 0.5, %v2526_v32 }
 0x927   :  { %v621_v34 = vadd.f32 0.5, %v620_v33 }
 0x929   :  { %v622_v35 = vsel %vm2766_vm4, %v2526_v32, %v621_v34  ;;  %v198_v34 = vadd.f32 %v2763_v10, %v2843_v63 }
 0x92a   :  { %625 = vrot.lane.b32.xlu0 %v622_v35, %s2649_s26  ;;  %v623_v38 = vmul.f32 %v622_v35, %v525_v21 }
 0x99c   :  { %v626_v36 = vpop.permute.xlu0 %625 }
 0x99d   :  { %v628_v37 = vmul.f32 %v626_v36, %v622_v35 }
 0x99f   :  { %630 = vrot.lane.b32.xlu1 %v628_v37, %s2650_s27 }
 0xa11   :  { %v631_v39 = vpop.permute.xlu1 %630 }
 0xa12   :  { %v633_v40 = vadd.f32 %v631_v39, %v623_v38 }
 0xa14   :  { %2527 = vtanh.f32 %v633_v40 }
 0xa21   :  { %v2528_v41 = vpop.eup %2527 }
 0xa22   :  { %636 = vrot.lane.b32.xlu0 %v2528_v41, %s2649_s26 }
 0xa94   :  { %v637_v42 = vpop.permute.xlu0 %636 }
 0xa95   :  { %v639_v43 = vmul.f32 %v637_v42, %v622_v35 }
 0xa97   :  { %641 = vrot.lane.b32.xlu1 %v639_v43, %s2650_s27 }
 0xb09   :  { %v642_v44 = vpop.permute.xlu1 %641 }
 0xb0a   :  { %645 = vst.msk [vmem:[#allocation3 + $0x18] sm:$0xff] %vm219_vm5, %v642_v44  ;;  %2350 = vmatmul.mubr.msk.f32.vlgmr.msra.gmra.mxu0 %vm219_vm5, %v642_v44 }
 0xb0b   :  { %2364 = vmatpush3.msra.mxu0 %v2707_v2  ;;  %2371 = vmatprep.mubr.msk.f32.mxu0 %vm2648_vm0, %v2647_v0 }
 0xb0c   :  { %2365 = vmatprep.subr.mxu0 %v2647_v0 }
 0xb0d   :  { %2366 = vmatpush3.msra.mxu0 %v2719_v5 }
 0xb0e   :  { %2367 = vmatprep.subr.mxu0 %v2647_v0 }
 0xb0f   :  { %2368 = vmatpush3.msra.mxu0 %v2727_v6 }
 0xb10   :  { %2369 = vmatprep.subr.mxu0 %v2647_v0 }
 0xb11   :  { %2370 = vmatpush3.msra.mxu0 %v2735_v7  ;;  %v1085_v31 = vld [vmem:[#allocation3 + $0x18] sm:$0xff] }
 0xb12   :  { %2385 = vmatprep.subr.mxu0 %v1081_v20 }
 0xbca   :  { %v720_v46 = vpop.f32.mrf.mxu0 }
 0xbcb   :  { %v724_v47 = vadd.f32 %v720_v46, %v188_v45 }
 0xbcc   :  { %v2351_v48 = vpop.f32.mrf.mxu0 }
 0xbcd   :  { %v725_v49 = vmul.f32 0.5, %v724_v47 }
 0xbcf   :  { %v726_v50 = vsel %vm2766_vm4, %v724_v47, %v725_v49  ;;  %v2942_v49 = vld [vmem:[%s3167_s3 + $0x38] sm:$0xff] }
 0xbd0   :  { %2529 = vtanh.f32 %v726_v50  ;;  %v2948_v50 = vld [vmem:[%s3167_s3 + $0x30] sm:$0xff] }
 0xbdd   :  { %v2530_v51 = vpop.eup %2529 }
 0xbde   :  { %v728_v52 = vmul.f32 0.5, %v2530_v51 }
 0xbe0   :  { %v729_v53 = vadd.f32 0.5, %v728_v52  ;;  %v2962_v52 = vld [vmem:[%s3167_s3 + $0x20] sm:$0xff] }
 0xbe2   :  { %v730_v54 = vsel %vm2766_vm4, %v2530_v51, %v729_v53  ;;  %v2955_v51 = vld [vmem:[%s3167_s3 + $0x28] sm:$0xff] }
 0xbe3   :  { %733 = vrot.lane.b32.xlu0 %v730_v54, %s2649_s26  ;;  %v731_v57 = vmul.f32 %v730_v54, %v633_v40 }
 0xc55   :  { %v734_v55 = vpop.permute.xlu0 %733 }
 0xc56   :  { %v736_v56 = vmul.f32 %v734_v55, %v730_v54 }
 0xc58   :  { %738 = vrot.lane.b32.xlu1 %v736_v56, %s2650_s27 }
 0xcca   :  { %v739_v58 = vpop.permute.xlu1 %738 }
 0xccb   :  { %v741_v59 = vadd.f32 %v739_v58, %v731_v57  ;;  %v203_v57 = vadd.f32 %v2841_v62, %v2763_v10 }
 0xccd   :  { %2531 = vtanh.f32 %v741_v59 }
 0xcda   :  { %v2532_v61 = vpop.eup %2531 }
 0xcdb   :  { %744 = vrot.lane.b32.xlu0 %v2532_v61, %s2649_s26 }
 0xd4d   :  { %v745_v1 = vpop.permute.xlu0 %744 }
 0xd4e   :  { %v747_v3 = vmul.f32 %v745_v1, %v730_v54 }
 0xd50   :  { %749 = vrot.lane.b32.xlu1 %v747_v3, %s2650_s27 }
 0xdc2   :  { %v750_v4 = vpop.permute.xlu1 %749 }
 0xdc3   :  { %753 = vst.msk [vmem:[#allocation3 + $0x20] sm:$0xff] %vm219_vm5, %v750_v4  ;;  %2361 = vmatmul.mubr.msk.f32.vlgmr.msra.gmra.mxu1 %vm219_vm5, %v750_v4  ;;  %v2997_v4 = vld [vmem:[%s3168_s4 + $0x1] ss:$0 sm:$0xff] }
 0xdc4   :  { %2375 = vmatpush3.msra.mxu1 %v2707_v2  ;;  %2382 = vmatprep.mubr.msk.f32.mxu1 %vm2648_vm0, %v2647_v0  ;;  %v193_v2 = vadd.f32 %v2837_v60, %v2763_v10 }
 0xdc5   :  { %2376 = vmatprep.subr.mxu1 %v2647_v0 }
 0xdc6   :  { %2377 = vmatpush3.msra.mxu1 %v2719_v5 }
 0xdc7   :  { %2378 = vmatprep.subr.mxu1 %v2647_v0 }
 0xdc8   :  { %2379 = vmatpush3.msra.mxu1 %v2727_v6 }
 0xdc9   :  { %2380 = vmatprep.subr.mxu1 %v2647_v0 }
 0xdca   :  { %2381 = vmatpush3.msra.mxu1 %v2735_v7  ;;  %v1086_v32 = vld [vmem:[#allocation3 + $0x20] sm:$0xff] }
 0xdcb   :  { %2405 = vmatprep.subr.mxu1 %v2647_v0 }
 0xe83   :  { %v828_v8 = vpop.f32.mrf.mxu1 }
 0xe84   :  { %v832_v9 = vadd.f32 %v828_v8, %v193_v2 }
 0xe85   :  { %v2362_v11 = vpop.f32.mrf.mxu1 }
 0xe86   :  { %v833_v12 = vmul.f32 0.5, %v832_v9 }
 0xe88   :  { %v834_v5 = vsel %vm2766_vm4, %v832_v9, %v833_v12 }
 0xe89   :  { %2533 = vtanh.f32 %v834_v5 }
 0xe96   :  { %v2534_v13 = vpop.eup %2533 }
 0xe97   :  { %v836_v14 = vmul.f32 0.5, %v2534_v13 }
 0xe99   :  { %v837_v6 = vadd.f32 0.5, %v836_v14 }
 0xe9b   :  { %v838_v15 = vsel %vm2766_vm4, %v2534_v13, %v837_v6 }
 0xe9c   :  { %841 = vrot.lane.b32.xlu0 %v838_v15, %s2649_s26  ;;  %v839_v60 = vmul.f32 %v838_v15, %v741_v59 }
 0xf0e   :  { %v842_v7 = vpop.permute.xlu0 %841 }
 0xf0f   :  { %v844_v17 = vmul.f32 %v842_v7, %v838_v15 }
 0xf11   :  { %846 = vrot.lane.b32.xlu1 %v844_v17, %s2650_s27 }
 0xf83   :  { %v847_v18 = vpop.permute.xlu1 %846 }
 0xf84   :  { %v849_v19 = vadd.f32 %v847_v18, %v839_v60 }
 0xf86   :  { %2535 = vtanh.f32 %v849_v19 }
 0xf93   :  { %v2536_v21 = vpop.eup %2535 }
 0xf94   :  { %852 = vrot.lane.b32.xlu0 %v2536_v21, %s2649_s26 }
0x1006   :  { %v853_v22 = vpop.permute.xlu0 %852 }
0x1007   :  { %v855_v23 = vmul.f32 %v853_v22, %v838_v15 }
0x1009   :  { %857 = vrot.lane.b32.xlu1 %v855_v23, %s2650_s27 }
0x107b   :  { %v858_v24 = vpop.permute.xlu1 %857 }
0x107c   :  { %861 = vst.msk [vmem:[#allocation3 + $0x28] sm:$0xff] %vm219_vm5, %v858_v24  ;;  %2372 = vmatmul.mubr.msk.f32.vlgmr.msra.gmra.mxu0 %vm219_vm5, %v858_v24 }
0x107d   :  { %2386 = vmatpush3.msra.mxu0 %v1081_v20  ;;  %2393 = vmatprep.mubr.msk.f32.mxu0 %vm219_vm5, %v1082_v26 }
0x107e   :  { %2387 = vmatprep.subr.mxu0 %v1080_v25 }
0x107f   :  { %2388 = vmatpush3.msra.mxu0 %v1080_v25 }
0x1080   :  { %2389 = vmatprep.subr.mxu0 %v1079_v27 }
0x1081   :  { %2390 = vmatpush3.msra.mxu0 %v1079_v27 }
0x1082   :  { %2391 = vmatprep.subr.mxu0 %v1078_v28 }
0x1083   :  { %2392 = vmatpush3.msra.mxu0 %v1078_v28  ;;  %v1087_v33 = vld [vmem:[#allocation3 + $0x28] sm:$0xff] }
0x1084   :  { %2394 = vmatmul.mubr.msk.f32.vlgmr.msra.gmra.mxu0 %vm219_vm5, %v1083_v29  ;;  %2427 = vmatprep.subr.mxu0 %v2647_v0 }
0x1085   :  { %2396 = vmatprep.mubr.msk.f32.mxu0 %vm219_vm5, %v1084_v30  ;;  %2428 = vmatpush3.msra.mxu0 %v2942_v49 }
0x1086   :  { %2429 = vmatprep.subr.mxu0 %v2647_v0 }
0x1087   :  { %2430 = vmatpush3.msra.mxu0 %v2948_v50 }
0x1088   :  { %2397 = vmatmul.mubr.msk.f32.gmra.mxu0 %vm219_vm5, %v1085_v31  ;;  %2431 = vmatprep.subr.mxu0 %v2647_v0 }
0x1089   :  { %2399 = vmatprep.mubr.msk.f32.mxu0 %vm219_vm5, %v1086_v32  ;;  %2432 = vmatpush3.msra.mxu0 %v2955_v51 }
0x108a   :  { %2433 = vmatprep.subr.mxu0 %v2647_v0 }
0x108b   :  { %2434 = vmatpush3.msra.mxu0 %v2962_v52 }
0x108c   :  { %2400 = vmatmul.mubr.msk.f32.gmra.mxu0 %vm219_vm5, %v1087_v33  ;;  %2449 = vmatprep.subr.mxu0 %v2647_v0 }
0x113c   :  { %v936_v35 = vpop.f32.mrf.mxu0 }
0x113d   :  { %v940_v36 = vadd.f32 %v936_v35, %v198_v34 }
0x113e   :  { %v2373_v37 = vpop.f32.mrf.mxu0 }
0x113f   :  { %v941_v38 = vmul.f32 0.5, %v940_v36 }
0x1141   :  { %v942_v39 = vsel %vm2766_vm4, %v940_v36, %v941_v38 }
0x1142   :  { %2537 = vtanh.f32 %v942_v39 }
0x1144   :  { %v2395_v58 = vpop.f32.mrf.mxu0 }
0x1145   :  { %v1194_v36 = vadd.f32 %v2395_v58, %v2997_v4 }
0x1146   :  { %v1188_v3 = vpop.f32.mrf.mxu0 }
0x1147   :  { %v1189_v2 = vadd.f32 %v2997_v4, %v1188_v3 }
0x114f   :  { %v2538_v40 = vpop.eup %2537 }
0x1150   :  { %v944_v41 = vmul.f32 0.5, %v2538_v40 }
0x1152   :  { %v945_v42 = vadd.f32 0.5, %v944_v41 }
0x1154   :  { %v946_v43 = vsel %vm2766_vm4, %v2538_v40, %v945_v42 }
0x1155   :  { %949 = vrot.lane.b32.xlu0 %v946_v43, %s2649_s26  ;;  %v947_v63 = vmul.f32 %v946_v43, %v849_v19 }
0x11c7   :  { %v950_v44 = vpop.permute.xlu0 %949 }
0x11c8   :  { %v952_v45 = vmul.f32 %v950_v44, %v946_v43 }
0x11ca   :  { %954 = vrot.lane.b32.xlu1 %v952_v45, %s2650_s27 }
0x123c   :  { %v955_v46 = vpop.permute.xlu1 %954 }
0x123d   :  { %v2935_v47 = vadd.f32 %v955_v46, %v947_v63 }
0x123f   :  { %2539 = vtanh.f32 %v2935_v47 }
0x124c   :  { %v2540_v48 = vpop.eup %2539 }
0x124d   :  { %960 = vrot.lane.b32.xlu0 %v2540_v48, %s2649_s26 }
0x12bf   :  { %v961_v53 = vpop.permute.xlu0 %960 }
0x12c0   :  { %v963_v54 = vmul.f32 %v961_v53, %v946_v43 }
0x12c2   :  { %965 = vrot.lane.b32.xlu1 %v963_v54, %s2650_s27 }
0x1334   :  { %v966_v55 = vpop.permute.xlu1 %965 }
0x1335   :  { %969 = vst.msk [vmem:[#allocation3 + $0x30] sm:$0xff] %vm219_vm5, %v966_v55  ;;  %2383 = vmatmul.mubr.msk.f32.vlgmr.msra.gmra.mxu1 %vm219_vm5, %v966_v55 }
0x1336   :  { %2406 = vmatpush3.msra.mxu1 %v2942_v49  ;;  %2413 = vmatprep.mubr.msk.f32.mxu1 %vm2648_vm0, %v2647_v0 }
0x1337   :  { %2407 = vmatprep.subr.mxu1 %v2647_v0 }
0x1338   :  { %2408 = vmatpush3.msra.mxu1 %v2948_v50 }
0x1339   :  { %2409 = vmatprep.subr.mxu1 %v2647_v0 }
0x133a   :  { %2410 = vmatpush3.msra.mxu1 %v2955_v51 }
0x133b   :  { %2411 = vmatprep.subr.mxu1 %v2647_v0 }
0x133c   :  { %2412 = vmatpush3.msra.mxu1 %v2962_v52  ;;  %v1088_v56 = vld [vmem:[#allocation3 + $0x30] sm:$0xff] }
0x133d   :  { %2414 = vmatmul.mubr.f32.vlgmr.msra.gmra.mxu1 %v2647_v0  ;;  %2402 = vmatprep.mubr.msk.f32.mxu0 %vm219_vm5, %v1088_v56 }
0x133e   :  { %2416 = vmatprep.subr.mxu1 %v2647_v0  ;;  %2424 = vmatprep.mubr.msk.f32.mxu1 %vm2648_vm0, %v2647_v0 }
0x133f   :  { %2417 = vmatpush3.msra.mxu1 %v2942_v49 }
0x1340   :  { %2418 = vmatprep.subr.mxu1 %v2647_v0 }
0x1341   :  { %2419 = vmatpush3.msra.mxu1 %v2948_v50 }
0x1342   :  { %2420 = vmatprep.subr.mxu1 %v2647_v0 }
0x1343   :  { %2421 = vmatpush3.msra.mxu1 %v2955_v51 }
0x1344   :  { %2422 = vmatprep.subr.mxu1 %v2647_v0 }
0x1345   :  { %2423 = vmatpush3.msra.mxu1 %v2962_v52 }
0x1346   :  { %2438 = vmatprep.subr.mxu1 %v2647_v0 }
0x13f5   :  { %v1044_v59 = vpop.f32.mrf.mxu1 }
0x13f6   :  { %v1048_v61 = vadd.f32 %v1044_v59, %v203_v57 }
0x13f7   :  { %v2384_v1 = vpop.f32.mrf.mxu1 }
0x13f8   :  { %v1049_v7 = vmul.f32 0.5, %v1048_v61 }
0x13fa   :  { %v1050_v17 = vsel %vm2766_vm4, %v1048_v61, %v1049_v7  ;;  %v2398_v61 = vpop.f32.mrf.mxu0 }
0x13fc   :  { %v1198_v1 = vpop.f32.mrf.mxu0 }
0x13fd   :  { %v1307_v8 = vpop.f32.mrf.mxu1 }
0x13fe   :  { %v1311_v9 = vadd.f32 %v1307_v8, %v1189_v2  ;;  %v3052_v3 = vpop.f32.mrf.mxu0 }
0x13ff   :  { %v2415_v11 = vpop.f32.mrf.mxu1 }
0x1400   :  { %v1312_v12 = vmul.f32 0.5, %v1311_v9  ;;  %v3054_v2 = vpop.f32.mrf.mxu0  ;;  %v1199_v11 = vadd.f32 %v2997_v4, %v1198_v1 }
0x1402   :  { %v1313_v5 = vsel %vm2766_vm4, %v1311_v9, %v1312_v12 }
0x1403   :  { %2541 = vtanh.f32 %v1313_v5 }
0x1404   :  { %2543 = vtanh.f32 %v1050_v17 }
0x1410   :  { %v2542_v10 = vpop.eup %2541 }
0x1411   :  { %v1315_v62 = vmul.f32 0.5, %v2542_v10  ;;  %v2544_v20 = vpop.eup %2543 }
0x1412   :  { %v1052_v21 = vmul.f32 0.5, %v2544_v20 }
0x1413   :  { %v1316_v13 = vadd.f32 0.5, %v1315_v62 }
0x1414   :  { %v1053_v23 = vadd.f32 0.5, %v1052_v21 }
0x1415   :  { %v1317_v14 = vsel %vm2766_vm4, %v2542_v10, %v1316_v13 }
0x1416   :  { %1320 = vrot.lane.b32.xlu0 %v1317_v14, %s2649_s26  ;;  %v1318_v60 = vmul.f32 0.0, %v1317_v14  ;;  %v1054_v24 = vsel %vm2766_vm4, %v2544_v20, %v1053_v23 }
0x1417   :  { %v1055_v30 = vmul.f32 %v1054_v24, %v2935_v47 }
0x1488   :  { %v1321_v6 = vpop.permute.xlu0 %1320 }
0x1489   :  { %v1323_v15 = vmul.f32 %v1321_v6, %v1317_v14 }
0x148b   :  { %1325 = vrot.lane.b32.xlu1 %v1323_v15, %s2650_s27 }
0x14fd   :  { %v1326_v18 = vpop.permute.xlu1 %1325 }
0x14fe   :  { %v1328_v19 = vadd.f32 %v1326_v18, %v1318_v60 }
0x1500   :  { %2545 = vtanh.f32 %v1328_v19 }
0x150d   :  { %v2546_v22 = vpop.eup %2545 }
0x150e   :  { %1331 = vrot.lane.b32.xlu0 %v2546_v22, %s2649_s26 }
0x1512   :  { %1057 = vrot.lane.b32.xlu0 %v1054_v24, %s2649_s26 }
0x1580   :  { %v1332_v25 = vpop.permute.xlu0 %1331 }
0x1581   :  { %v1334_v26 = vmul.f32 %v1332_v25, %v1317_v14  ;;  %v1204_v25 = vadd.f32 %v2398_v61, %v2997_v4 }
0x1583   :  { %1337 = vrot.lane.b32.xlu1 %v1334_v26, %s2650_s27 }
0x1584   :  { %v1058_v27 = vpop.permute.xlu0 %1057 }
0x1585   :  { %v1060_v28 = vmul.f32 %v1058_v27, %v1054_v24 }
0x1587   :  { %1062 = vrot.lane.b32.xlu0 %v1060_v28, %s2650_s27 }
0x15f5   :  { %v1338_v29 = vpop.permute.xlu1 %1337 }
0x15f6   :  { %2425 = vmatmul.mubr.msk.f32.vlgmr.msra.gmra.mxu1 %vm219_vm5, %v1338_v29 }
0x15f7   :  { %2439 = vmatpush3.msra.mxu1 %v2942_v49  ;;  %2446 = vmatprep.mubr.msk.f32.mxu1 %vm2648_vm0, %v2647_v0 }
0x15f8   :  { %2440 = vmatprep.subr.mxu1 %v2647_v0 }
0x15f9   :  { %v1063_v31 = vpop.permute.xlu0 %1062  ;;  %2441 = vmatpush3.msra.mxu1 %v2948_v50 }
0x15fa   :  { %v1065_v32 = vadd.f32 %v1063_v31, %v1055_v30  ;;  %2442 = vmatprep.subr.mxu1 %v2647_v0 }
0x15fb   :  { %2443 = vmatpush3.msra.mxu1 %v2955_v51 }
0x15fc   :  { %2547 = vtanh.f32 %v1065_v32  ;;  %2444 = vmatprep.subr.mxu1 %v2647_v0 }
0x15fd   :  { %2445 = vmatpush3.msra.mxu1 %v2962_v52 }
0x15fe   :  { %2460 = vmatprep.subr.mxu1 %v2647_v0 }
0x1609   :  { %v2548_v33 = vpop.eup %2547 }
0x160a   :  { %1068 = vrot.lane.b32.xlu0 %v2548_v33, %s2649_s26 }
0x167c   :  { %v1069_v34 = vpop.permute.xlu0 %1068 }
0x167d   :  { %v1071_v35 = vmul.f32 %v1069_v34, %v1054_v24 }
0x167f   :  { %1073 = vrot.lane.b32.xlu0 %v1071_v35, %s2650_s27 }
0x16b6   :  { %v1407_v37 = vpop.f32.mrf.mxu1 }
0x16b7   :  { %v1411_v38 = vadd.f32 %v1407_v37, %v1194_v36 }
0x16b8   :  { %v2426_v39 = vpop.f32.mrf.mxu1 }
0x16b9   :  { %v1412_v40 = vmul.f32 0.5, %v1411_v38 }
0x16bb   :  { %v1413_v41 = vsel %vm2766_vm4, %v1411_v38, %v1412_v40 }
0x16bc   :  { %2549 = vtanh.f32 %v1413_v41 }
0x16c9   :  { %v2550_v42 = vpop.eup %2549 }
0x16ca   :  { %v1415_v43 = vmul.f32 0.5, %v2550_v42 }
0x16cc   :  { %v1416_v44 = vadd.f32 0.5, %v1415_v43 }
0x16ce   :  { %v1417_v45 = vsel %vm2766_vm4, %v2550_v42, %v1416_v44  ;;  %v1209_v44 = vadd.f32 %v2997_v4, %v3054_v2 }
0x16cf   :  { %1420 = vrot.lane.b32.xlu1 %v1417_v45, %s2649_s26  ;;  %v1418_v53 = vmul.f32 %v1417_v45, %v1328_v19 }
0x16f1   :  { %v1074_v63 = vpop.permute.xlu0 %1073 }
0x16f2   :  { %1077 = vst.msk [vmem:[#allocation3 + $0x38] sm:$0xff] %vm219_vm5, %v1074_v63 }
0x16f9   :  { %v1089_v46 = vld [vmem:[#allocation3 + $0x38] sm:$0xff] }
0x16fa   :  { %2403 = vmatmul.mubr.msk.f32.gmra.mxu0 %vm219_vm5, %v1089_v46 }
0x16fb   :  { %2435 = vmatprep.mubr.msk.f32.mxu0 %vm2648_vm0, %v2647_v0 }
0x1741   :  { %v1421_v47 = vpop.permute.xlu1 %1420 }
0x1742   :  { %v1423_v48 = vmul.f32 %v1421_v47, %v1417_v45 }
0x1744   :  { %1425 = vrot.lane.b32.xlu1 %v1423_v48, %s2650_s27 }
0x17b6   :  { %v1426_v54 = vpop.permute.xlu1 %1425 }
0x17b7   :  { %v1428_v55 = vadd.f32 %v1426_v54, %v1418_v53 }
0x17b9   :  { %2551 = vtanh.f32 %v1428_v55 }
0x17ba   :  { %v3056_v8 = vpop.f32.mrf.mxu0 }
0x17bc   :  { %v3058_v9 = vpop.f32.mrf.mxu0 }
0x17c6   :  { %v2552_v56 = vpop.eup %2551 }
0x17c7   :  { %1431 = vrot.lane.b32.xlu1 %v2552_v56, %s2649_s26 }
0x1839   :  { %v1432_v57 = vpop.permute.xlu1 %1431 }
0x183a   :  { %v1434_v58 = vmul.f32 %v1432_v57, %v1417_v45 }
0x183c   :  { %1437 = vrot.lane.b32.xlu1 %v1434_v58, %s2650_s27 }
0x18ae   :  { %v1438_v59 = vpop.permute.xlu1 %1437 }
0x18af   :  { %2436 = vmatmul.mubr.msk.f32.vlgmr.msra.gmra.mxu0 %vm219_vm5, %v1438_v59 }
0x18b0   :  { %2450 = vmatpush3.msra.mxu0 %v2942_v49  ;;  %2457 = vmatprep.mubr.msk.f32.mxu0 %vm2648_vm0, %v2647_v0 }
0x18b1   :  { %2451 = vmatprep.subr.mxu0 %v2647_v0 }
0x18b2   :  { %2452 = vmatpush3.msra.mxu0 %v2948_v50 }
0x18b3   :  { %2453 = vmatprep.subr.mxu0 %v2647_v0 }
0x18b4   :  { %2454 = vmatpush3.msra.mxu0 %v2955_v51 }
0x18b5   :  { %2455 = vmatprep.subr.mxu0 %v2647_v0 }
0x18b6   :  { %2456 = vmatpush3.msra.mxu0 %v2962_v52 }
0x18b7   :  { %2471 = vmatprep.subr.mxu0 %v2647_v0 }
0x196f   :  { %v1507_v12 = vpop.f32.mrf.mxu0 }
0x1970   :  { %v1511_v5 = vadd.f32 %v1507_v12, %v1199_v11 }
0x1971   :  { %v2437_v10 = vpop.f32.mrf.mxu0 }
0x1972   :  { %v1512_v62 = vmul.f32 0.5, %v1511_v5  ;;  %v1214_v10 = vadd.f32 %v3052_v3, %v2997_v4 }
0x1974   :  { %v1513_v13 = vsel %vm2766_vm4, %v1511_v5, %v1512_v62 }
0x1975   :  { %2553 = vtanh.f32 %v1513_v13 }
0x1982   :  { %v2554_v14 = vpop.eup %2553 }
0x1983   :  { %v1515_v6 = vmul.f32 0.5, %v2554_v14 }
0x1985   :  { %v1516_v15 = vadd.f32 0.5, %v1515_v6 }
0x1987   :  { %v1517_v7 = vsel %vm2766_vm4, %v2554_v14, %v1516_v15 }
0x1988   :  { %1520 = vrot.lane.b32.xlu0 %v1517_v7, %s2649_s26  ;;  %v1518_v18 = vmul.f32 %v1517_v7, %v1428_v55 }
0x19fa   :  { %v1521_v17 = vpop.permute.xlu0 %1520 }
0x19fb   :  { %v1523_v60 = vmul.f32 %v1521_v17, %v1517_v7 }
0x19fd   :  { %1525 = vrot.lane.b32.xlu1 %v1523_v60, %s2650_s27 }
0x1a6f   :  { %v1526_v19 = vpop.permute.xlu1 %1525 }
0x1a70   :  { %v1528_v20 = vadd.f32 %v1526_v19, %v1518_v18 }
0x1a72   :  { %2555 = vtanh.f32 %v1528_v20 }
0x1a7f   :  { %v2556_v21 = vpop.eup %2555 }
0x1a80   :  { %1531 = vrot.lane.b32.xlu0 %v2556_v21, %s2649_s26 }
0x1af2   :  { %v1532_v22 = vpop.permute.xlu0 %1531 }
0x1af3   :  { %v1534_v23 = vmul.f32 %v1532_v22, %v1517_v7 }
0x1af5   :  { %1537 = vrot.lane.b32.xlu1 %v1534_v23, %s2650_s27  ;;  %v1219_v23 = vadd.f32 %v2997_v4, %v3058_v9 }
0x1b67   :  { %v1538_v24 = vpop.permute.xlu1 %1537 }
0x1b68   :  { %2447 = vmatmul.mubr.msk.f32.vlgmr.msra.gmra.mxu1 %vm219_vm5, %v1538_v24 }
0x1b69   :  { %2461 = vmatpush3.msra.mxu1 %v2942_v49  ;;  %2468 = vmatprep.mubr.msk.f32.mxu1 %vm2648_vm0, %v2647_v0 }
0x1b6a   :  { %2462 = vmatprep.subr.mxu1 %v2647_v0 }
0x1b6b   :  { %2463 = vmatpush3.msra.mxu1 %v2948_v50 }
0x1b6c   :  { %2464 = vmatprep.subr.mxu1 %v2647_v0 }
0x1b6d   :  { %2465 = vmatpush3.msra.mxu1 %v2955_v51 }
0x1b6e   :  { %2466 = vmatprep.subr.mxu1 %v2647_v0 }
0x1b6f   :  { %2467 = vmatpush3.msra.mxu1 %v2962_v52 }
0x1b70   :  { %2482 = vmatprep.subr.mxu1 %v2647_v0 }
0x1c28   :  { %v1607_v26 = vpop.f32.mrf.mxu1 }
0x1c29   :  { %v1611_v27 = vadd.f32 %v1607_v26, %v1204_v25 }
0x1c2a   :  { %v2448_v28 = vpop.f32.mrf.mxu1 }
0x1c2b   :  { %v1612_v29 = vmul.f32 0.5, %v1611_v27 }
0x1c2d   :  { %v1613_v30 = vsel %vm2766_vm4, %v1611_v27, %v1612_v29 }
0x1c2e   :  { %2557 = vtanh.f32 %v1613_v30 }
0x1c3b   :  { %v2558_v31 = vpop.eup %2557 }
0x1c3c   :  { %v1615_v32 = vmul.f32 0.5, %v2558_v31 }
0x1c3e   :  { %v1616_v33 = vadd.f32 0.5, %v1615_v32 }
0x1c40   :  { %v1617_v34 = vsel %vm2766_vm4, %v2558_v31, %v1616_v33 }
0x1c41   :  { %1620 = vrot.lane.b32.xlu0 %v1617_v34, %s2649_s26  ;;  %v1618_v37 = vmul.f32 %v1617_v34, %v1528_v20 }
0x1cb3   :  { %v1621_v35 = vpop.permute.xlu0 %1620 }
0x1cb4   :  { %v1623_v36 = vmul.f32 %v1621_v35, %v1617_v34 }
0x1cb6   :  { %1625 = vrot.lane.b32.xlu1 %v1623_v36, %s2650_s27 }
0x1d28   :  { %v1626_v38 = vpop.permute.xlu1 %1625 }
0x1d29   :  { %v1628_v39 = vadd.f32 %v1626_v38, %v1618_v37 }
0x1d2b   :  { %2559 = vtanh.f32 %v1628_v39 }
0x1d38   :  { %v2560_v40 = vpop.eup %2559 }
0x1d39   :  { %1631 = vrot.lane.b32.xlu0 %v2560_v40, %s2649_s26 }
0x1dab   :  { %v1632_v41 = vpop.permute.xlu0 %1631 }
0x1dac   :  { %v1634_v42 = vmul.f32 %v1632_v41, %v1617_v34  ;;  %v1224_v41 = vadd.f32 %v3056_v8, %v2997_v4 }
0x1dae   :  { %1637 = vrot.lane.b32.xlu1 %v1634_v42, %s2650_s27 }
0x1e20   :  { %v1638_v43 = vpop.permute.xlu1 %1637 }
0x1e21   :  { %2458 = vmatmul.mubr.msk.f32.vlgmr.msra.gmra.mxu0 %vm219_vm5, %v1638_v43 }
0x1e22   :  { %2472 = vmatpush3.msra.mxu0 %v2942_v49  ;;  %2479 = vmatprep.mubr.msk.f32.mxu0 %vm2648_vm0, %v2647_v0 }
0x1e23   :  { %2473 = vmatprep.subr.mxu0 %v2647_v0 }
0x1e24   :  { %2474 = vmatpush3.msra.mxu0 %v2948_v50 }
0x1e25   :  { %2475 = vmatprep.subr.mxu0 %v2647_v0 }
0x1e26   :  { %2476 = vmatpush3.msra.mxu0 %v2955_v51 }
0x1e27   :  { %2477 = vmatprep.subr.mxu0 %v2647_v0 }
0x1e28   :  { %2478 = vmatpush3.msra.mxu0 %v2962_v52 }
0x1e29   :  { %2493 = vmatprep.subr.mxu0 %v2647_v0 }
0x1ee1   :  { %v1707_v45 = vpop.f32.mrf.mxu0 }
0x1ee2   :  { %v1711_v63 = vadd.f32 %v1707_v45, %v1209_v44 }
0x1ee3   :  { %v2459_v46 = vpop.f32.mrf.mxu0 }
0x1ee4   :  { %v1712_v47 = vmul.f32 0.5, %v1711_v63 }
0x1ee6   :  { %v1713_v48 = vsel %vm2766_vm4, %v1711_v63, %v1712_v47 }
0x1ee7   :  { %2561 = vtanh.f32 %v1713_v48 }
0x1ef4   :  { %v2562_v53 = vpop.eup %2561 }
0x1ef5   :  { %v1715_v54 = vmul.f32 0.5, %v2562_v53 }
0x1ef7   :  { %v1716_v55 = vadd.f32 0.5, %v1715_v54 }
0x1ef9   :  { %v1717_v56 = vsel %vm2766_vm4, %v2562_v53, %v1716_v55 }
0x1efa   :  { %1720 = vrot.lane.b32.xlu0 %v1717_v56, %s2649_s26  ;;  %v1718_v59 = vmul.f32 %v1717_v56, %v1628_v39 }
0x1f6c   :  { %v1721_v57 = vpop.permute.xlu0 %1720 }
0x1f6d   :  { %v1723_v58 = vmul.f32 %v1721_v57, %v1717_v56  ;;  %v2038_v57 = vld [vmem:[#allocation7 + $0x18] sm:$0xff] }
0x1f6f   :  { %1725 = vrot.lane.b32.xlu1 %v1723_v58, %s2650_s27  ;;  %v2037_v58 = vld [vmem:[#allocation7 + $0x10] sm:$0xff] }
0x1fe1   :  { %v1726_v61 = vpop.permute.xlu1 %1725 }
0x1fe2   :  { %v1728_v1 = vadd.f32 %v1726_v61, %v1718_v59  ;;  %v2036_v59 = vld [vmem:[#allocation7 + $0x8] sm:$0xff] }
0x1fe4   :  { %2563 = vtanh.f32 %v1728_v1 }
0x1ff1   :  { %v2564_v2 = vpop.eup %2563 }
0x1ff2   :  { %1731 = vrot.lane.b32.xlu0 %v2564_v2, %s2649_s26 }
0x2064   :  { %v1732_v11 = vpop.permute.xlu0 %1731 }
0x2065   :  { %v1734_v12 = vmul.f32 %v1732_v11, %v1717_v56 }
0x2067   :  { %1737 = vrot.lane.b32.xlu1 %v1734_v12, %s2650_s27  ;;  %v2175_v12 = vld [vmem:[%s3170_s6] ss:$0 sm:$0xff] }
0x20d9   :  { %v1738_v5 = vpop.permute.xlu1 %1737 }
0x20da   :  { %2469 = vmatmul.mubr.msk.f32.vlgmr.msra.gmra.mxu1 %vm219_vm5, %v1738_v5 }
0x20db   :  { %2483 = vmatpush3.msra.mxu1 %v2942_v49  ;;  %2490 = vmatprep.mubr.msk.f32.mxu1 %vm2648_vm0, %v2647_v0 }
0x20dc   :  { %2484 = vmatprep.subr.mxu1 %v2647_v0 }
0x20dd   :  { %2485 = vmatpush3.msra.mxu1 %v2948_v50 }
0x20de   :  { %2486 = vmatprep.subr.mxu1 %v2647_v0 }
0x20df   :  { %2487 = vmatpush3.msra.mxu1 %v2955_v51 }
0x20e0   :  { %2488 = vmatprep.subr.mxu1 %v2647_v0 }
0x20e1   :  { %2489 = vmatpush3.msra.mxu1 %v2962_v52 }
0x219a   :  { %v1807_v62 = vpop.f32.mrf.mxu1 }
0x219b   :  { %v1811_v49 = vadd.f32 %v1807_v62, %v1214_v10 }
0x219c   :  { %v2470_v13 = vpop.f32.mrf.mxu1 }
0x219d   :  { %v1812_v14 = vmul.f32 0.5, %v1811_v49 }
0x219f   :  { %v1813_v6 = vsel %vm2766_vm4, %v1811_v49, %v1812_v14 }
0x21a0   :  { %2565 = vtanh.f32 %v1813_v6 }
0x21ad   :  { %v2566_v50 = vpop.eup %2565 }
0x21ae   :  { %v1815_v15 = vmul.f32 0.5, %v2566_v50 }
0x21b0   :  { %v1816_v7 = vadd.f32 0.5, %v1815_v15 }
0x21b2   :  { %v1817_v51 = vsel %vm2766_vm4, %v2566_v50, %v1816_v7 }
0x21b3   :  { %1820 = vrot.lane.b32.xlu0 %v1817_v51, %s2649_s26  ;;  %v1818_v3 = vmul.f32 %v1817_v51, %v1728_v1 }
0x2225   :  { %v1821_v52 = vpop.permute.xlu0 %1820 }
0x2226   :  { %v1823_v17 = vmul.f32 %v1821_v52, %v1817_v51 }
0x2228   :  { %1825 = vrot.lane.b32.xlu1 %v1823_v17, %s2650_s27 }
0x229a   :  { %v1826_v60 = vpop.permute.xlu1 %1825 }
0x229b   :  { %v1828_v18 = vadd.f32 %v1826_v60, %v1818_v3 }
0x229d   :  { %2567 = vtanh.f32 %v1828_v18 }
0x22aa   :  { %v2568_v19 = vpop.eup %2567 }
0x22ab   :  { %1831 = vrot.lane.b32.xlu0 %v2568_v19, %s2649_s26 }
0x231d   :  { %v1832_v20 = vpop.permute.xlu0 %1831 }
0x231e   :  { %v1834_v21 = vmul.f32 %v1832_v20, %v1817_v51 }
0x2320   :  { %1837 = vrot.lane.b32.xlu1 %v1834_v21, %s2650_s27 }
0x2392   :  { %v1838_v22 = vpop.permute.xlu1 %1837 }
0x2393   :  { %2480 = vmatmul.mubr.msk.f32.vlgmr.msra.gmra.mxu0 %vm219_vm5, %v1838_v22 }
0x2394   :  { %2501 = vmatprep.mubr.msk.f32.mxu0 %vm2648_vm0, %v2647_v0  ;;  %2494 = vmatpush3.msra.mxu0 %v2038_v57 }
0x2395   :  { %2495 = vmatprep.subr.mxu0 %v2647_v0 }
0x2396   :  { %2496 = vmatpush3.msra.mxu0 %v2037_v58 }
0x2397   :  { %2497 = vmatprep.subr.mxu0 %v2647_v0 }
0x2398   :  { %2498 = vmatpush3.msra.mxu0 %v2036_v59 }
0x2399   :  { %2499 = vmatprep.subr.mxu0 %v2647_v0 }
0x239a   :  { %2500 = vmatpush3.msra.mxu0 %v2035_v16 }
0x2453   :  { %v1907_v24 = vpop.f32.mrf.mxu0 }
0x2454   :  { %v1911_v25 = vadd.f32 %v1907_v24, %v1219_v23 }
0x2455   :  { %v2481_v26 = vpop.f32.mrf.mxu0 }
0x2456   :  { %v1912_v27 = vmul.f32 0.5, %v1911_v25 }
0x2458   :  { %v1913_v28 = vsel %vm2766_vm4, %v1911_v25, %v1912_v27 }
0x2459   :  { %2569 = vtanh.f32 %v1913_v28 }
0x2466   :  { %v2570_v29 = vpop.eup %2569 }
0x2467   :  { %v1915_v30 = vmul.f32 0.5, %v2570_v29 }
0x2469   :  { %v1916_v31 = vadd.f32 0.5, %v1915_v30 }
0x246b   :  { %v1917_v32 = vsel %vm2766_vm4, %v2570_v29, %v1916_v31 }
0x246c   :  { %1920 = vrot.lane.b32.xlu0 %v1917_v32, %s2649_s26  ;;  %v1918_v9 = vmul.f32 %v1917_v32, %v1828_v18 }
0x24de   :  { %v1921_v33 = vpop.permute.xlu0 %1920 }
0x24df   :  { %v1923_v34 = vmul.f32 %v1921_v33, %v1917_v32 }
0x24e1   :  { %1925 = vrot.lane.b32.xlu1 %v1923_v34, %s2650_s27 }
0x2553   :  { %v1926_v35 = vpop.permute.xlu1 %1925 }
0x2554   :  { %v1928_v36 = vadd.f32 %v1926_v35, %v1918_v9 }
0x2556   :  { %2571 = vtanh.f32 %v1928_v36 }
0x2563   :  { %v2572_v37 = vpop.eup %2571 }
0x2564   :  { %1931 = vrot.lane.b32.xlu0 %v2572_v37, %s2649_s26 }
0x25d6   :  { %v1932_v38 = vpop.permute.xlu0 %1931 }
0x25d7   :  { %v1934_v39 = vmul.f32 %v1932_v38, %v1917_v32 }
0x25d9   :  { %1937 = vrot.lane.b32.xlu1 %v1934_v39, %s2650_s27 }
0x264b   :  { %v1938_v40 = vpop.permute.xlu1 %1937 }
0x264c   :  { %2491 = vmatmul.mubr.msk.f32.vlgmr.msra.gmra.mxu1 %vm219_vm5, %v1938_v40 }
0x270c   :  { %v2007_v42 = vpop.f32.mrf.mxu1 }
0x270d   :  { %v2011_v43 = vadd.f32 %v2007_v42, %v1224_v41 }
0x270e   :  { %v2492_v44 = vpop.f32.mrf.mxu1 }
0x270f   :  { %v2012_v45 = vmul.f32 0.5, %v2011_v43 }
0x2711   :  { %v2013_v63 = vsel %vm2766_vm4, %v2011_v43, %v2012_v45 }
0x2712   :  { %2573 = vtanh.f32 %v2013_v63 }
0x271f   :  { %v2574_v46 = vpop.eup %2573 }
0x2720   :  { %v2015_v47 = vmul.f32 0.5, %v2574_v46 }
0x2722   :  { %v2016_v48 = vadd.f32 0.5, %v2015_v47 }
0x2724   :  { %v2017_v53 = vsel %vm2766_vm4, %v2574_v46, %v2016_v48 }
0x2725   :  { %2020 = vrot.lane.b32.xlu0 %v2017_v53, %s2649_s26  ;;  %v2018_v4 = vmul.f32 %v2017_v53, %v1928_v36 }
0x2797   :  { %v2021_v54 = vpop.permute.xlu0 %2020 }
0x2798   :  { %v2023_v55 = vmul.f32 %v2021_v54, %v2017_v53 }
0x279a   :  { %2025 = vrot.lane.b32.xlu1 %v2023_v55, %s2650_s27 }
0x280c   :  { %v2026_v8 = vpop.permute.xlu1 %2025 }
0x280d   :  { %v2028_v56 = vadd.f32 %v2026_v8, %v2018_v4 }
0x280f   :  { %2575 = vtanh.f32 %v2028_v56 }
0x281c   :  { %v2576_v61 = vpop.eup %2575 }
0x281d   :  { %2031 = vrot.lane.b32.xlu0 %v2576_v61, %s2649_s26 }
0x288f   :  { %v2032_v1 = vpop.permute.xlu0 %2031 }
0x2890   :  { %v2034_v2 = vmul.f32 %v2032_v1, %v2017_v53 }
0x2892   :  { %2047 = vrot.lane.b32.xlu1 %v2034_v2, %s2650_s27 }
0x2904   :  { %v2048_v11 = vpop.permute.xlu1 %2047 }
0x2905   :  { %2502 = vmatmul.mubr.msk.f32.vlgmr.msra.gmra.mxu0 %vm219_vm5, %v2048_v11 }
0x29c5   :  { %v2117_v5 = vpop.f32.mrf.mxu0 }
0x29c6   :  { %v2118_v10 = vadd.f32 %v2175_v12, %v2117_v5 }
0x29c7   :  { %v2503_v0 = vpop.f32.mrf.mxu0 }
0x29c8   :  { %2121 = vst [vmem:[#allocation9] sm:$0xff] %v2118_v10 }
0x29c9   :  { %2628 = shalt.err (!%p2625_p0)
}
0x29ca   :  { %2131 = dma.vmem_to_hbm [thread:$0]  %s2129_s24, 128, %s3171_s7, [#allocation6]  }
0x29cb   :  { %2641 = dma.done.wait [#allocation6], 128  }
0x29cc   :  { %2642 = vsyncadd [#allocation6], 4294967168 }
0x29cd   :  { %2135 = vsyncpa [#allocation5], 1 }
0x29ce   :  { %2136 = vsyncpa [#allocation8], 1 }
0x29cf   :  { %2137 = vsyncpa [#allocation6], 1 }

// kernel: tpu_custom_call.1
= control target key start
LH: loop header
LB: loop body
LE: loop exit
PB: predicated region body
PF: predicated region fallthrough
CT: control target
= control target key end

     0   :  { %12 = vsyncpa [#allocation5], 0  ;;  %s3164_s0 = inlined_call_operand.vmem [shape: f32[1,64,8], index: 0, kind: input, shape index: {}]   ;;  %s3165_s1 = inlined_call_operand.vmem [shape: f32[8,128], index: 1, kind: input, shape index: {}]   ;;  %s3166_s2 = inlined_call_operand.hbm [shape: f32[1,32,128], index: 2, kind: input, shape index: {}]   ;;  %s3167_s3 = inlined_call_operand.vmem [shape: f32[2,32,128], index: 3, kind: input, shape index: {}]   ;;  %s3168_s4 = inlined_call_operand.vmem [shape: f32[2,1,128], index: 4, kind: input, shape index: {}]   ;;  %s3169_s5 = inlined_call_operand.hbm [shape: f32[32,128], index: 5, kind: input, shape index: {}]   ;;  %s3170_s6 = inlined_call_operand.vmem [shape: f32[1,128], index: 6, kind: input, shape index: {}]   ;;  %s3171_s7 = inlined_call_operand.hbm [shape: f32[8,128], index: 7, kind: output, shape index: {}]  }
   0x1   :  { %13 = vsyncpa [#allocation8], 0 }
   0x2   :  { %14 = vsyncpa [#allocation6], 0  ;;  %s2643_s24 = smov [#allocation4]  }
   0x3   :  { %s24_s25 = sshll.u32 %s2643_s24, 4  ;;  %s25_s25 = int_to_ptr.vmem [resolvable:$true] %s24_s25 }
   0x4   :  { %s2585_s26 = scalar_lea.vmem %s25_s25, 512  ;;  %p2590_p1 = scmp.lt.s32.totalorder %s25_s25, %s25_s25 }
   0x5   :  { %p2586_p0 = scmp.ne.s32.totalorder %s25_s25, %s2585_s26  ;;  %p2591_p2 = scmp.lt.s32.totalorder %s2585_s26, %s2585_s26 }
   0x7   :  { %p2592_p3 = por %p2591_p2, %p2590_p1 }
   0x9   :  { %p2593_p4 = pnand %p2592_p3, %p2586_p0 }
   0xb   :  { %2596 = shalt.err (!%p2593_p4)
}
   0xc   :  { %s2644_s27 = smov 128   ;;  %s2645_s28 = smov 8  }
   0xd   :  { %30 = dma.hbm_to_vmem [thread:$0]  %s3166_s2, 512, %s25_s25, [#allocation5], %s2644_s27, %s2644_s27, %s2645_s28  }
   0xe   :  { %s2646_s8 = smov [#allocation7]  }
   0xf   :  { %s40_s9 = sshll.u32 %s2646_s8, 4  ;;  %s41_s9 = int_to_ptr.vmem [resolvable:$true] %s40_s9 }
  0x10   :  { %s2605_s10 = scalar_lea.vmem %s41_s9, 512  ;;  %p2610_p6 = scmp.lt.s32.totalorder %s41_s9, %s41_s9 }
  0x11   :  { %p2606_p5 = scmp.ne.s32.totalorder %s41_s9, %s2605_s10  ;;  %p2611_p7 = scmp.lt.s32.totalorder %s2605_s10, %s2605_s10 }
  0x13   :  { %p2612_p8 = por %p2611_p7, %p2610_p6 }
  0x15   :  { %p2613_p9 = pnand %p2612_p8, %p2606_p5 }
  0x17   :  { %2616 = shalt.err (!%p2613_p9)
}
  0x18   :  { %46 = dma.hbm_to_vmem [thread:$0]  %s3169_s5, 512, %s41_s9, [#allocation8], %s2644_s27, %s2644_s27, %s2645_s28  }
  0x19   :  { %2637 = dma.done.wait [#allocation5], 512  }
  0x1a   :  { %2638 = vsyncadd [#allocation5], 4294966784 }
  0x1b   :  { %2639 = dma.done.wait [#allocation8], 512  }
  0x1c   :  { %2640 = vsyncadd [#allocation8], 4294966784  ;;  %v2647_v0 = vmov 0.0   ;;  %vm2648_vm0 = vmmov 0   ;;  %vm76_vm1 = vcmask 64512   ;;  %v60_v1 = vld [vmem:[%s3165_s1] sm:$0xff]  ;;  %v55_v8 = vlaneseq }
  0x1d   :  { %2297 = vmatprep.subr.mxu1 %v2647_v0  ;;  %2305 = vmatprep.mubr.msk.f32.mxu1 %vm2648_vm0, %v2647_v0  ;;  %v2707_v2 = vld [vmem:[%s3167_s3 + $0x18] sm:$0xff]  ;;  %v61_v3 = vld [vmem:[%s3164_s0] sm:$0xff]  ;;  %v62_v4 = vld [vmem:[%s3164_s0 + $0x8] sm:$0xff]  ;;  %s2649_s26 = smov 64   ;;  %s2650_s27 = smov 32   ;;  %vm219_vm5 = vcmask 261120  }
  0x1e   :  { %2283 = vmatprep.subr.mxu0 %v60_v1  ;;  %2298 = vmatpush3.msra.mxu1 %v2707_v2  ;;  %v2719_v5 = vld [vmem:[%s3167_s3 + $0x10] sm:$0xff]  ;;  %v2727_v6 = vld [vmem:[%s3167_s3 + $0x8] sm:$0xff]  ;;  %v2735_v7 = vld [vmem:[%s3167_s3] sm:$0xff]  ;;  %v56_v11 = vand.u32 127, %v55_v8  ;;  %s2651_s23 = smov [#allocation9]  }
  0x1f   :  { %2284 = vmatpush3.msra.mxu0 %v60_v1  ;;  %2285 = vmatprep.mubr.msk.f32.mxu0 %vm76_vm1, %v61_v3  ;;  %v2763_v10 = vld [vmem:[%s3168_s4] ss:$0 sm:$0xff]  ;;  %v63_v48 = vld [vmem:[%s3164_s0 + $0x10] sm:$0xff]  ;;  %v64_v49 = vld [vmem:[%s3164_s0 + $0x18] sm:$0xff]  ;;  %s2128_s24 = sshll.u32 %s2651_s23, 4  ;;  %s2129_s24 = int_to_ptr.vmem [resolvable:$true] %s2128_s24 }
  0x20   :  { %2299 = vmatprep.subr.mxu1 %v2647_v0  ;;  %2286 = vmatmul.mubr.msk.f32.vlgmr.msra.gmra.mxu0 %vm76_vm1, %v62_v4  ;;  %vm57_vm2 = vcmp.ge.s32.totalorder %v56_v11, 64  ;;  %vm58_vm3 = vcmp.lt.s32.totalorder %v56_v11, 96  ;;  %v65_v50 = vld [vmem:[%s3164_s0 + $0x20] sm:$0xff]  ;;  %v66_v51 = vld [vmem:[%s3164_s0 + $0x28] sm:$0xff]  ;;  %v67_v52 = vld [vmem:[%s3164_s0 + $0x30] sm:$0xff]  ;;  %s2617_s25 = scalar_lea.vmem %s2129_s24, 128  ;;  %p2622_p11 = scmp.lt.s32.totalorder %s2129_s24, %s2129_s24 }
  0x21   :  { %2300 = vmatpush3.msra.mxu1 %v2719_v5  ;;  %2319 = vmatprep.subr.mxu0 %v2647_v0  ;;  %vm2766_vm4 = vmand %vm57_vm2, %vm58_vm3  ;;  %v68_v53 = vld [vmem:[%s3164_s0 + $0x38] sm:$0xff]  ;;  %v2035_v16 = vld [vmem:[#allocation7] sm:$0xff]  ;;  %p2618_p10 = scmp.ne.s32.totalorder %s2129_s24, %s2617_s25  ;;  %p2623_p12 = scmp.lt.s32.totalorder %s2617_s25, %s2617_s25 }
  0x22   :  { %2301 = vmatprep.subr.mxu1 %v2647_v0  ;;  %2320 = vmatpush3.msra.mxu0 %v2707_v2 }
  0x23   :  { %2302 = vmatpush3.msra.mxu1 %v2727_v6  ;;  %2321 = vmatprep.subr.mxu0 %v2647_v0  ;;  %p2624_p13 = por %p2623_p12, %p2622_p11 }
  0x24   :  { %2303 = vmatprep.subr.mxu1 %v2647_v0  ;;  %2322 = vmatpush3.msra.mxu0 %v2719_v5 }
  0x25   :  { %2304 = vmatpush3.msra.mxu1 %v2735_v7  ;;  %2323 = vmatprep.subr.mxu0 %v2647_v0  ;;  %p2625_p0 = pnand %p2624_p13, %p2618_p10 }
  0x26   :  { %2306 = vmatmul.mubr.f32.vlgmr.msra.gmra.mxu1 %v2647_v0  ;;  %2308 = vmatprep.subr.mxu1 %v2647_v0 }
  0x27   :  { %2309 = vmatpush3.msra.mxu1 %v2707_v2  ;;  %2316 = vmatprep.mubr.msk.f32.mxu1 %vm2648_vm0, %v2647_v0 }
  0x28   :  { %2310 = vmatprep.subr.mxu1 %v2647_v0  ;;  %2324 = vmatpush3.msra.mxu0 %v2727_v6 }
  0x29   :  { %2311 = vmatpush3.msra.mxu1 %v2719_v5  ;;  %2325 = vmatprep.subr.mxu0 %v2647_v0 }
  0x2a   :  { %2312 = vmatprep.subr.mxu1 %v2647_v0  ;;  %2326 = vmatpush3.msra.mxu0 %v2735_v7 }
  0x2b   :  { %2313 = vmatpush3.msra.mxu1 %v2727_v6  ;;  %2341 = vmatprep.subr.mxu0 %v2647_v0 }
  0x2c   :  { %2314 = vmatprep.subr.mxu1 %v2647_v0  ;;  %2288 = vmatprep.mubr.msk.f32.mxu0 %vm76_vm1, %v63_v48 }
  0x2d   :  { %2315 = vmatpush3.msra.mxu1 %v2735_v7  ;;  %2289 = vmatmul.mubr.msk.f32.gmra.mxu0 %vm76_vm1, %v64_v49 }
  0x2e   :  { %2330 = vmatprep.subr.mxu1 %v2647_v0  ;;  %2291 = vmatprep.mubr.msk.f32.mxu0 %vm76_vm1, %v65_v50 }
  0x31   :  { %2292 = vmatmul.mubr.msk.f32.gmra.mxu0 %vm76_vm1, %v66_v51 }
  0x32   :  { %2294 = vmatprep.mubr.msk.f32.mxu0 %vm76_vm1, %v67_v52 }
  0x35   :  { %2295 = vmatmul.mubr.msk.f32.gmra.mxu0 %vm76_vm1, %v68_v53 }
  0x36   :  { %2327 = vmatprep.mubr.msk.f32.mxu0 %vm2648_vm0, %v2647_v0 }
  0xe0   :  { %v2287_v9 = vpop.f32.mrf.mxu0 }
  0xe1   :  { %v173_v33 = vadd.f32 %v2287_v9, %v2763_v10 }
  0xe2   :  { %v167_v12 = vpop.f32.mrf.mxu0 }
  0xe3   :  { %v168_v13 = vadd.f32 %v2763_v10, %v167_v12 }
  0xe6   :  { %v289_v14 = vpop.f32.mrf.mxu1 }
  0xe7   :  { %v293_v15 = vadd.f32 %v289_v14, %v168_v13 }
  0xe8   :  { %v2307_v17 = vpop.f32.mrf.mxu1 }
  0xe9   :  { %v294_v18 = vmul.f32 0.5, %v293_v15 }
  0xeb   :  { %v295_v19 = vsel %vm2766_vm4, %v293_v15, %v294_v18 }
  0xec   :  { %2513 = vtanh.f32 %v295_v19 }
  0xed   :  { %v2290_v58 = vpop.f32.mrf.mxu0 }
  0xef   :  { %v177_v59 = vpop.f32.mrf.mxu0 }
  0xf0   :  { %v178_v1 = vadd.f32 %v2763_v10, %v177_v59 }
  0xf1   :  { %v2837_v60 = vpop.f32.mrf.mxu0 }
  0xf3   :  { %v2839_v61 = vpop.f32.mrf.mxu0 }
  0xf5   :  { %v2841_v62 = vpop.f32.mrf.mxu0 }
  0xf7   :  { %v2843_v63 = vpop.f32.mrf.mxu0 }
  0xf9   :  { %v2514_v20 = vpop.eup %2513 }
  0xfa   :  { %v297_v21 = vmul.f32 0.5, %v2514_v20 }
  0xfc   :  { %v298_v22 = vadd.f32 0.5, %v297_v21 }
  0xfe   :  { %v299_v23 = vsel %vm2766_vm4, %v2514_v20, %v298_v22 }
  0xff   :  { %302 = vrot.lane.b32.xlu0 %v299_v23, %s2649_s26  ;;  %v300_v26 = vmul.f32 0.0, %v299_v23 }
 0x171   :  { %v303_v24 = vpop.permute.xlu0 %302 }
 0x172   :  { %v305_v25 = vmul.f32 %v303_v24, %v299_v23 }
 0x174   :  { %307 = vrot.lane.b32.xlu0 %v305_v25, %s2650_s27 }
 0x1e6   :  { %v308_v27 = vpop.permute.xlu0 %307 }
 0x1e7   :  { %v310_v28 = vadd.f32 %v308_v27, %v300_v26  ;;  %v183_v26 = vadd.f32 %v2290_v58, %v2763_v10 }
 0x1e9   :  { %2515 = vtanh.f32 %v310_v28 }
 0x1f6   :  { %v2516_v29 = vpop.eup %2515 }
 0x1f7   :  { %313 = vrot.lane.b32.xlu1 %v2516_v29, %s2649_s26 }
 0x269   :  { %v314_v30 = vpop.permute.xlu1 %313 }
 0x26a   :  { %v316_v31 = vmul.f32 %v314_v30, %v299_v23 }
 0x26c   :  { %318 = vrot.lane.b32.xlu1 %v316_v31, %s2650_s27 }
 0x2de   :  { %v319_v32 = vpop.permute.xlu1 %318 }
 0x2df   :  { %321 = vst.msk [vmem:[#allocation3] sm:$0xff] %vm219_vm5, %v319_v32  ;;  %2317 = vmatmul.mubr.msk.f32.vlgmr.msra.gmra.mxu1 %vm219_vm5, %v319_v32 }
 0x2e0   :  { %2331 = vmatpush3.msra.mxu1 %v2707_v2  ;;  %2338 = vmatprep.mubr.msk.f32.mxu1 %vm2648_vm0, %v2647_v0 }
 0x2e1   :  { %2332 = vmatprep.subr.mxu1 %v2647_v0 }
 0x2e2   :  { %2333 = vmatpush3.msra.mxu1 %v2719_v5 }
 0x2e3   :  { %2334 = vmatprep.subr.mxu1 %v2647_v0 }
 0x2e4   :  { %2335 = vmatpush3.msra.mxu1 %v2727_v6 }
 0x2e5   :  { %2336 = vmatprep.subr.mxu1 %v2647_v0 }
 0x2e6   :  { %2337 = vmatpush3.msra.mxu1 %v2735_v7 }
 0x2e7   :  { %2352 = vmatprep.subr.mxu1 %v2647_v0 }
 0x39f   :  { %v396_v34 = vpop.f32.mrf.mxu1 }
 0x3a0   :  { %v400_v35 = vadd.f32 %v396_v34, %v173_v33 }
 0x3a1   :  { %v2318_v36 = vpop.f32.mrf.mxu1 }
 0x3a2   :  { %v401_v37 = vmul.f32 0.5, %v400_v35 }
 0x3a4   :  { %v402_v38 = vsel %vm2766_vm4, %v400_v35, %v401_v37 }
 0x3a5   :  { %2517 = vtanh.f32 %v402_v38 }
 0x3b2   :  { %v2518_v39 = vpop.eup %2517 }
 0x3b3   :  { %v404_v40 = vmul.f32 0.5, %v2518_v39 }
 0x3b5   :  { %v405_v41 = vadd.f32 0.5, %v404_v40 }
 0x3b7   :  { %v406_v42 = vsel %vm2766_vm4, %v2518_v39, %v405_v41 }
 0x3b8   :  { %409 = vrot.lane.b32.xlu0 %v406_v42, %s2649_s26  ;;  %v407_v45 = vmul.f32 %v406_v42, %v310_v28 }
 0x42a   :  { %v410_v43 = vpop.permute.xlu0 %409 }
 0x42b   :  { %v412_v44 = vmul.f32 %v410_v43, %v406_v42 }
 0x42d   :  { %414 = vrot.lane.b32.xlu1 %v412_v44, %s2650_s27 }
 0x49f   :  { %v415_v46 = vpop.permute.xlu1 %414 }
 0x4a0   :  { %v417_v47 = vadd.f32 %v415_v46, %v407_v45  ;;  %v188_v45 = vadd.f32 %v2763_v10, %v2839_v61 }
 0x4a2   :  { %2519 = vtanh.f32 %v417_v47 }
 0x4af   :  { %v2520_v54 = vpop.eup %2519 }
 0x4b0   :  { %420 = vrot.lane.b32.xlu0 %v2520_v54, %s2649_s26 }
 0x522   :  { %v421_v55 = vpop.permute.xlu0 %420 }
 0x523   :  { %v423_v56 = vmul.f32 %v421_v55, %v406_v42 }
 0x525   :  { %425 = vrot.lane.b32.xlu1 %v423_v56, %s2650_s27 }
 0x597   :  { %v426_v57 = vpop.permute.xlu1 %425 }
 0x598   :  { %429 = vst.msk [vmem:[#allocation3 + $0x8] sm:$0xff] %vm219_vm5, %v426_v57  ;;  %2328 = vmatmul.mubr.msk.f32.vlgmr.msra.gmra.mxu0 %vm219_vm5, %v426_v57 }
 0x599   :  { %2342 = vmatpush3.msra.mxu0 %v2707_v2  ;;  %2349 = vmatprep.mubr.msk.f32.mxu0 %vm2648_vm0, %v2647_v0 }
 0x59a   :  { %2343 = vmatprep.subr.mxu0 %v2647_v0 }
 0x59b   :  { %2344 = vmatpush3.msra.mxu0 %v2719_v5 }
 0x59c   :  { %2345 = vmatprep.subr.mxu0 %v2647_v0 }
 0x59d   :  { %2346 = vmatpush3.msra.mxu0 %v2727_v6 }
 0x59e   :  { %2347 = vmatprep.subr.mxu0 %v2647_v0 }
 0x59f   :  { %2348 = vmatpush3.msra.mxu0 %v2735_v7 }
 0x5a0   :  { %2363 = vmatprep.subr.mxu0 %v2647_v0 }
 0x658   :  { %v504_v3 = vpop.f32.mrf.mxu0 }
 0x659   :  { %v508_v4 = vadd.f32 %v504_v3, %v178_v1 }
 0x65a   :  { %v2329_v8 = vpop.f32.mrf.mxu0 }
 0x65b   :  { %v509_v9 = vmul.f32 0.5, %v508_v4 }
 0x65d   :  { %v510_v11 = vsel %vm2766_vm4, %v508_v4, %v509_v9 }
 0x65e   :  { %2521 = vtanh.f32 %v510_v11 }
 0x66b   :  { %v2522_v12 = vpop.eup %2521 }
 0x66c   :  { %v512_v13 = vmul.f32 0.5, %v2522_v12 }
 0x66e   :  { %v513_v14 = vadd.f32 0.5, %v512_v13 }
 0x670   :  { %v514_v15 = vsel %vm2766_vm4, %v2522_v12, %v513_v14 }
 0x671   :  { %517 = vrot.lane.b32.xlu0 %v514_v15, %s2649_s26  ;;  %v515_v19 = vmul.f32 %v514_v15, %v417_v47 }
 0x6e3   :  { %v518_v17 = vpop.permute.xlu0 %517 }
 0x6e4   :  { %v520_v18 = vmul.f32 %v518_v17, %v514_v15 }
 0x6e6   :  { %522 = vrot.lane.b32.xlu1 %v520_v18, %s2650_s27 }
 0x758   :  { %v523_v20 = vpop.permute.xlu1 %522 }
 0x759   :  { %v525_v21 = vadd.f32 %v523_v20, %v515_v19  ;;  %v1081_v20 = vld [vmem:[#allocation4 + $0x18] sm:$0xff] }
 0x75b   :  { %2523 = vtanh.f32 %v525_v21 }
 0x768   :  { %v2524_v22 = vpop.eup %2523 }
 0x769   :  { %528 = vrot.lane.b32.xlu0 %v2524_v22, %s2649_s26 }
 0x7db   :  { %v529_v23 = vpop.permute.xlu0 %528 }
 0x7dc   :  { %v531_v24 = vmul.f32 %v529_v23, %v514_v15 }
 0x7de   :  { %533 = vrot.lane.b32.xlu1 %v531_v24, %s2650_s27 }
 0x850   :  { %v534_v25 = vpop.permute.xlu1 %533 }
 0x851   :  { %537 = vst.msk [vmem:[#allocation3 + $0x10] sm:$0xff] %vm219_vm5, %v534_v25  ;;  %2339 = vmatmul.mubr.msk.f32.vlgmr.msra.gmra.mxu1 %vm219_vm5, %v534_v25  ;;  %v1080_v25 = vld [vmem:[#allocation4 + $0x10] sm:$0xff] }
 0x852   :  { %2353 = vmatpush3.msra.mxu1 %v2707_v2  ;;  %2360 = vmatprep.mubr.msk.f32.mxu1 %vm2648_vm0, %v2647_v0 }
 0x853   :  { %2354 = vmatprep.subr.mxu1 %v2647_v0 }
 0x854   :  { %2355 = vmatpush3.msra.mxu1 %v2719_v5 }
 0x855   :  { %2356 = vmatprep.subr.mxu1 %v2647_v0 }
 0x856   :  { %2357 = vmatpush3.msra.mxu1 %v2727_v6 }
 0x857   :  { %2358 = vmatprep.subr.mxu1 %v2647_v0 }
 0x858   :  { %2359 = vmatpush3.msra.mxu1 %v2735_v7 }
 0x859   :  { %2374 = vmatprep.subr.mxu1 %v2647_v0 }
 0x911   :  { %v612_v27 = vpop.f32.mrf.mxu1 }
 0x912   :  { %v616_v28 = vadd.f32 %v612_v27, %v183_v26  ;;  %v1082_v26 = vld [vmem:[#allocation3] sm:$0xff]  ;;  %v1079_v27 = vld [vmem:[#allocation4 + $0x8] sm:$0xff] }
 0x913   :  { %v2340_v29 = vpop.f32.mrf.mxu1 }
 0x914   :  { %v617_v30 = vmul.f32 0.5, %v616_v28  ;;  %v1083_v29 = vld [vmem:[#allocation3 + $0x8] sm:$0xff] }
 0x916   :  { %v618_v31 = vsel %vm2766_vm4, %v616_v28, %v617_v30  ;;  %v1078_v28 = vld [vmem:[#allocation4] sm:$0xff]  ;;  %v1084_v30 = vld [vmem:[#allocation3 + $0x10] sm:$0xff] }
 0x917   :  { %2525 = vtanh.f32 %v618_v31 }
 0x924   :  { %v2526_v32 = vpop.eup %2525 }
 0x925   :  { %v620_v33 = vmul.f32 0.5, %v2526_v32 }
 0x927   :  { %v621_v34 = vadd.f32 0.5, %v620_v33 }
 0x929   :  { %v622_v35 = vsel %vm2766_vm4, %v2526_v32, %v621_v34  ;;  %v198_v34 = vadd.f32 %v2763_v10, %v2843_v63 }
 0x92a   :  { %625 = vrot.lane.b32.xlu0 %v622_v35, %s2649_s26  ;;  %v623_v38 = vmul.f32 %v622_v35, %v525_v21 }
 0x99c   :  { %v626_v36 = vpop.permute.xlu0 %625 }
 0x99d   :  { %v628_v37 = vmul.f32 %v626_v36, %v622_v35 }
 0x99f   :  { %630 = vrot.lane.b32.xlu1 %v628_v37, %s2650_s27 }
 0xa11   :  { %v631_v39 = vpop.permute.xlu1 %630 }
 0xa12   :  { %v633_v40 = vadd.f32 %v631_v39, %v623_v38 }
 0xa14   :  { %2527 = vtanh.f32 %v633_v40 }
 0xa21   :  { %v2528_v41 = vpop.eup %2527 }
 0xa22   :  { %636 = vrot.lane.b32.xlu0 %v2528_v41, %s2649_s26 }
 0xa94   :  { %v637_v42 = vpop.permute.xlu0 %636 }
 0xa95   :  { %v639_v43 = vmul.f32 %v637_v42, %v622_v35 }
 0xa97   :  { %641 = vrot.lane.b32.xlu1 %v639_v43, %s2650_s27 }
 0xb09   :  { %v642_v44 = vpop.permute.xlu1 %641 }
 0xb0a   :  { %645 = vst.msk [vmem:[#allocation3 + $0x18] sm:$0xff] %vm219_vm5, %v642_v44  ;;  %2350 = vmatmul.mubr.msk.f32.vlgmr.msra.gmra.mxu0 %vm219_vm5, %v642_v44 }
 0xb0b   :  { %2364 = vmatpush3.msra.mxu0 %v2707_v2  ;;  %2371 = vmatprep.mubr.msk.f32.mxu0 %vm2648_vm0, %v2647_v0 }
 0xb0c   :  { %2365 = vmatprep.subr.mxu0 %v2647_v0 }
 0xb0d   :  { %2366 = vmatpush3.msra.mxu0 %v2719_v5 }
 0xb0e   :  { %2367 = vmatprep.subr.mxu0 %v2647_v0 }
 0xb0f   :  { %2368 = vmatpush3.msra.mxu0 %v2727_v6 }
 0xb10   :  { %2369 = vmatprep.subr.mxu0 %v2647_v0 }
 0xb11   :  { %2370 = vmatpush3.msra.mxu0 %v2735_v7  ;;  %v1085_v31 = vld [vmem:[#allocation3 + $0x18] sm:$0xff] }
 0xb12   :  { %2385 = vmatprep.subr.mxu0 %v1081_v20 }
 0xbca   :  { %v720_v46 = vpop.f32.mrf.mxu0 }
 0xbcb   :  { %v724_v47 = vadd.f32 %v720_v46, %v188_v45 }
 0xbcc   :  { %v2351_v48 = vpop.f32.mrf.mxu0 }
 0xbcd   :  { %v725_v49 = vmul.f32 0.5, %v724_v47 }
 0xbcf   :  { %v726_v50 = vsel %vm2766_vm4, %v724_v47, %v725_v49  ;;  %v2942_v49 = vld [vmem:[%s3167_s3 + $0x38] sm:$0xff] }
 0xbd0   :  { %2529 = vtanh.f32 %v726_v50  ;;  %v2948_v50 = vld [vmem:[%s3167_s3 + $0x30] sm:$0xff] }
 0xbdd   :  { %v2530_v51 = vpop.eup %2529 }
 0xbde   :  { %v728_v52 = vmul.f32 0.5, %v2530_v51 }
 0xbe0   :  { %v729_v53 = vadd.f32 0.5, %v728_v52  ;;  %v2962_v52 = vld [vmem:[%s3167_s3 + $0x20] sm:$0xff] }
 0xbe2   :  { %v730_v54 = vsel %vm2766_vm4, %v2530_v51, %v729_v53  ;;  %v2955_v51 = vld [vmem:[%s3167_s3 + $0x28] sm:$0xff] }
 0xbe3   :  { %733 = vrot.lane.b32.xlu0 %v730_v54, %s2649_s26  ;;  %v731_v57 = vmul.f32 %v730_v54, %v633_v40 }
 0xc55   :  { %v734_v55 = vpop.permute.xlu0 %733 }
 0xc56   :  { %v736_v56 = vmul.f32 %v734_v55, %v730_v54 }
 0xc58   :  { %738 = vrot.lane.b32.xlu1 %v736_v56, %s2650_s27 }
 0xcca   :  { %v739_v58 = vpop.permute.xlu1 %738 }
 0xccb   :  { %v741_v59 = vadd.f32 %v739_v58, %v731_v57  ;;  %v203_v57 = vadd.f32 %v2841_v62, %v2763_v10 }
 0xccd   :  { %2531 = vtanh.f32 %v741_v59 }
 0xcda   :  { %v2532_v61 = vpop.eup %2531 }
 0xcdb   :  { %744 = vrot.lane.b32.xlu0 %v2532_v61, %s2649_s26 }
 0xd4d   :  { %v745_v1 = vpop.permute.xlu0 %744 }
 0xd4e   :  { %v747_v3 = vmul.f32 %v745_v1, %v730_v54 }
 0xd50   :  { %749 = vrot.lane.b32.xlu1 %v747_v3, %s2650_s27 }
 0xdc2   :  { %v750_v4 = vpop.permute.xlu1 %749 }
 0xdc3   :  { %753 = vst.msk [vmem:[#allocation3 + $0x20] sm:$0xff] %vm219_vm5, %v750_v4  ;;  %2361 = vmatmul.mubr.msk.f32.vlgmr.msra.gmra.mxu1 %vm219_vm5, %v750_v4  ;;  %v2997_v4 = vld [vmem:[%s3168_s4 + $0x1] ss:$0 sm:$0xff] }
 0xdc4   :  { %2375 = vmatpush3.msra.mxu1 %v2707_v2  ;;  %2382 = vmatprep.mubr.msk.f32.mxu1 %vm2648_vm0, %v2647_v0  ;;  %v193_v2 = vadd.f32 %v2837_v60, %v2763_v10 }
 0xdc5   :  { %2376 = vmatprep.subr.mxu1 %v2647_v0 }
 0xdc6   :  { %2377 = vmatpush3.msra.mxu1 %v2719_v5 }
 0xdc7   :  { %2378 = vmatprep.subr.mxu1 %v2647_v0 }
 0xdc8   :  { %2379 = vmatpush3.msra.mxu1 %v2727_v6 }
 0xdc9   :  { %2380 = vmatprep.subr.mxu1 %v2647_v0 }
 0xdca   :  { %2381 = vmatpush3.msra.mxu1 %v2735_v7  ;;  %v1086_v32 = vld [vmem:[#allocation3 + $0x20] sm:$0xff] }
 0xdcb   :  { %2405 = vmatprep.subr.mxu1 %v2647_v0 }
 0xe83   :  { %v828_v8 = vpop.f32.mrf.mxu1 }
 0xe84   :  { %v832_v9 = vadd.f32 %v828_v8, %v193_v2 }
 0xe85   :  { %v2362_v11 = vpop.f32.mrf.mxu1 }
 0xe86   :  { %v833_v12 = vmul.f32 0.5, %v832_v9 }
 0xe88   :  { %v834_v5 = vsel %vm2766_vm4, %v832_v9, %v833_v12 }
 0xe89   :  { %2533 = vtanh.f32 %v834_v5 }
 0xe96   :  { %v2534_v13 = vpop.eup %2533 }
 0xe97   :  { %v836_v14 = vmul.f32 0.5, %v2534_v13 }
 0xe99   :  { %v837_v6 = vadd.f32 0.5, %v836_v14 }
 0xe9b   :  { %v838_v15 = vsel %vm2766_vm4, %v2534_v13, %v837_v6 }
 0xe9c   :  { %841 = vrot.lane.b32.xlu0 %v838_v15, %s2649_s26  ;;  %v839_v60 = vmul.f32 %v838_v15, %v741_v59 }
 0xf0e   :  { %v842_v7 = vpop.permute.xlu0 %841 }
 0xf0f   :  { %v844_v17 = vmul.f32 %v842_v7, %v838_v15 }
 0xf11   :  { %846 = vrot.lane.b32.xlu1 %v844_v17, %s2650_s27 }
 0xf83   :  { %v847_v18 = vpop.permute.xlu1 %846 }
 0xf84   :  { %v849_v19 = vadd.f32 %v847_v18, %v839_v60 }
 0xf86   :  { %2535 = vtanh.f32 %v849_v19 }
 0xf93   :  { %v2536_v21 = vpop.eup %2535 }
 0xf94   :  { %852 = vrot.lane.b32.xlu0 %v2536_v21, %s2649_s26 }
0x1006   :  { %v853_v22 = vpop.permute.xlu0 %852 }
0x1007   :  { %v855_v23 = vmul.f32 %v853_v22, %v838_v15 }
0x1009   :  { %857 = vrot.lane.b32.xlu1 %v855_v23, %s2650_s27 }
0x107b   :  { %v858_v24 = vpop.permute.xlu1 %857 }
0x107c   :  { %861 = vst.msk [vmem:[#allocation3 + $0x28] sm:$0xff] %vm219_vm5, %v858_v24  ;;  %2372 = vmatmul.mubr.msk.f32.vlgmr.msra.gmra.mxu0 %vm219_vm5, %v858_v24 }
0x107d   :  { %2386 = vmatpush3.msra.mxu0 %v1081_v20  ;;  %2393 = vmatprep.mubr.msk.f32.mxu0 %vm219_vm5, %v1082_v26 }
0x107e   :  { %2387 = vmatprep.subr.mxu0 %v1080_v25 }
0x107f   :  { %2388 = vmatpush3.msra.mxu0 %v1080_v25 }
0x1080   :  { %2389 = vmatprep.subr.mxu0 %v1079_v27 }
0x1081   :  { %2390 = vmatpush3.msra.mxu0 %v1079_v27 }
0x1082   :  { %2391 = vmatprep.subr.mxu0 %v1078_v28 }
0x1083   :  { %2392 = vmatpush3.msra.mxu0 %v1078_v28  ;;  %v1087_v33 = vld [vmem:[#allocation3 + $0x28] sm:$0xff] }
0x1084   :  { %2394 = vmatmul.mubr.msk.f32.vlgmr.msra.gmra.mxu0 %vm219_vm5, %v1083_v29  ;;  %2427 = vmatprep.subr.mxu0 %v2647_v0 }
0x1085   :  { %2396 = vmatprep.mubr.msk.f32.mxu0 %vm219_vm5, %v1084_v30  ;;  %2428 = vmatpush3.msra.mxu0 %v2942_v49 }
0x1086   :  { %2429 = vmatprep.subr.mxu0 %v2647_v0 }
0x1087   :  { %2430 = vmatpush3.msra.mxu0 %v2948_v50 }
0x1088   :  { %2397 = vmatmul.mubr.msk.f32.gmra.mxu0 %vm219_vm5, %v1085_v31  ;;  %2431 = vmatprep.subr.mxu0 %v2647_v0 }
0x1089   :  { %2399 = vmatprep.mubr.msk.f32.mxu0 %vm219_vm5, %v1086_v32  ;;  %2432 = vmatpush3.msra.mxu0 %v2955_v51 }
0x108a   :  { %2433 = vmatprep.subr.mxu0 %v2647_v0 }
0x108b   :  { %2434 = vmatpush3.msra.mxu0 %v2962_v52 }
0x108c   :  { %2400 = vmatmul.mubr.msk.f32.gmra.mxu0 %vm219_vm5, %v1087_v33  ;;  %2449 = vmatprep.subr.mxu0 %v2647_v0 }
0x113c   :  { %v936_v35 = vpop.f32.mrf.mxu0 }
0x113d   :  { %v940_v36 = vadd.f32 %v936_v35, %v198_v34 }
0x113e   :  { %v2373_v37 = vpop.f32.mrf.mxu0 }
0x113f   :  { %v941_v38 = vmul.f32 0.5, %v940_v36 }
0x1141   :  { %v942_v39 = vsel %vm2766_vm4, %v940_v36, %v941_v38 }
0x1142   :  { %2537 = vtanh.f32 %v942_v39 }
0x1144   :  { %v2395_v58 = vpop.f32.mrf.mxu0 }
0x1145   :  { %v1194_v36 = vadd.f32 %v2395_v58, %v2997_v4 }
0x1146   :  { %v1188_v3 = vpop.f32.mrf.mxu0 }
0x1147   :  { %v1189_v2 = vadd.f32 %v2997_v4, %v1188_v3 }
0x114f   :  { %v2538_v40 = vpop.eup %2537 }
0x1150   :  { %v944_v41 = vmul.f32 0.5, %v2538_v40 }
0x1152   :  { %v945_v42 = vadd.f32 0.5, %v944_v41 }
0x1154   :  { %v946_v43 = vsel %vm2766_vm4, %v2538_v40, %v945_v42 }
0x1155   :  { %949 = vrot.lane.b32.xlu0 %v946_v43, %s2649_s26  ;;  %v947_v63 = vmul.f32 %v946_v43, %v849_v19 }
0x11c7   :  { %v950_v44 = vpop.permute.xlu0 %949 }
0x11c8   :  { %v952_v45 = vmul.f32 %v950_v44, %v946_v43 }
0x11ca   :  { %954 = vrot.lane.b32.xlu1 %v952_v45, %s2650_s27 }
0x123c   :  { %v955_v46 = vpop.permute.xlu1 %954 }
0x123d   :  { %v2935_v47 = vadd.f32 %v955_v46, %v947_v63 }
0x123f   :  { %2539 = vtanh.f32 %v2935_v47 }
0x124c   :  { %v2540_v48 = vpop.eup %2539 }
0x124d   :  { %960 = vrot.lane.b32.xlu0 %v2540_v48, %s2649_s26 }
0x12bf   :  { %v961_v53 = vpop.permute.xlu0 %960 }
0x12c0   :  { %v963_v54 = vmul.f32 %v961_v53, %v946_v43 }
0x12c2   :  { %965 = vrot.lane.b32.xlu1 %v963_v54, %s2650_s27 }
0x1334   :  { %v966_v55 = vpop.permute.xlu1 %965 }
0x1335   :  { %969 = vst.msk [vmem:[#allocation3 + $0x30] sm:$0xff] %vm219_vm5, %v966_v55  ;;  %2383 = vmatmul.mubr.msk.f32.vlgmr.msra.gmra.mxu1 %vm219_vm5, %v966_v55 }
0x1336   :  { %2406 = vmatpush3.msra.mxu1 %v2942_v49  ;;  %2413 = vmatprep.mubr.msk.f32.mxu1 %vm2648_vm0, %v2647_v0 }
0x1337   :  { %2407 = vmatprep.subr.mxu1 %v2647_v0 }
0x1338   :  { %2408 = vmatpush3.msra.mxu1 %v2948_v50 }
0x1339   :  { %2409 = vmatprep.subr.mxu1 %v2647_v0 }
0x133a   :  { %2410 = vmatpush3.msra.mxu1 %v2955_v51 }
0x133b   :  { %2411 = vmatprep.subr.mxu1 %v2647_v0 }
0x133c   :  { %2412 = vmatpush3.msra.mxu1 %v2962_v52  ;;  %v1088_v56 = vld [vmem:[#allocation3 + $0x30] sm:$0xff] }
0x133d   :  { %2414 = vmatmul.mubr.f32.vlgmr.msra.gmra.mxu1 %v2647_v0  ;;  %2402 = vmatprep.mubr.msk.f32.mxu0 %vm219_vm5, %v1088_v56 }
0x133e   :  { %2416 = vmatprep.subr.mxu1 %v2647_v0  ;;  %2424 = vmatprep.mubr.msk.f32.mxu1 %vm2648_vm0, %v2647_v0 }
0x133f   :  { %2417 = vmatpush3.msra.mxu1 %v2942_v49 }
0x1340   :  { %2418 = vmatprep.subr.mxu1 %v2647_v0 }
0x1341   :  { %2419 = vmatpush3.msra.mxu1 %v2948_v50 }
0x1342   :  { %2420 = vmatprep.subr.mxu1 %v2647_v0 }
0x1343   :  { %2421 = vmatpush3.msra.mxu1 %v2955_v51 }
0x1344   :  { %2422 = vmatprep.subr.mxu1 %v2647_v0 }
0x1345   :  { %2423 = vmatpush3.msra.mxu1 %v2962_v52 }
0x1346   :  { %2438 = vmatprep.subr.mxu1 %v2647_v0 }
0x13f5   :  { %v1044_v59 = vpop.f32.mrf.mxu1 }
0x13f6   :  { %v1048_v61 = vadd.f32 %v1044_v59, %v203_v57 }
0x13f7   :  { %v2384_v1 = vpop.f32.mrf.mxu1 }
0x13f8   :  { %v1049_v7 = vmul.f32 0.5, %v1048_v61 }
0x13fa   :  { %v1050_v17 = vsel %vm2766_vm4, %v1048_v61, %v1049_v7  ;;  %v2398_v61 = vpop.f32.mrf.mxu0 }
0x13fc   :  { %v1198_v1 = vpop.f32.mrf.mxu0 }
0x13fd   :  { %v1307_v8 = vpop.f32.mrf.mxu1 }
0x13fe   :  { %v1311_v9 = vadd.f32 %v1307_v8, %v1189_v2  ;;  %v3052_v3 = vpop.f32.mrf.mxu0 }
0x13ff   :  { %v2415_v11 = vpop.f32.mrf.mxu1 }
0x1400   :  { %v1312_v12 = vmul.f32 0.5, %v1311_v9  ;;  %v3054_v2 = vpop.f32.mrf.mxu0  ;;  %v1199_v11 = vadd.f32 %v2997_v4, %v1198_v1 }
0x1402   :  { %v1313_v5 = vsel %vm2766_vm4, %v1311_v9, %v1312_v12 }
0x1403   :  { %2541 = vtanh.f32 %v1313_v5 }
0x1404   :  { %2543 = vtanh.f32 %v1050_v17 }
0x1410   :  { %v2542_v10 = vpop.eup %2541 }
0x1411   :  { %v1315_v62 = vmul.f32 0.5, %v2542_v10  ;;  %v2544_v20 = vpop.eup %2543 }
0x1412   :  { %v1052_v21 = vmul.f32 0.5, %v2544_v20 }
0x1413   :  { %v1316_v13 = vadd.f32 0.5, %v1315_v62 }
0x1414   :  { %v1053_v23 = vadd.f32 0.5, %v1052_v21 }
0x1415   :  { %v1317_v14 = vsel %vm2766_vm4, %v2542_v10, %v1316_v13 }
0x1416   :  { %1320 = vrot.lane.b32.xlu0 %v1317_v14, %s2649_s26  ;;  %v1318_v60 = vmul.f32 0.0, %v1317_v14  ;;  %v1054_v24 = vsel %vm2766_vm4, %v2544_v20, %v1053_v23 }
0x1417   :  { %v1055_v30 = vmul.f32 %v1054_v24, %v2935_v47 }
0x1488   :  { %v1321_v6 = vpop.permute.xlu0 %1320 }
0x1489   :  { %v1323_v15 = vmul.f32 %v1321_v6, %v1317_v14 }
0x148b   :  { %1325 = vrot.lane.b32.xlu1 %v1323_v15, %s2650_s27 }
0x14fd   :  { %v1326_v18 = vpop.permute.xlu1 %1325 }
0x14fe   :  { %v1328_v19 = vadd.f32 %v1326_v18, %v1318_v60 }
0x1500   :  { %2545 = vtanh.f32 %v1328_v19 }
0x150d   :  { %v2546_v22 = vpop.eup %2545 }
0x150e   :  { %1331 = vrot.lane.b32.xlu0 %v2546_v22, %s2649_s26 }
0x1512   :  { %1057 = vrot.lane.b32.xlu0 %v1054_v24, %s2649_s26 }
0x1580   :  { %v1332_v25 = vpop.permute.xlu0 %1331 }
0x1581   :  { %v1334_v26 = vmul.f32 %v1332_v25, %v1317_v14  ;;  %v1204_v25 = vadd.f32 %v2398_v61, %v2997_v4 }
0x1583   :  { %1337 = vrot.lane.b32.xlu1 %v1334_v26, %s2650_s27 }
0x1584   :  { %v1058_v27 = vpop.permute.xlu0 %1057 }
0x1585   :  { %v1060_v28 = vmul.f32 %v1058_v27, %v1054_v24 }
0x1587   :  { %1062 = vrot.lane.b32.xlu0 %v1060_v28, %s2650_s27 }
0x15f5   :  { %v1338_v29 = vpop.permute.xlu1 %1337 }
0x15f6   :  { %2425 = vmatmul.mubr.msk.f32.vlgmr.msra.gmra.mxu1 %vm219_vm5, %v1338_v29 }
0x15f7   :  { %2439 = vmatpush3.msra.mxu1 %v2942_v49  ;;  %2446 = vmatprep.mubr.msk.f32.mxu1 %vm2648_vm0, %v2647_v0 }
0x15f8   :  { %2440 = vmatprep.subr.mxu1 %v2647_v0 }
0x15f9   :  { %v1063_v31 = vpop.permute.xlu0 %1062  ;;  %2441 = vmatpush3.msra.mxu1 %v2948_v50 }
0x15fa   :  { %v1065_v32 = vadd.f32 %v1063_v31, %v1055_v30  ;;  %2442 = vmatprep.subr.mxu1 %v2647_v0 }
0x15fb   :  { %2443 = vmatpush3.msra.mxu1 %v2955_v51 }
0x15fc   :  { %2547 = vtanh.f32 %v1065_v32  ;;  %2444 = vmatprep.subr.mxu1 %v2647_v0 }
0x15fd   :  { %2445 = vmatpush3.msra.mxu1 %v2962_v52 }
0x15fe   :  { %2460 = vmatprep.subr.mxu1 %v2647_v0 }
0x1609   :  { %v2548_v33 = vpop.eup %2547 }
0x160a   :  { %1068 = vrot.lane.b32.xlu0 %v2548_v33, %s2649_s26 }
0x167c   :  { %v1069_v34 = vpop.permute.xlu0 %1068 }
0x167d   :  { %v1071_v35 = vmul.f32 %v1069_v34, %v1054_v24 }
0x167f   :  { %1073 = vrot.lane.b32.xlu0 %v1071_v35, %s2650_s27 }
0x16b6   :  { %v1407_v37 = vpop.f32.mrf.mxu1 }
0x16b7   :  { %v1411_v38 = vadd.f32 %v1407_v37, %v1194_v36 }
0x16b8   :  { %v2426_v39 = vpop.f32.mrf.mxu1 }
0x16b9   :  { %v1412_v40 = vmul.f32 0.5, %v1411_v38 }
0x16bb   :  { %v1413_v41 = vsel %vm2766_vm4, %v1411_v38, %v1412_v40 }
0x16bc   :  { %2549 = vtanh.f32 %v1413_v41 }
0x16c9   :  { %v2550_v42 = vpop.eup %2549 }
0x16ca   :  { %v1415_v43 = vmul.f32 0.5, %v2550_v42 }
0x16cc   :  { %v1416_v44 = vadd.f32 0.5, %v1415_v43 }
0x16ce   :  { %v1417_v45 = vsel %vm2766_vm4, %v2550_v42, %v1416_v44  ;;  %v1209_v44 = vadd.f32 %v2997_v4, %v3054_v2 }
0x16cf   :  { %1420 = vrot.lane.b32.xlu1 %v1417_v45, %s2649_s26  ;;  %v1418_v53 = vmul.f32 %v1417_v45, %v1328_v19 }
0x16f1   :  { %v1074_v63 = vpop.permute.xlu0 %1073 }
0x16f2   :  { %1077 = vst.msk [vmem:[#allocation3 + $0x38] sm:$0xff] %vm219_vm5, %v1074_v63 }
0x16f9   :  { %v1089_v46 = vld [vmem:[#allocation3 + $0x38] sm:$0xff] }
0x16fa   :  { %2403 = vmatmul.mubr.msk.f32.gmra.mxu0 %vm219_vm5, %v1089_v46 }
0x16fb   :  { %2435 = vmatprep.mubr.msk.f32.mxu0 %vm2648_vm0, %v2647_v0 }
0x1741   :  { %v1421_v47 = vpop.permute.xlu1 %1420 }
0x1742   :  { %v1423_v48 = vmul.f32 %v1421_v47, %v1417_v45 }
0x1744   :  { %1425 = vrot.lane.b32.xlu1 %v1423_v48, %s2650_s27 }
0x17b6   :  { %v1426_v54 = vpop.permute.xlu1 %1425 }
0x17b7   :  { %v1428_v55 = vadd.f32 %v1426_v54, %v1418_v53 }
0x17b9   :  { %2551 = vtanh.f32 %v1428_v55 }
0x17ba   :  { %v3056_v8 = vpop.f32.mrf.mxu0 }
0x17bc   :  { %v3058_v9 = vpop.f32.mrf.mxu0 }
0x17c6   :  { %v2552_v56 = vpop.eup %2551 }
0x17c7   :  { %1431 = vrot.lane.b32.xlu1 %v2552_v56, %s2649_s26 }
0x1839   :  { %v1432_v57 = vpop.permute.xlu1 %1431 }
0x183a   :  { %v1434_v58 = vmul.f32 %v1432_v57, %v1417_v45 }
0x183c   :  { %1437 = vrot.lane.b32.xlu1 %v1434_v58, %s2650_s27 }
0x18ae   :  { %v1438_v59 = vpop.permute.xlu1 %1437 }
0x18af   :  { %2436 = vmatmul.mubr.msk.f32.vlgmr.msra.gmra.mxu0 %vm219_vm5, %v1438_v59 }
0x18b0   :  { %2450 = vmatpush3.msra.mxu0 %v2942_v49  ;;  %2457 = vmatprep.mubr.msk.f32.mxu0 %vm2648_vm0, %v2647_v0 }
0x18b1   :  { %2451 = vmatprep.subr.mxu0 %v2647_v0 }
0x18b2   :  { %2452 = vmatpush3.msra.mxu0 %v2948_v50 }
0x18b3   :  { %2453 = vmatprep.subr.mxu0 %v2647_v0 }
0x18b4   :  { %2454 = vmatpush3.msra.mxu0 %v2955_v51 }
0x18b5   :  { %2455 = vmatprep.subr.mxu0 %v2647_v0 }
0x18b6   :  { %2456 = vmatpush3.msra.mxu0 %v2962_v52 }
0x18b7   :  { %2471 = vmatprep.subr.mxu0 %v2647_v0 }
0x196f   :  { %v1507_v12 = vpop.f32.mrf.mxu0 }
0x1970   :  { %v1511_v5 = vadd.f32 %v1507_v12, %v1199_v11 }
0x1971   :  { %v2437_v10 = vpop.f32.mrf.mxu0 }
0x1972   :  { %v1512_v62 = vmul.f32 0.5, %v1511_v5  ;;  %v1214_v10 = vadd.f32 %v3052_v3, %v2997_v4 }
0x1974   :  { %v1513_v13 = vsel %vm2766_vm4, %v1511_v5, %v1512_v62 }
0x1975   :  { %2553 = vtanh.f32 %v1513_v13 }
0x1982   :  { %v2554_v14 = vpop.eup %2553 }
0x1983   :  { %v1515_v6 = vmul.f32 0.5, %v2554_v14 }
0x1985   :  { %v1516_v15 = vadd.f32 0.5, %v1515_v6 }
0x1987   :  { %v1517_v7 = vsel %vm2766_vm4, %v2554_v14, %v1516_v15 }
0x1988   :  { %1520 = vrot.lane.b32.xlu0 %v1517_v7, %s2649_s26  ;;  %v1518_v18 = vmul.f32 %v1517_v7, %v1428_v55 }
0x19fa   :  { %v1521_v17 = vpop.permute.xlu0 %1520 }
0x19fb   :  { %v1523_v60 = vmul.f32 %v1521_v17, %v1517_v7 }
0x19fd   :  { %1525 = vrot.lane.b32.xlu1 %v1523_v60, %s2650_s27 }
0x1a6f   :  { %v1526_v19 = vpop.permute.xlu1 %1525 }
0x1a70   :  { %v1528_v20 = vadd.f32 %v1526_v19, %v1518_v18 }
0x1a72   :  { %2555 = vtanh.f32 %v1528_v20 }
0x1a7f   :  { %v2556_v21 = vpop.eup %2555 }
0x1a80   :  { %1531 = vrot.lane.b32.xlu0 %v2556_v21, %s2649_s26 }
0x1af2   :  { %v1532_v22 = vpop.permute.xlu0 %1531 }
0x1af3   :  { %v1534_v23 = vmul.f32 %v1532_v22, %v1517_v7 }
0x1af5   :  { %1537 = vrot.lane.b32.xlu1 %v1534_v23, %s2650_s27  ;;  %v1219_v23 = vadd.f32 %v2997_v4, %v3058_v9 }
0x1b67   :  { %v1538_v24 = vpop.permute.xlu1 %1537 }
0x1b68   :  { %2447 = vmatmul.mubr.msk.f32.vlgmr.msra.gmra.mxu1 %vm219_vm5, %v1538_v24 }
0x1b69   :  { %2461 = vmatpush3.msra.mxu1 %v2942_v49  ;;  %2468 = vmatprep.mubr.msk.f32.mxu1 %vm2648_vm0, %v2647_v0 }
0x1b6a   :  { %2462 = vmatprep.subr.mxu1 %v2647_v0 }
0x1b6b   :  { %2463 = vmatpush3.msra.mxu1 %v2948_v50 }
0x1b6c   :  { %2464 = vmatprep.subr.mxu1 %v2647_v0 }
0x1b6d   :  { %2465 = vmatpush3.msra.mxu1 %v2955_v51 }
0x1b6e   :  { %2466 = vmatprep.subr.mxu1 %v2647_v0 }
0x1b6f   :  { %2467 = vmatpush3.msra.mxu1 %v2962_v52 }
0x1b70   :  { %2482 = vmatprep.subr.mxu1 %v2647_v0 }
0x1c28   :  { %v1607_v26 = vpop.f32.mrf.mxu1 }
0x1c29   :  { %v1611_v27 = vadd.f32 %v1607_v26, %v1204_v25 }
0x1c2a   :  { %v2448_v28 = vpop.f32.mrf.mxu1 }
0x1c2b   :  { %v1612_v29 = vmul.f32 0.5, %v1611_v27 }
0x1c2d   :  { %v1613_v30 = vsel %vm2766_vm4, %v1611_v27, %v1612_v29 }
0x1c2e   :  { %2557 = vtanh.f32 %v1613_v30 }
0x1c3b   :  { %v2558_v31 = vpop.eup %2557 }
0x1c3c   :  { %v1615_v32 = vmul.f32 0.5, %v2558_v31 }
0x1c3e   :  { %v1616_v33 = vadd.f32 0.5, %v1615_v32 }
0x1c40   :  { %v1617_v34 = vsel %vm2766_vm4, %v2558_v31, %v1616_v33 }
0x1c41   :  { %1620 = vrot.lane.b32.xlu0 %v1617_v34, %s2649_s26  ;;  %v1618_v37 = vmul.f32 %v1617_v34, %v1528_v20 }
0x1cb3   :  { %v1621_v35 = vpop.permute.xlu0 %1620 }
0x1cb4   :  { %v1623_v36 = vmul.f32 %v1621_v35, %v1617_v34 }
0x1cb6   :  { %1625 = vrot.lane.b32.xlu1 %v1623_v36, %s2650_s27 }
0x1d28   :  { %v1626_v38 = vpop.permute.xlu1 %1625 }
0x1d29   :  { %v1628_v39 = vadd.f32 %v1626_v38, %v1618_v37 }
0x1d2b   :  { %2559 = vtanh.f32 %v1628_v39 }
0x1d38   :  { %v2560_v40 = vpop.eup %2559 }
0x1d39   :  { %1631 = vrot.lane.b32.xlu0 %v2560_v40, %s2649_s26 }
0x1dab   :  { %v1632_v41 = vpop.permute.xlu0 %1631 }
0x1dac   :  { %v1634_v42 = vmul.f32 %v1632_v41, %v1617_v34  ;;  %v1224_v41 = vadd.f32 %v3056_v8, %v2997_v4 }
0x1dae   :  { %1637 = vrot.lane.b32.xlu1 %v1634_v42, %s2650_s27 }
0x1e20   :  { %v1638_v43 = vpop.permute.xlu1 %1637 }
0x1e21   :  { %2458 = vmatmul.mubr.msk.f32.vlgmr.msra.gmra.mxu0 %vm219_vm5, %v1638_v43 }
0x1e22   :  { %2472 = vmatpush3.msra.mxu0 %v2942_v49  ;;  %2479 = vmatprep.mubr.msk.f32.mxu0 %vm2648_vm0, %v2647_v0 }
0x1e23   :  { %2473 = vmatprep.subr.mxu0 %v2647_v0 }
0x1e24   :  { %2474 = vmatpush3.msra.mxu0 %v2948_v50 }
0x1e25   :  { %2475 = vmatprep.subr.mxu0 %v2647_v0 }
0x1e26   :  { %2476 = vmatpush3.msra.mxu0 %v2955_v51 }
0x1e27   :  { %2477 = vmatprep.subr.mxu0 %v2647_v0 }
0x1e28   :  { %2478 = vmatpush3.msra.mxu0 %v2962_v52 }
0x1e29   :  { %2493 = vmatprep.subr.mxu0 %v2647_v0 }
0x1ee1   :  { %v1707_v45 = vpop.f32.mrf.mxu0 }
0x1ee2   :  { %v1711_v63 = vadd.f32 %v1707_v45, %v1209_v44 }
0x1ee3   :  { %v2459_v46 = vpop.f32.mrf.mxu0 }
0x1ee4   :  { %v1712_v47 = vmul.f32 0.5, %v1711_v63 }
0x1ee6   :  { %v1713_v48 = vsel %vm2766_vm4, %v1711_v63, %v1712_v47 }
0x1ee7   :  { %2561 = vtanh.f32 %v1713_v48 }
0x1ef4   :  { %v2562_v53 = vpop.eup %2561 }
0x1ef5   :  { %v1715_v54 = vmul.f32 0.5, %v2562_v53 }
0x1ef7   :  { %v1716_v55 = vadd.f32 0.5, %v1715_v54 }
0x1ef9   :  { %v1717_v56 = vsel %vm2766_vm4, %v2562_v53, %v1716_v55 }
0x1efa   :  { %1720 = vrot.lane.b32.xlu0 %v1717_v56, %s2649_s26  ;;  %v1718_v59 = vmul.f32 %v1717_v56, %v1628_v39 }
0x1f6c   :  { %v1721_v57 = vpop.permute.xlu0 %1720 }
0x1f6d   :  { %v1723_v58 = vmul.f32 %v1721_v57, %v1717_v56  ;;  %v2038_v57 = vld [vmem:[#allocation7 + $0x18] sm:$0xff] }
0x1f6f   :  { %1725 = vrot.lane.b32.xlu1 %v1723_v58, %s2650_s27  ;;  %v2037_v58 = vld [vmem:[#allocation7 + $0x10] sm:$0xff] }
0x1fe1   :  { %v1726_v61 = vpop.permute.xlu1 %1725 }
0x1fe2   :  { %v1728_v1 = vadd.f32 %v1726_v61, %v1718_v59  ;;  %v2036_v59 = vld [vmem:[#allocation7 + $0x8] sm:$0xff] }
0x1fe4   :  { %2563 = vtanh.f32 %v1728_v1 }
0x1ff1   :  { %v2564_v2 = vpop.eup %2563 }
0x1ff2   :  { %1731 = vrot.lane.b32.xlu0 %v2564_v2, %s2649_s26 }
0x2064   :  { %v1732_v11 = vpop.permute.xlu0 %1731 }
0x2065   :  { %v1734_v12 = vmul.f32 %v1732_v11, %v1717_v56 }
0x2067   :  { %1737 = vrot.lane.b32.xlu1 %v1734_v12, %s2650_s27  ;;  %v2175_v12 = vld [vmem:[%s3170_s6] ss:$0 sm:$0xff] }
0x20d9   :  { %v1738_v5 = vpop.permute.xlu1 %1737 }
0x20da   :  { %2469 = vmatmul.mubr.msk.f32.vlgmr.msra.gmra.mxu1 %vm219_vm5, %v1738_v5 }
0x20db   :  { %2483 = vmatpush3.msra.mxu1 %v2942_v49  ;;  %2490 = vmatprep.mubr.msk.f32.mxu1 %vm2648_vm0, %v2647_v0 }
0x20dc   :  { %2484 = vmatprep.subr.mxu1 %v2647_v0 }
0x20dd   :  { %2485 = vmatpush3.msra.mxu1 %v2948_v50 }
0x20de   :  { %2486 = vmatprep.subr.mxu1 %v2647_v0 }
0x20df   :  { %2487 = vmatpush3.msra.mxu1 %v2955_v51 }
0x20e0   :  { %2488 = vmatprep.subr.mxu1 %v2647_v0 }
0x20e1   :  { %2489 = vmatpush3.msra.mxu1 %v2962_v52 }
0x219a   :  { %v1807_v62 = vpop.f32.mrf.mxu1 }
0x219b   :  { %v1811_v49 = vadd.f32 %v1807_v62, %v1214_v10 }
0x219c   :  { %v2470_v13 = vpop.f32.mrf.mxu1 }
0x219d   :  { %v1812_v14 = vmul.f32 0.5, %v1811_v49 }
0x219f   :  { %v1813_v6 = vsel %vm2766_vm4, %v1811_v49, %v1812_v14 }
0x21a0   :  { %2565 = vtanh.f32 %v1813_v6 }
0x21ad   :  { %v2566_v50 = vpop.eup %2565 }
0x21ae   :  { %v1815_v15 = vmul.f32 0.5, %v2566_v50 }
0x21b0   :  { %v1816_v7 = vadd.f32 0.5, %v1815_v15 }
0x21b2   :  { %v1817_v51 = vsel %vm2766_vm4, %v2566_v50, %v1816_v7 }
0x21b3   :  { %1820 = vrot.lane.b32.xlu0 %v1817_v51, %s2649_s26  ;;  %v1818_v3 = vmul.f32 %v1817_v51, %v1728_v1 }
0x2225   :  { %v1821_v52 = vpop.permute.xlu0 %1820 }
0x2226   :  { %v1823_v17 = vmul.f32 %v1821_v52, %v1817_v51 }
0x2228   :  { %1825 = vrot.lane.b32.xlu1 %v1823_v17, %s2650_s27 }
0x229a   :  { %v1826_v60 = vpop.permute.xlu1 %1825 }
0x229b   :  { %v1828_v18 = vadd.f32 %v1826_v60, %v1818_v3 }
0x229d   :  { %2567 = vtanh.f32 %v1828_v18 }
0x22aa   :  { %v2568_v19 = vpop.eup %2567 }
0x22ab   :  { %1831 = vrot.lane.b32.xlu0 %v2568_v19, %s2649_s26 }
0x231d   :  { %v1832_v20 = vpop.permute.xlu0 %1831 }
0x231e   :  { %v1834_v21 = vmul.f32 %v1832_v20, %v1817_v51 }
0x2320   :  { %1837 = vrot.lane.b32.xlu1 %v1834_v21, %s2650_s27 }
0x2392   :  { %v1838_v22 = vpop.permute.xlu1 %1837 }
0x2393   :  { %2480 = vmatmul.mubr.msk.f32.vlgmr.msra.gmra.mxu0 %vm219_vm5, %v1838_v22 }
0x2394   :  { %2501 = vmatprep.mubr.msk.f32.mxu0 %vm2648_vm0, %v2647_v0  ;;  %2494 = vmatpush3.msra.mxu0 %v2038_v57 }
0x2395   :  { %2495 = vmatprep.subr.mxu0 %v2647_v0 }
0x2396   :  { %2496 = vmatpush3.msra.mxu0 %v2037_v58 }
0x2397   :  { %2497 = vmatprep.subr.mxu0 %v2647_v0 }
0x2398   :  { %2498 = vmatpush3.msra.mxu0 %v2036_v59 }
0x2399   :  { %2499 = vmatprep.subr.mxu0 %v2647_v0 }
0x239a   :  { %2500 = vmatpush3.msra.mxu0 %v2035_v16 }
0x2453   :  { %v1907_v24 = vpop.f32.mrf.mxu0 }
0x2454   :  { %v1911_v25 = vadd.f32 %v1907_v24, %v1219_v23 }
0x2455   :  { %v2481_v26 = vpop.f32.mrf.mxu0 }
0x2456   :  { %v1912_v27 = vmul.f32 0.5, %v1911_v25 }
0x2458   :  { %v1913_v28 = vsel %vm2766_vm4, %v1911_v25, %v1912_v27 }
0x2459   :  { %2569 = vtanh.f32 %v1913_v28 }
0x2466   :  { %v2570_v29 = vpop.eup %2569 }
0x2467   :  { %v1915_v30 = vmul.f32 0.5, %v2570_v29 }
0x2469   :  { %v1916_v31 = vadd.f32 0.5, %v1915_v30 }
0x246b   :  { %v1917_v32 = vsel %vm2766_vm4, %v2570_v29, %v1916_v31 }
0x246c   :  { %1920 = vrot.lane.b32.xlu0 %v1917_v32, %s2649_s26  ;;  %v1918_v9 = vmul.f32 %v1917_v32, %v1828_v18 }
0x24de   :  { %v1921_v33 = vpop.permute.xlu0 %1920 }
0x24df   :  { %v1923_v34 = vmul.f32 %v1921_v33, %v1917_v32 }
0x24e1   :  { %1925 = vrot.lane.b32.xlu1 %v1923_v34, %s2650_s27 }
0x2553   :  { %v1926_v35 = vpop.permute.xlu1 %1925 }
0x2554   :  { %v1928_v36 = vadd.f32 %v1926_v35, %v1918_v9 }
0x2556   :  { %2571 = vtanh.f32 %v1928_v36 }
0x2563   :  { %v2572_v37 = vpop.eup %2571 }
0x2564   :  { %1931 = vrot.lane.b32.xlu0 %v2572_v37, %s2649_s26 }
0x25d6   :  { %v1932_v38 = vpop.permute.xlu0 %1931 }
0x25d7   :  { %v1934_v39 = vmul.f32 %v1932_v38, %v1917_v32 }
0x25d9   :  { %1937 = vrot.lane.b32.xlu1 %v1934_v39, %s2650_s27 }
0x264b   :  { %v1938_v40 = vpop.permute.xlu1 %1937 }
0x264c   :  { %2491 = vmatmul.mubr.msk.f32.vlgmr.msra.gmra.mxu1 %vm219_vm5, %v1938_v40 }
0x270c   :  { %v2007_v42 = vpop.f32.mrf.mxu1 }
0x270d   :  { %v2011_v43 = vadd.f32 %v2007_v42, %v1224_v41 }
0x270e   :  { %v2492_v44 = vpop.f32.mrf.mxu1 }
0x270f   :  { %v2012_v45 = vmul.f32 0.5, %v2011_v43 }
0x2711   :  { %v2013_v63 = vsel %vm2766_vm4, %v2011_v43, %v2012_v45 }
0x2712   :  { %2573 = vtanh.f32 %v2013_v63 }
0x271f   :  { %v2574_v46 = vpop.eup %2573 }
0x2720   :  { %v2015_v47 = vmul.f32 0.5, %v2574_v46 }
0x2722   :  { %v2016_v48 = vadd.f32 0.5, %v2015_v47 }
0x2724   :  { %v2017_v53 = vsel %vm2766_vm4, %v2574_v46, %v2016_v48 }
0x2725   :  { %2020 = vrot.lane.b32.xlu0 %v2017_v53, %s2649_s26  ;;  %v2018_v4 = vmul.f32 %v2017_v53, %v1928_v36 }
0x2797   :  { %v2021_v54 = vpop.permute.xlu0 %2020 }
0x2798   :  { %v2023_v55 = vmul.f32 %v2021_v54, %v2017_v53 }
0x279a   :  { %2025 = vrot.lane.b32.xlu1 %v2023_v55, %s2650_s27 }
0x280c   :  { %v2026_v8 = vpop.permute.xlu1 %2025 }
0x280d   :  { %v2028_v56 = vadd.f32 %v2026_v8, %v2018_v4 }
0x280f   :  { %2575 = vtanh.f32 %v2028_v56 }
0x281c   :  { %v2576_v61 = vpop.eup %2575 }
0x281d   :  { %2031 = vrot.lane.b32.xlu0 %v2576_v61, %s2649_s26 }
0x288f   :  { %v2032_v1 = vpop.permute.xlu0 %2031 }
0x2890   :  { %v2034_v2 = vmul.f32 %v2032_v1, %v2017_v53 }
0x2892   :  { %2047 = vrot.lane.b32.xlu1 %v2034_v2, %s2650_s27 }
0x2904   :  { %v2048_v11 = vpop.permute.xlu1 %2047 }
0x2905   :  { %2502 = vmatmul.mubr.msk.f32.vlgmr.msra.gmra.mxu0 %vm219_vm5, %v2048_v11 }
0x29c5   :  { %v2117_v5 = vpop.f32.mrf.mxu0 }
0x29c6   :  { %v2118_v10 = vadd.f32 %v2175_v12, %v2117_v5 }
0x29c7   :  { %v2503_v0 = vpop.f32.mrf.mxu0 }
0x29c8   :  { %2121 = vst [vmem:[#allocation9] sm:$0xff] %v2118_v10 }
0x29c9   :  { %2628 = shalt.err (!%p2625_p0)
}
0x29ca   :  { %2131 = dma.vmem_to_hbm [thread:$0]  %s2129_s24, 128, %s3171_s7, [#allocation6]  }
0x29cb   :  { %2641 = dma.done.wait [#allocation6], 128  }
0x29cc   :  { %2642 = vsyncadd [#allocation6], 4294967168 }
0x29cd   :  { %2135 = vsyncpa [#allocation5], 1 }
0x29ce   :  { %2136 = vsyncpa [#allocation8], 1 }
0x29cf   :  { %2137 = vsyncpa [#allocation6], 1 }

</bundles_post_ra>
